<compile_context>
chip_gen: v6e
topology: v6e:2x2x1
jax: 0.10.0
libtpu: 0.0.40
codegen_flags: <defaults>
</compile_context>

<pallas_src>
import jax
import jax.numpy as jnp
import numpy as np
from jax import lax
from jax.experimental import pallas as pl
from jax.experimental.pallas import tpu as pltpu


def fused_net_kernel(x_ref, a1_ref, b1_ref, a2_ref, b2_ref,
                     wf1_ref, bf1_ref, wf2_ref, bf2_ref, o_ref):
    """Whole Net forward for one batch tile.

    x_ref:   (BT, 28, 28)    input images (Cin = 1), f32
    a1_ref:  (5, 28, 480)    conv1 banded weights, bf16.  col = (j%2)*240 + (j//2)*20 + c
    b1_ref:  (1, 240)        conv1 bias tiled over pooled-j, f32
    a2_ref:  (5, 240, 400)   conv2 banded weights, bf16.  col = (j%2)*200 + (j//2)*50 + c2
    b2_ref:  (1, 200)        conv2 bias tiled over pooled-j, f32
    wf1_ref: (800, 500)      fc1 weight (rows permuted to kernel flatten order), bf16
    wf2_ref: (500, 128)      fc2 weight zero-padded to 128 output lanes, bf16
    o_ref:   (1, BT, 128)    logits (first 10 lanes valid)
    """
    bt = x_ref.shape[0]
    f32 = jnp.float32
    bf16 = jnp.bfloat16

    xb = x_ref[...].astype(bf16)                               # (bt, 28, 28)

    # ---- conv1: 5 accumulating MXU dots against banded weights ----
    y1 = jnp.zeros((bt, 24, 480), f32)
    for kh in range(5):
        lhs = xb[:, kh:kh + 24, :].reshape(bt * 24, 28)        # sublane slice only
        y1 = y1 + jnp.dot(lhs, a1_ref[kh],
                          preferred_element_type=f32).reshape(bt, 24, 480)

    # ---- 2x2/2 max-pool, then bias + ReLU (exact reordering) ----
    pw = jnp.maximum(y1[:, :, :240], y1[:, :, 240:])           # W-pool: contiguous halves
    pw = pw.reshape(bt, 12, 2, 240)
    h1 = jnp.maximum(pw[:, :, 0, :], pw[:, :, 1, :])           # H-pool  (bt, 12, 240)
    h1 = jnp.maximum(h1 + b1_ref[...], 0.0)
    h1b = h1.astype(bf16)

    # ---- conv2: 5 accumulating MXU dots against banded weights ----
    y2 = jnp.zeros((bt, 8, 400), f32)
    for kh in range(5):
        lhs = h1b[:, kh:kh + 8, :].reshape(bt * 8, 240)        # sublane slice only
        y2 = y2 + jnp.dot(lhs, a2_ref[kh],
                          preferred_element_type=f32).reshape(bt, 8, 400)

    pw2 = jnp.maximum(y2[:, :, :200], y2[:, :, 200:])          # W-pool
    pw2 = pw2.reshape(bt, 4, 2, 200)
    h2 = jnp.maximum(pw2[:, :, 0, :], pw2[:, :, 1, :])         # H-pool  (bt, 4, 200)
    h2 = jnp.maximum(h2 + b2_ref[...], 0.0)

    # ---- flatten (ii, jj, c2 order; fc1 rows pre-permuted to match) ----
    f = h2.reshape(bt, 800).astype(bf16)

    # ---- fc1 + ReLU, fc2 (lane-dense 128-wide output) ----
    z1 = jnp.dot(f, wf1_ref[...], preferred_element_type=f32) + bf1_ref[...]
    z1 = jnp.maximum(z1, 0.0).astype(bf16)
    o_ref[0] = jnp.dot(z1, wf2_ref[...], preferred_element_type=f32) + bf2_ref[...]


def preprocess_params(params):
    """One-time repack of PyTorch-layout params into kernel layout (off hot path)."""
    f32 = np.float32
    w1 = np.asarray(params["conv1_w"], f32)    # (20, 1, 5, 5)  OIHW
    b1 = np.asarray(params["conv1_b"], f32)    # (20,)
    w2 = np.asarray(params["conv2_w"], f32)    # (50, 20, 5, 5) OIHW
    b2 = np.asarray(params["conv2_b"], f32)    # (50,)
    fw1 = np.asarray(params["fc1_w"], f32)     # (500, 800)
    fb1 = np.asarray(params["fc1_b"], f32)     # (500,)
    fw2 = np.asarray(params["fc2_w"], f32)     # (10, 500)
    fb2 = np.asarray(params["fc2_b"], f32)     # (10,)

    K = 5
    # conv1 banded weights: a1[kh, j+kw, col(j,c)] = w1[c, 0, kh, kw]
    # col(j, c) = (j % 2) * 240 + (j // 2) * 20 + c   (pool phase | pooled-j | channel)
    a1 = np.zeros((K, 28, 480), f32)
    for kh in range(K):
        for kw in range(K):
            for j in range(24):
                col = (j % 2) * 240 + (j // 2) * 20
                a1[kh, j + kw, col:col + 20] = w1[:, 0, kh, kw]
    b1_240 = np.tile(b1, 12).reshape(1, 240)

    # conv2 banded weights: a2[kh, (j+kw)*20 + c1, col2(j,c2)] = w2[c2, c1, kh, kw]
    # col2(j, c2) = (j % 2) * 200 + (j // 2) * 50 + c2
    a2 = np.zeros((K, 240, 400), f32)
    for kh in range(K):
        for kw in range(K):
            for j in range(8):
                row = (j + kw) * 20
                col = (j % 2) * 200 + (j // 2) * 50
                a2[kh, row:row + 20, col:col + 50] = w2[:, :, kh, kw].T
    b2_200 = np.tile(b2, 4).reshape(1, 200)

    # fc1: PyTorch flattens (c2, ii, jj); kernel flattens (ii, jj, c2).  Fold once.
    wf1 = fw1.reshape(500, 50, 4, 4).transpose(2, 3, 1, 0).reshape(800, 500)
    # fc2: zero-pad output dim to 128 lanes (lane-dense store).
    wf2 = np.zeros((500, 128), f32)
    wf2[:, :10] = fw2.T
    bf2 = np.zeros((1, 128), f32)
    bf2[0, :10] = fb2

    bf16 = jnp.bfloat16
    return {
        "a1": jnp.asarray(a1, bf16),  "b1": jnp.asarray(b1_240, jnp.float32),
        "a2": jnp.asarray(a2, bf16),  "b2": jnp.asarray(b2_200, jnp.float32),
        "wf1": jnp.asarray(wf1, bf16), "bf1": jnp.asarray(fb1.reshape(1, 500), jnp.float32),
        "wf2": jnp.asarray(wf2, bf16), "bf2": jnp.asarray(bf2, jnp.float32),
    }


@jax.jit
def net_forward(x_nchw, packed):
    B, Cin, H, W = x_nchw.shape
    assert Cin == 1 and H == 28 and W == 28
    # Cin == 1: NCHW and NHWC have identical element order -> pure reshape.
    x = x_nchw.reshape(B, H, W)

    # Batch tile: big enough to feed the MXU M-dim, capped to keep per-tile
    # intermediates well inside v7x's 64 MiB VMEM; >= 2 tiles whenever B >= 2 so
    # the "parallel" grid axis can shard across two TensorCores.
    BT = max(1, min(64, pl.cdiv(B, 2)))
    n_tiles = pl.cdiv(B, BT)
    B_pad = n_tiles * BT
    if B_pad != B:
        x = jnp.pad(x, ((0, B_pad - B), (0, 0), (0, 0)))

    weight_bytes = sum(int(np.prod(v.shape)) * v.dtype.itemsize for v in packed.values())
    cost = pl.CostEstimate(
        flops=2 * B_pad * (576 * 25 * 20 + 64 * 500 * 50 + 800 * 500 + 500 * 10),
        transcendentals=0,
        bytes_accessed=int(weight_bytes + B_pad * H * W * 4 + B_pad * 128 * 4),
    )

    out = pl.pallas_call(
        fused_net_kernel,
        out_shape=jax.ShapeDtypeStruct((n_tiles, BT, 128), jnp.float32),
        grid=(n_tiles,),
        in_specs=[
            pl.BlockSpec((BT, H, W), lambda i: (i, 0, 0)),
            # weights/biases: constant index maps -> stay VMEM-resident, never re-DMA'd
            pl.BlockSpec((5, 28, 480), lambda i: (0, 0, 0)),
            pl.BlockSpec((1, 240), lambda i: (0, 0)),
            pl.BlockSpec((5, 240, 400), lambda i: (0, 0, 0)),
            pl.BlockSpec((1, 200), lambda i: (0, 0)),
            pl.BlockSpec((800, 500), lambda i: (0, 0)),
            pl.BlockSpec((1, 500), lambda i: (0, 0)),
            pl.BlockSpec((500, 128), lambda i: (0, 0)),
            pl.BlockSpec((1, 128), lambda i: (0, 0)),
        ],
        out_specs=pl.BlockSpec((1, BT, 128), lambda i: (i, 0, 0)),
        compiler_params=pltpu.CompilerParams(
            dimension_semantics=("parallel",),          # v7x: 2 TCs split batch tiles
            vmem_limit_bytes=48 * 1024 * 1024,
        ),
        cost_estimate=cost,
    )(x, packed["a1"], packed["b1"], packed["a2"], packed["b2"],
      packed["wf1"], packed["bf1"], packed["wf2"], packed["bf2"])
    return out.reshape(B_pad, 128)[:B, :10]


def reference_forward(x_nchw, params):
    """Pure-JAX reference reproducing the PyTorch forward exactly (f32, HIGHEST)."""
    dn = ("NCHW", "OIHW", "NCHW")
    hi = lax.Precision.HIGHEST
    y = lax.conv_general_dilated(x_nchw, params["conv1_w"], (1, 1), "VALID",
                                 dimension_numbers=dn, precision=hi)
    y = jnp.maximum(y + params["conv1_b"][None, :, None, None], 0.0)
    y = lax.reduce_window(y, -jnp.inf, lax.max, (1, 1, 2, 2), (1, 1, 2, 2), "VALID")
    y = lax.conv_general_dilated(y, params["conv2_w"], (1, 1), "VALID",
                                 dimension_numbers=dn, precision=hi)
    y = jnp.maximum(y + params["conv2_b"][None, :, None, None], 0.0)
    y = lax.reduce_window(y, -jnp.inf, lax.max, (1, 1, 2, 2), (1, 1, 2, 2), "VALID")
    y = y.reshape(y.shape[0], -1)
    y = jnp.maximum(jnp.dot(y, params["fc1_w"].T, precision=hi) + params["fc1_b"], 0.0)
    y = jnp.dot(y, params["fc2_w"].T, precision=hi) + params["fc2_b"]
    return y


def init_params(key):
    ks = jax.random.split(key, 8)

    def u(k, shape, fan_in):
        bound = 1.0 / np.sqrt(fan_in)
        return jax.random.uniform(k, shape, jnp.float32, -bound, bound)

    return {
        "conv1_w": u(ks[0], (20, 1, 5, 5), 1 * 5 * 5),
        "conv1_b": u(ks[1], (20,), 1 * 5 * 5),
        "conv2_w": u(ks[2], (50, 20, 5, 5), 20 * 5 * 5),
        "conv2_b": u(ks[3], (50,), 20 * 5 * 5),
        "fc1_w": u(ks[4], (500, 800), 800),
        "fc1_b": u(ks[5], (500,), 800),
        "fc2_w": u(ks[6], (10, 500), 500),
        "fc2_b": u(ks[7], (10,), 500),
    }


if __name__ == "__main__":
    root = jax.random.PRNGKey(0)
    pkey, xkey = jax.random.split(root)
    params = init_params(pkey)
    packed = preprocess_params(params)          # one-time weight repack (off hot path)

    # 28x28 input is required by the module's view(-1, 4*4*50); keep batch small.
    x = jax.random.normal(xkey, (2, 1, 28, 28), jnp.float32)

    out = jax.block_until_ready(net_forward(x, packed))
    ref = jax.block_until_ready(reference_forward(x, params))

    assert out.shape == (2, 10) and out.dtype == jnp.float32
    np.testing.assert_allclose(np.asarray(out), np.asarray(ref), rtol=5e-2, atol=5e-2)
    print("KERNEL_OK")
</pallas_src>

<mosaic_0001>
module attributes {stable_mosaic.version = 11 : i64} {
  func.func @fused_net_kernel(%arg0: i32, %arg1: memref<1x28x28xf32, #tpu.memory_space<vmem>>, %arg2: memref<5x28x480xbf16, #tpu.memory_space<vmem>>, %arg3: memref<1x240xf32, #tpu.memory_space<vmem>>, %arg4: memref<5x240x400xbf16, #tpu.memory_space<vmem>>, %arg5: memref<1x200xf32, #tpu.memory_space<vmem>>, %arg6: memref<800x500xbf16, #tpu.memory_space<vmem>>, %arg7: memref<1x500xf32, #tpu.memory_space<vmem>>, %arg8: memref<500x128xbf16, #tpu.memory_space<vmem>>, %arg9: memref<1x128xf32, #tpu.memory_space<vmem>>, %arg10: memref<1x1x128xf32, #tpu.memory_space<vmem>>) attributes {dimension_semantics = [#tpu.dimension_semantics<parallel>], iteration_bounds = array<i64: 2>, scalar_prefetch = 0 : i64, scratch_operands = 0 : i64, tpu.core_type = #tpu.core_type<tc>, window_params = [{transform_indices = @transform_0, window_bounds = array<i64: 1, 28, 28>}, {pipeline_mode = #tpu.pipeline_mode<synchronous>, transform_indices = @transform_1, window_bounds = array<i64: 5, 28, 480>}, {pipeline_mode = #tpu.pipeline_mode<synchronous>, transform_indices = @transform_2, window_bounds = array<i64: 1, 240>}, {pipeline_mode = #tpu.pipeline_mode<synchronous>, transform_indices = @transform_3, window_bounds = array<i64: 5, 240, 400>}, {pipeline_mode = #tpu.pipeline_mode<synchronous>, transform_indices = @transform_4, window_bounds = array<i64: 1, 200>}, {pipeline_mode = #tpu.pipeline_mode<synchronous>, transform_indices = @transform_5, window_bounds = array<i64: 800, 500>}, {pipeline_mode = #tpu.pipeline_mode<synchronous>, transform_indices = @transform_6, window_bounds = array<i64: 1, 500>}, {pipeline_mode = #tpu.pipeline_mode<synchronous>, transform_indices = @transform_7, window_bounds = array<i64: 500, 128>}, {pipeline_mode = #tpu.pipeline_mode<synchronous>, transform_indices = @transform_8, window_bounds = array<i64: 1, 128>}, {transform_indices = @transform_9, window_bounds = array<i64: 1, 1, 128>}]} {
    %c0 = arith.constant 0 : index
    %c0_0 = arith.constant 0 : index
    %c0_1 = arith.constant 0 : index
    %0 = vector.load %arg1[%c0, %c0_0, %c0_1] : memref<1x28x28xf32, #tpu.memory_space<vmem>>, vector<1x28x28xf32>
    %1 = arith.truncf %0 : vector<1x28x28xf32> to vector<1x28x28xbf16>
    %cst = arith.constant 0.000000e+00 : f32
    %2 = vector.broadcast %cst : f32 to vector<1x24x480xf32>
    %3 = vector.extract_strided_slice %1 {offsets = [0, 0, 0], sizes = [1, 24, 28], strides = [1, 1, 1]} : vector<1x28x28xbf16> to vector<1x24x28xbf16>
    %4 = vector.shape_cast %3 : vector<1x24x28xbf16> to vector<24x28xbf16>
    %c0_2 = arith.constant 0 : index
    %c0_3 = arith.constant 0 : index
    %c0_4 = arith.constant 0 : index
    %5 = vector.load %arg2[%c0_2, %c0_3, %c0_4] : memref<5x28x480xbf16, #tpu.memory_space<vmem>>, vector<1x28x480xbf16>
    %6 = vector.shape_cast %5 : vector<1x28x480xbf16> to vector<28x480xbf16>
    %cst_5 = arith.constant dense<0.000000e+00> : vector<24x480xf32>
    %7 = tpu.matmul %4, %6, %cst_5 {dimension_numbers = #tpu.dot_dimension_numbers<[1], [0], [0], [1], [0, 0, 1, 1], [], []>} : vector<24x28xbf16>, vector<28x480xbf16>, vector<24x480xf32> -> vector<24x480xf32>
    %8 = vector.shape_cast %7 : vector<24x480xf32> to vector<1x24x480xf32>
    %9 = arith.addf %2, %8 : vector<1x24x480xf32>
    %10 = vector.extract_strided_slice %1 {offsets = [0, 1, 0], sizes = [1, 24, 28], strides = [1, 1, 1]} : vector<1x28x28xbf16> to vector<1x24x28xbf16>
    %11 = vector.shape_cast %10 : vector<1x24x28xbf16> to vector<24x28xbf16>
    %c1 = arith.constant 1 : index
    %c0_6 = arith.constant 0 : index
    %c0_7 = arith.constant 0 : index
    %12 = vector.load %arg2[%c1, %c0_6, %c0_7] : memref<5x28x480xbf16, #tpu.memory_space<vmem>>, vector<1x28x480xbf16>
    %13 = vector.shape_cast %12 : vector<1x28x480xbf16> to vector<28x480xbf16>
    %cst_8 = arith.constant dense<0.000000e+00> : vector<24x480xf32>
    %14 = tpu.matmul %11, %13, %cst_8 {dimension_numbers = #tpu.dot_dimension_numbers<[1], [0], [0], [1], [0, 0, 1, 1], [], []>} : vector<24x28xbf16>, vector<28x480xbf16>, vector<24x480xf32> -> vector<24x480xf32>
    %15 = vector.shape_cast %14 : vector<24x480xf32> to vector<1x24x480xf32>
    %16 = arith.addf %9, %15 : vector<1x24x480xf32>
    %17 = vector.extract_strided_slice %1 {offsets = [0, 2, 0], sizes = [1, 24, 28], strides = [1, 1, 1]} : vector<1x28x28xbf16> to vector<1x24x28xbf16>
    %18 = vector.shape_cast %17 : vector<1x24x28xbf16> to vector<24x28xbf16>
    %c2 = arith.constant 2 : index
    %c0_9 = arith.constant 0 : index
    %c0_10 = arith.constant 0 : index
    %19 = vector.load %arg2[%c2, %c0_9, %c0_10] : memref<5x28x480xbf16, #tpu.memory_space<vmem>>, vector<1x28x480xbf16>
    %20 = vector.shape_cast %19 : vector<1x28x480xbf16> to vector<28x480xbf16>
    %cst_11 = arith.constant dense<0.000000e+00> : vector<24x480xf32>
    %21 = tpu.matmul %18, %20, %cst_11 {dimension_numbers = #tpu.dot_dimension_numbers<[1], [0], [0], [1], [0, 0, 1, 1], [], []>} : vector<24x28xbf16>, vector<28x480xbf16>, vector<24x480xf32> -> vector<24x480xf32>
    %22 = vector.shape_cast %21 : vector<24x480xf32> to vector<1x24x480xf32>
    %23 = arith.addf %16, %22 : vector<1x24x480xf32>
    %24 = vector.extract_strided_slice %1 {offsets = [0, 3, 0], sizes = [1, 24, 28], strides = [1, 1, 1]} : vector<1x28x28xbf16> to vector<1x24x28xbf16>
    %25 = vector.shape_cast %24 : vector<1x24x28xbf16> to vector<24x28xbf16>
    %c3 = arith.constant 3 : index
    %c0_12 = arith.constant 0 : index
    %c0_13 = arith.constant 0 : index
    %26 = vector.load %arg2[%c3, %c0_12, %c0_13] : memref<5x28x480xbf16, #tpu.memory_space<vmem>>, vector<1x28x480xbf16>
    %27 = vector.shape_cast %26 : vector<1x28x480xbf16> to vector<28x480xbf16>
    %cst_14 = arith.constant dense<0.000000e+00> : vector<24x480xf32>
    %28 = tpu.matmul %25, %27, %cst_14 {dimension_numbers = #tpu.dot_dimension_numbers<[1], [0], [0], [1], [0, 0, 1, 1], [], []>} : vector<24x28xbf16>, vector<28x480xbf16>, vector<24x480xf32> -> vector<24x480xf32>
    %29 = vector.shape_cast %28 : vector<24x480xf32> to vector<1x24x480xf32>
    %30 = arith.addf %23, %29 : vector<1x24x480xf32>
    %31 = vector.extract_strided_slice %1 {offsets = [0, 4, 0], sizes = [1, 24, 28], strides = [1, 1, 1]} : vector<1x28x28xbf16> to vector<1x24x28xbf16>
    %32 = vector.shape_cast %31 : vector<1x24x28xbf16> to vector<24x28xbf16>
    %c4 = arith.constant 4 : index
    %c0_15 = arith.constant 0 : index
    %c0_16 = arith.constant 0 : index
    %33 = vector.load %arg2[%c4, %c0_15, %c0_16] : memref<5x28x480xbf16, #tpu.memory_space<vmem>>, vector<1x28x480xbf16>
    %34 = vector.shape_cast %33 : vector<1x28x480xbf16> to vector<28x480xbf16>
    %cst_17 = arith.constant dense<0.000000e+00> : vector<24x480xf32>
    %35 = tpu.matmul %32, %34, %cst_17 {dimension_numbers = #tpu.dot_dimension_numbers<[1], [0], [0], [1], [0, 0, 1, 1], [], []>} : vector<24x28xbf16>, vector<28x480xbf16>, vector<24x480xf32> -> vector<24x480xf32>
    %36 = vector.shape_cast %35 : vector<24x480xf32> to vector<1x24x480xf32>
    %37 = arith.addf %30, %36 : vector<1x24x480xf32>
    %38 = vector.extract_strided_slice %37 {offsets = [0, 0, 0], sizes = [1, 24, 240], strides = [1, 1, 1]} : vector<1x24x480xf32> to vector<1x24x240xf32>
    %39 = vector.extract_strided_slice %37 {offsets = [0, 0, 240], sizes = [1, 24, 240], strides = [1, 1, 1]} : vector<1x24x480xf32> to vector<1x24x240xf32>
    %40 = arith.maximumf %38, %39 : vector<1x24x240xf32>
    %41 = vector.shape_cast %40 : vector<1x24x240xf32> to vector<1x12x2x240xf32>
    %42 = vector.extract_strided_slice %41 {offsets = [0, 0, 0, 0], sizes = [1, 12, 1, 240], strides = [1, 1, 1, 1]} : vector<1x12x2x240xf32> to vector<1x12x1x240xf32>
    %43 = vector.shape_cast %42 : vector<1x12x1x240xf32> to vector<1x12x240xf32>
    %44 = vector.extract_strided_slice %41 {offsets = [0, 0, 1, 0], sizes = [1, 12, 1, 240], strides = [1, 1, 1, 1]} : vector<1x12x2x240xf32> to vector<1x12x1x240xf32>
    %45 = vector.shape_cast %44 : vector<1x12x1x240xf32> to vector<1x12x240xf32>
    %46 = arith.maximumf %43, %45 : vector<1x12x240xf32>
    %c0_18 = arith.constant 0 : index
    %c0_19 = arith.constant 0 : index
    %47 = vector.load %arg3[%c0_18, %c0_19] : memref<1x240xf32, #tpu.memory_space<vmem>>, vector<1x240xf32>
    %48 = vector.shape_cast %47 : vector<1x240xf32> to vector<1x1x240xf32>
    %49 = vector.broadcast %48 : vector<1x1x240xf32> to vector<1x12x240xf32>
    %50 = arith.addf %46, %49 : vector<1x12x240xf32>
    %cst_20 = arith.constant 0.000000e+00 : f32
    %51 = vector.broadcast %cst_20 : f32 to vector<1x12x240xf32>
    %52 = arith.maximumf %50, %51 : vector<1x12x240xf32>
    %53 = arith.truncf %52 : vector<1x12x240xf32> to vector<1x12x240xbf16>
    %cst_21 = arith.constant 0.000000e+00 : f32
    %54 = vector.broadcast %cst_21 : f32 to vector<1x8x400xf32>
    %55 = vector.extract_strided_slice %53 {offsets = [0, 0, 0], sizes = [1, 8, 240], strides = [1, 1, 1]} : vector<1x12x240xbf16> to vector<1x8x240xbf16>
    %56 = vector.shape_cast %55 : vector<1x8x240xbf16> to vector<8x240xbf16>
    %c0_22 = arith.constant 0 : index
    %c0_23 = arith.constant 0 : index
    %c0_24 = arith.constant 0 : index
    %57 = vector.load %arg4[%c0_22, %c0_23, %c0_24] : memref<5x240x400xbf16, #tpu.memory_space<vmem>>, vector<1x240x400xbf16>
    %58 = vector.shape_cast %57 : vector<1x240x400xbf16> to vector<240x400xbf16>
    %cst_25 = arith.constant dense<0.000000e+00> : vector<8x400xf32>
    %59 = tpu.matmul %56, %58, %cst_25 {dimension_numbers = #tpu.dot_dimension_numbers<[1], [0], [0], [1], [0, 0, 1, 1], [], []>} : vector<8x240xbf16>, vector<240x400xbf16>, vector<8x400xf32> -> vector<8x400xf32>
    %60 = vector.shape_cast %59 : vector<8x400xf32> to vector<1x8x400xf32>
    %61 = arith.addf %54, %60 : vector<1x8x400xf32>
    %62 = vector.extract_strided_slice %53 {offsets = [0, 1, 0], sizes = [1, 8, 240], strides = [1, 1, 1]} : vector<1x12x240xbf16> to vector<1x8x240xbf16>
    %63 = vector.shape_cast %62 : vector<1x8x240xbf16> to vector<8x240xbf16>
    %c1_26 = arith.constant 1 : index
    %c0_27 = arith.constant 0 : index
    %c0_28 = arith.constant 0 : index
    %64 = vector.load %arg4[%c1_26, %c0_27, %c0_28] : memref<5x240x400xbf16, #tpu.memory_space<vmem>>, vector<1x240x400xbf16>
    %65 = vector.shape_cast %64 : vector<1x240x400xbf16> to vector<240x400xbf16>
    %cst_29 = arith.constant dense<0.000000e+00> : vector<8x400xf32>
    %66 = tpu.matmul %63, %65, %cst_29 {dimension_numbers = #tpu.dot_dimension_numbers<[1], [0], [0], [1], [0, 0, 1, 1], [], []>} : vector<8x240xbf16>, vector<240x400xbf16>, vector<8x400xf32> -> vector<8x400xf32>
    %67 = vector.shape_cast %66 : vector<8x400xf32> to vector<1x8x400xf32>
    %68 = arith.addf %61, %67 : vector<1x8x400xf32>
    %69 = vector.extract_strided_slice %53 {offsets = [0, 2, 0], sizes = [1, 8, 240], strides = [1, 1, 1]} : vector<1x12x240xbf16> to vector<1x8x240xbf16>
    %70 = vector.shape_cast %69 : vector<1x8x240xbf16> to vector<8x240xbf16>
    %c2_30 = arith.constant 2 : index
    %c0_31 = arith.constant 0 : index
    %c0_32 = arith.constant 0 : index
    %71 = vector.load %arg4[%c2_30, %c0_31, %c0_32] : memref<5x240x400xbf16, #tpu.memory_space<vmem>>, vector<1x240x400xbf16>
    %72 = vector.shape_cast %71 : vector<1x240x400xbf16> to vector<240x400xbf16>
    %cst_33 = arith.constant dense<0.000000e+00> : vector<8x400xf32>
    %73 = tpu.matmul %70, %72, %cst_33 {dimension_numbers = #tpu.dot_dimension_numbers<[1], [0], [0], [1], [0, 0, 1, 1], [], []>} : vector<8x240xbf16>, vector<240x400xbf16>, vector<8x400xf32> -> vector<8x400xf32>
    %74 = vector.shape_cast %73 : vector<8x400xf32> to vector<1x8x400xf32>
    %75 = arith.addf %68, %74 : vector<1x8x400xf32>
    %76 = vector.extract_strided_slice %53 {offsets = [0, 3, 0], sizes = [1, 8, 240], strides = [1, 1, 1]} : vector<1x12x240xbf16> to vector<1x8x240xbf16>
    %77 = vector.shape_cast %76 : vector<1x8x240xbf16> to vector<8x240xbf16>
    %c3_34 = arith.constant 3 : index
    %c0_35 = arith.constant 0 : index
    %c0_36 = arith.constant 0 : index
    %78 = vector.load %arg4[%c3_34, %c0_35, %c0_36] : memref<5x240x400xbf16, #tpu.memory_space<vmem>>, vector<1x240x400xbf16>
    %79 = vector.shape_cast %78 : vector<1x240x400xbf16> to vector<240x400xbf16>
    %cst_37 = arith.constant dense<0.000000e+00> : vector<8x400xf32>
    %80 = tpu.matmul %77, %79, %cst_37 {dimension_numbers = #tpu.dot_dimension_numbers<[1], [0], [0], [1], [0, 0, 1, 1], [], []>} : vector<8x240xbf16>, vector<240x400xbf16>, vector<8x400xf32> -> vector<8x400xf32>
    %81 = vector.shape_cast %80 : vector<8x400xf32> to vector<1x8x400xf32>
    %82 = arith.addf %75, %81 : vector<1x8x400xf32>
    %83 = vector.extract_strided_slice %53 {offsets = [0, 4, 0], sizes = [1, 8, 240], strides = [1, 1, 1]} : vector<1x12x240xbf16> to vector<1x8x240xbf16>
    %84 = vector.shape_cast %83 : vector<1x8x240xbf16> to vector<8x240xbf16>
    %c4_38 = arith.constant 4 : index
    %c0_39 = arith.constant 0 : index
    %c0_40 = arith.constant 0 : index
    %85 = vector.load %arg4[%c4_38, %c0_39, %c0_40] : memref<5x240x400xbf16, #tpu.memory_space<vmem>>, vector<1x240x400xbf16>
    %86 = vector.shape_cast %85 : vector<1x240x400xbf16> to vector<240x400xbf16>
    %cst_41 = arith.constant dense<0.000000e+00> : vector<8x400xf32>
    %87 = tpu.matmul %84, %86, %cst_41 {dimension_numbers = #tpu.dot_dimension_numbers<[1], [0], [0], [1], [0, 0, 1, 1], [], []>} : vector<8x240xbf16>, vector<240x400xbf16>, vector<8x400xf32> -> vector<8x400xf32>
    %88 = vector.shape_cast %87 : vector<8x400xf32> to vector<1x8x400xf32>
    %89 = arith.addf %82, %88 : vector<1x8x400xf32>
    %90 = vector.extract_strided_slice %89 {offsets = [0, 0, 0], sizes = [1, 8, 200], strides = [1, 1, 1]} : vector<1x8x400xf32> to vector<1x8x200xf32>
    %91 = vector.extract_strided_slice %89 {offsets = [0, 0, 200], sizes = [1, 8, 200], strides = [1, 1, 1]} : vector<1x8x400xf32> to vector<1x8x200xf32>
    %92 = arith.maximumf %90, %91 : vector<1x8x200xf32>
    %93 = vector.shape_cast %92 : vector<1x8x200xf32> to vector<1x4x2x200xf32>
    %94 = vector.extract_strided_slice %93 {offsets = [0, 0, 0, 0], sizes = [1, 4, 1, 200], strides = [1, 1, 1, 1]} : vector<1x4x2x200xf32> to vector<1x4x1x200xf32>
    %95 = vector.shape_cast %94 : vector<1x4x1x200xf32> to vector<1x4x200xf32>
    %96 = vector.extract_strided_slice %93 {offsets = [0, 0, 1, 0], sizes = [1, 4, 1, 200], strides = [1, 1, 1, 1]} : vector<1x4x2x200xf32> to vector<1x4x1x200xf32>
    %97 = vector.shape_cast %96 : vector<1x4x1x200xf32> to vector<1x4x200xf32>
    %98 = arith.maximumf %95, %97 : vector<1x4x200xf32>
    %c0_42 = arith.constant 0 : index
    %c0_43 = arith.constant 0 : index
    %99 = vector.load %arg5[%c0_42, %c0_43] : memref<1x200xf32, #tpu.memory_space<vmem>>, vector<1x200xf32>
    %100 = vector.shape_cast %99 : vector<1x200xf32> to vector<1x1x200xf32>
    %101 = vector.broadcast %100 : vector<1x1x200xf32> to vector<1x4x200xf32>
    %102 = arith.addf %98, %101 : vector<1x4x200xf32>
    %cst_44 = arith.constant 0.000000e+00 : f32
    %103 = vector.broadcast %cst_44 : f32 to vector<1x4x200xf32>
    %104 = arith.maximumf %102, %103 : vector<1x4x200xf32>
    %105 = vector.shape_cast %104 : vector<1x4x200xf32> to vector<1x800xf32>
    %106 = arith.truncf %105 : vector<1x800xf32> to vector<1x800xbf16>
    %c0_45 = arith.constant 0 : index
    %c0_46 = arith.constant 0 : index
    %107 = vector.load %arg6[%c0_45, %c0_46] : memref<800x500xbf16, #tpu.memory_space<vmem>>, vector<800x500xbf16>
    %cst_47 = arith.constant dense<0.000000e+00> : vector<1x500xf32>
    %108 = tpu.matmul %106, %107, %cst_47 {dimension_numbers = #tpu.dot_dimension_numbers<[1], [0], [0], [1], [0, 0, 1, 1], [], []>} : vector<1x800xbf16>, vector<800x500xbf16>, vector<1x500xf32> -> vector<1x500xf32>
    %c0_48 = arith.constant 0 : index
    %c0_49 = arith.constant 0 : index
    %109 = vector.load %arg7[%c0_48, %c0_49] : memref<1x500xf32, #tpu.memory_space<vmem>>, vector<1x500xf32>
    %110 = arith.addf %108, %109 : vector<1x500xf32>
    %cst_50 = arith.constant 0.000000e+00 : f32
    %111 = vector.broadcast %cst_50 : f32 to vector<1x500xf32>
    %112 = arith.maximumf %110, %111 : vector<1x500xf32>
    %113 = arith.truncf %112 : vector<1x500xf32> to vector<1x500xbf16>
    %c0_51 = arith.constant 0 : index
    %c0_52 = arith.constant 0 : index
    %114 = vector.load %arg8[%c0_51, %c0_52] : memref<500x128xbf16, #tpu.memory_space<vmem>>, vector<500x128xbf16>
    %cst_53 = arith.constant dense<0.000000e+00> : vector<1x128xf32>
    %115 = tpu.matmul %113, %114, %cst_53 {dimension_numbers = #tpu.dot_dimension_numbers<[1], [0], [0], [1], [0, 0, 1, 1], [], []>} : vector<1x500xbf16>, vector<500x128xbf16>, vector<1x128xf32> -> vector<1x128xf32>
    %c0_54 = arith.constant 0 : index
    %c0_55 = arith.constant 0 : index
    %116 = vector.load %arg9[%c0_54, %c0_55] : memref<1x128xf32, #tpu.memory_space<vmem>>, vector<1x128xf32>
    %117 = arith.addf %115, %116 : vector<1x128xf32>
    %c0_56 = arith.constant 0 : index
    %c0_57 = arith.constant 0 : index
    %c0_58 = arith.constant 0 : index
    %118 = vector.load %arg10[%c0_56, %c0_57, %c0_58] : memref<1x1x128xf32, #tpu.memory_space<vmem>>, vector<1x1x128xf32>
    %119 = vector.shape_cast %118 : vector<1x1x128xf32> to vector<1x128xf32>
    %120 = vector.shape_cast %117 : vector<1x128xf32> to vector<1x1x128xf32>
    tpu.vector_store %arg10[%c0_56, %c0_57, %c0_58], %120 {strides = array<i32>} : memref<1x1x128xf32, #tpu.memory_space<vmem>>, vector<1x1x128xf32>,
    return
  }
  func.func @transform_0(%arg0: i32) -> (i32, i32, i32) {
    %c0_i32 = arith.constant 0 : i32
    %c0_i32_0 = arith.constant 0 : i32
    %c0_i32_1 = arith.constant 0 : i32
    return %arg0, %c0_i32, %c0_i32_0 : i32, i32, i32
  }
  func.func @transform_1(%arg0: i32) -> (i32, i32, i32) {
    %c0_i32 = arith.constant 0 : i32
    %c0_i32_0 = arith.constant 0 : i32
    %c0_i32_1 = arith.constant 0 : i32
    %c0_i32_2 = arith.constant 0 : i32
    return %c0_i32, %c0_i32_0, %c0_i32_1 : i32, i32, i32
  }
  func.func @transform_2(%arg0: i32) -> (i32, i32) {
    %c0_i32 = arith.constant 0 : i32
    %c0_i32_0 = arith.constant 0 : i32
    %c0_i32_1 = arith.constant 0 : i32
    return %c0_i32, %c0_i32_0 : i32, i32
  }
  func.func @transform_3(%arg0: i32) -> (i32, i32, i32) {
    %c0_i32 = arith.constant 0 : i32
    %c0_i32_0 = arith.constant 0 : i32
    %c0_i32_1 = arith.constant 0 : i32
    %c0_i32_2 = arith.constant 0 : i32
    return %c0_i32, %c0_i32_0, %c0_i32_1 : i32, i32, i32
  }
  func.func @transform_4(%arg0: i32) -> (i32, i32) {
    %c0_i32 = arith.constant 0 : i32
    %c0_i32_0 = arith.constant 0 : i32
    %c0_i32_1 = arith.constant 0 : i32
    return %c0_i32, %c0_i32_0 : i32, i32
  }
  func.func @transform_5(%arg0: i32) -> (i32, i32) {
    %c0_i32 = arith.constant 0 : i32
    %c0_i32_0 = arith.constant 0 : i32
    %c0_i32_1 = arith.constant 0 : i32
    return %c0_i32, %c0_i32_0 : i32, i32
  }
  func.func @transform_6(%arg0: i32) -> (i32, i32) {
    %c0_i32 = arith.constant 0 : i32
    %c0_i32_0 = arith.constant 0 : i32
    %c0_i32_1 = arith.constant 0 : i32
    return %c0_i32, %c0_i32_0 : i32, i32
  }
  func.func @transform_7(%arg0: i32) -> (i32, i32) {
    %c0_i32 = arith.constant 0 : i32
    %c0_i32_0 = arith.constant 0 : i32
    %c0_i32_1 = arith.constant 0 : i32
    return %c0_i32, %c0_i32_0 : i32, i32
  }
  func.func @transform_8(%arg0: i32) -> (i32, i32) {
    %c0_i32 = arith.constant 0 : i32
    %c0_i32_0 = arith.constant 0 : i32
    %c0_i32_1 = arith.constant 0 : i32
    return %c0_i32, %c0_i32_0 : i32, i32
  }
  func.func @transform_9(%arg0: i32) -> (i32, i32, i32) {
    %c0_i32 = arith.constant 0 : i32
    %c0_i32_0 = arith.constant 0 : i32
    %c0_i32_1 = arith.constant 0 : i32
    return %arg0, %c0_i32, %c0_i32_0 : i32, i32, i32
  }
}

</mosaic_0001>

<bundles_post_ra>
// kernel: net_forward.1
= control target key start
LH: loop header
LB: loop body
LE: loop exit
PB: predicated region body
PF: predicated region fallthrough
CT: control target
= control target key end

     0   :  { %14 = vsyncpa [#allocation3], 0  ;;  %s10695_s0 = inlined_call_operand.vmem [shape: f32[2,28,28], index: 0, kind: input, shape index: {}]   ;;  %s10696_s1 = inlined_call_operand.vmem [shape: bf16[5,28,480], index: 1, kind: input, shape index: {}]   ;;  %s10697_s2 = inlined_call_operand.vmem [shape: f32[1,240], index: 2, kind: input, shape index: {}]   ;;  %s10698_s3 = inlined_call_operand.vmem [shape: bf16[5,240,400], index: 3, kind: input, shape index: {}]   ;;  %s10699_s4 = inlined_call_operand.vmem [shape: f32[1,200], index: 4, kind: input, shape index: {}]   ;;  %s10700_s5 = inlined_call_operand.vmem [shape: bf16[800,500], index: 5, kind: input, shape index: {}]   ;;  %s10701_s6 = inlined_call_operand.vmem [shape: f32[1,500], index: 6, kind: input, shape index: {}]   ;;  %s10702_s7 = inlined_call_operand.vmem [shape: bf16[500,128], index: 7, kind: input, shape index: {}]   ;;  %s10703_s8 = inlined_call_operand.vmem [shape: f32[1,128], index: 8, kind: input, shape index: {}]   ;;  %s10704_s9 = inlined_call_operand.hbm [shape: f32[2,1,128], index: 9, kind: output, shape index: {}]  }
   0x1   :  { %16 = vsyncpa [#allocation3 + $0x1], 0  ;;  %s8244_s30 = smov 0   ;;  %s8246_s10 = smov 0  }
   0x2   :  { %s8248_s11 = smov 0   ;;  %s8250_s12 = smov 0  }
   0x3 LB: > { %s8265_s13 = sadd.s32 4294967295, %s8183_s12   ;;  %s6271_s14 = sadd.s32 4294967294, %s8183_s12   ;;  %s8183_s12 = sphi %s8250_s12, %s10712_s12   ;;  %s8179_s11 = sphi %s8248_s11, %s10711_s11   ;;  %s8175_s10 = sphi %s8246_s10, %s10710_s10   ;;  %s8171_s30 = sphi %s8244_s30, %s10709_s30  }
   0x4   : > { %s8269_s15 = sadd.s32 1, %s8183_s12   ;;  %s223_s16 = sadd.s32 1, %s8179_s11 }
   0x5   : > { %s220_s17 = ssub.s32 %s8183_s12, %s8269_s15  ;;  %p233_p0 = scmp.ne.s32.totalorder %s8179_s11, %s8175_s10 }
   0x6   : > { %p221_p1 = scmp.eq.s32.totalorder %s220_s17, 0  ;;  %p234_p2 = scmp.eq.s32.totalorder %s8265_s13, 1 }
   0x7   : > { %p239_p3 = scmp.ne.s32.totalorder %s8175_s10, %s8171_s30  ;;  %p240_p4 = scmp.eq.s32.totalorder %s6271_s14, 1 }
   0x8   : > { %s8280_s18 = scalar_select %p221_p1, %s8179_s11, %s223_s16  }
   0x9   : > { %p8282_p5 = por %p234_p2, %p233_p0  ;;  %p8286_p6 = por %p240_p4, %p239_p3 }
   0xa   : > { %10705 = sst [smem:[#allocation5_spill]] %s8280_s18  ;;  %p6274_p7 = scmp.ge.s32.totalorder %s8183_s12, 1 }
   0xb   : > { %p290_p8 = scmp.lt.s32.totalorder %s8183_s12, 3 }
   0xd   : > { %p291_p9 = pnand %p6274_p7, %p290_p8 }
   0xe   : > { %p325_p10 = scmp.lt.s32.totalorder (!%p291_p9), %s8265_s13, 1  ;;  %s8186_s27 = smov (!%p291_p9), 16  }
   0xf   : > { %294 = sbr.rel (%p291_p9) target bundleno = 1717 (0x6b5), region = 56  ;;  %s8188_s26 = smov (!%p291_p9), 56  }
  0x10   : > { %s8191_s29 = smov (!%p291_p9), 72   ;;  %s8192_s14 = smov (!%p291_p9), 88  }
  0x11   : > { %s323_s18 = sand.u32 (!%p291_p9), 1, %s8175_s10  }
  0x12   : > { %s6204_s23 = scalar_lea.sflag (!%p291_p9), [#allocation3], %s323_s18 }
  0x14   : > { %v7281_v0 = vld [vmem:[%s10696_s1 + $0x24] ss:$16 sps:$4 sm:$0x3f]   ;;  %vm388_vm0 = vcmask 1045504   ;;  %v8185_v3 = vmov 0   ;;  %s326_s25 = scalar_select %p325_p10, %s8265_s13, 1 }
  0x15   : > { %6285 = vmatprep.subr.msk.bf16.mxu0 %vm388_vm0, %v7281_v0  ;;  %v7283_v1 = vld [vmem:[%s10696_s1 + $0x2c] ss:$16 sps:$4 sm:$0x3f]   ;;  %v7285_v2 = vld [vmem:[%s10696_s1 + $0x20] ss:$16 sps:$4 sm:$0x3f]   ;;  %433 = vmatprep.mubr.bf16.mxu0 %v8185_v3 }
  0x16   : > { %v7286_v4 = vld [vmem:[%s10696_s1 + $0x28] ss:$16 sps:$4 sm:$0x3f]   ;;  %v7287_v5 = vld [vmem:[%s10696_s1 + $0x4] ss:$16 sps:$4 sm:$0xff]   ;;  %484 = vmatprep.mubr.bf16.mxu1 %v8185_v3  ;;  %6288 = vmatprep.subr.msk.bf16.mxu1 %vm388_vm0, %v7283_v1  ;;  %v390_v6 = vsel %vm388_vm0, %v7285_v2, 0 }
  0x17   : > { %v7289_v7 = vld [vmem:[%s10696_s1 + $0xc] ss:$16 sps:$4 sm:$0xff]   ;;  %414 = vmatpush1.bf16.msra.mxu0 %v390_v6  ;;  %v396_v8 = vsel %vm388_vm0, %v7286_v4, 0  ;;  %v7291_v9 = vld [vmem:[%s10696_s1] ss:$16 sps:$4 sm:$0xff]   ;;  %s7183_s28 = sshll.u32 %s326_s25, 5 }
  0x18   : > { %v7292_v10 = vld [vmem:[%s10696_s1 + $0x8] ss:$16 sps:$4 sm:$0xff]   ;;  %465 = vmatpush1.bf16.msra.mxu1 %v396_v8  ;;  %415 = vmatprep.subr.bf16.mxu0 %v7287_v5  ;;  %v7293_v11 = vld [vmem:[%s10696_s1 + $0x64] ss:$16 sps:$4 sm:$0x3f]   ;;  %s329_s21 = scalar_lea.vmem %s10695_s0, %s7183_s28  ;;  %vm381_vm1 = vcmask 228352  }
  0x19   : > { %466 = vmatprep.subr.bf16.mxu1 %v7289_v7  ;;  %v7295_v12 = vld [vmem:[%s10696_s1 + $0x6c] ss:$16 sps:$4 sm:$0x3f]   ;;  %v7297_v13 = vld [vmem:[%s10696_s1 + $0x60] ss:$16 sps:$4 sm:$0x3f]  }
  0x1a   : > { %v7298_v14 = vld [vmem:[%s10696_s1 + $0x68] ss:$16 sps:$4 sm:$0x3f]   ;;  %v331_v15 = vld [vmem:[%s329_s21] sm:$0xff]  ;;  %v581_v18 = vsel %vm388_vm0, %v7297_v13, 0  ;;  %v333_v20 = vld [vmem:[%s329_s21 + $0x10] sm:$0xff] }
  0x1b   : > { %416 = vmatpush1.bf16.msra.mxu0 %v7291_v9  ;;  %v332_v16 = vld [vmem:[%s329_s21 + $0x8] sm:$0xff]  ;;  %v587_v19 = vsel %vm388_vm0, %v7298_v14, 0  ;;  %v334_v21 = vld [vmem:[%s329_s21 + $0x18] sm:$0xf]  ;;  %v7299_v22 = vld [vmem:[%s10696_s1 + $0x40] ss:$16 sps:$4 sm:$0xff]  }
  0x1c   : > { %467 = vmatpush1.bf16.msra.mxu1 %v7292_v10  ;;  %6307 = vmatprep.subr.msk.bf16.mxu0 %vm388_vm0, %v7293_v11  ;;  %v8340_v17 = vpack.c.bf16 %v332_v16, %v331_v15  ;;  %v7301_v23 = vld [vmem:[%s10696_s1 + $0x44] ss:$16 sps:$4 sm:$0xff]   ;;  %v7302_v24 = vld [vmem:[%s10696_s1 + $0x48] ss:$16 sps:$4 sm:$0xff]   ;;  %v7304_v25 = vld [vmem:[%s10696_s1 + $0x4c] ss:$16 sps:$4 sm:$0xff]   ;;  %v8370_v29 = vpack.c.bf16 %v334_v21, %v333_v20 }
  0x1d   : > { %6310 = vmatprep.subr.msk.bf16.mxu1 %vm388_vm0, %v7295_v12  ;;  %v7305_v27 = vld [vmem:[%s10696_s1 + $0xa4] ss:$16 sps:$4 sm:$0x3f]   ;;  %v7307_v28 = vld [vmem:[%s10696_s1 + $0xac] ss:$16 sps:$4 sm:$0x3f]  }
  0x1e   : > { %6286 = vmatmul.mubr.msk.bf16.vlgmr.msra.gmra.mxu0 %vm381_vm1, %v8340_v17  ;;  %v527_v26 = vshll.u32 %v8340_v17, 16  ;;  %v525_v30 = vshrl.u32 %v8340_v17, 16  ;;  %v531_v32 = vshll.u32 %v8370_v29, 16  ;;  %v7309_v35 = vld [vmem:[%s10696_s1 + $0xa0] ss:$16 sps:$4 sm:$0x3f]  }
  0x1f   : > { %6289 = vmatmul.mubr.msk.bf16.vlgmr.msra.gmra.mxu1 %vm381_vm1, %v8340_v17  ;;  %605 = vmatpush1.bf16.msra.mxu0 %v581_v18  ;;  %vm524_vm2 = vsmask.f32 7424  ;;  %v7310_v36 = vld [vmem:[%s10696_s1 + $0xa8] ss:$16 sps:$4 sm:$0x3f]   ;;  %v764_v38 = vsel %vm388_vm0, %v7309_v35, 0 }
  0x20   : > { %656 = vmatpush1.bf16.msra.mxu1 %v587_v19  ;;  %443 = vmatprep.mubr.bf16.mxu0 %v8185_v3  ;;  %v529_v31 = vrot.slane %v527_v26, 1  ;;  %v533_v34 = vrot.slane %v531_v32, 1  ;;  %v770_v39 = vsel %vm388_vm0, %v7310_v36, 0  ;;  %v7313_v40 = vld [vmem:[%s10696_s1 + $0x84] ss:$16 sps:$4 sm:$0xff]   ;;  %v535_v42 = vshrl.u32 %v8370_v29, 16 }
  0x21   : > { %494 = vmatprep.mubr.bf16.mxu1 %v8185_v3  ;;  %606 = vmatprep.subr.bf16.mxu0 %v7301_v23  ;;  %v7316_v41 = vld [vmem:[%s10696_s1 + $0x8c] ss:$16 sps:$4 sm:$0xff]   ;;  %v7311_v43 = vld [vmem:[%s10696_s1 + $0x80] ss:$16 sps:$4 sm:$0xff]   ;;  %v7314_v44 = vld [vmem:[%s10696_s1 + $0x88] ss:$16 sps:$4 sm:$0xff]  }
  0x22   : > { %657 = vmatprep.subr.bf16.mxu1 %v7304_v25  ;;  %v530_v33 = vor.u32 %v529_v31, %v525_v30  ;;  %v7317_v45 = vld [vmem:[%s10696_s1 + $0xe4] ss:$16 sps:$4 sm:$0x3f]   ;;  %v7319_v46 = vld [vmem:[%s10696_s1 + $0xec] ss:$16 sps:$4 sm:$0x3f]   ;;  %v537_v47 = vor.u32 %v535_v42, %v533_v34 }
  0x23   : > { %607 = vmatpush1.bf16.msra.mxu0 %v7299_v22  ;;  %v7321_v48 = vld [vmem:[%s10696_s1 + $0xe0] ss:$16 sps:$4 sm:$0x3f]   ;;  %v7322_v49 = vld [vmem:[%s10696_s1 + $0xe8] ss:$16 sps:$4 sm:$0x3f]  }
  0x24   : > { %658 = vmatpush1.bf16.msra.mxu1 %v7302_v24  ;;  %6329 = vmatprep.subr.msk.bf16.mxu0 %vm388_vm0, %v7305_v27  ;;  %v534_v37 = vsel %vm524_vm2, %v530_v33, %v533_v34  ;;  %v718_v50 = vrot.slane %v8340_v17, 1  ;;  %v719_v51 = vrot.slane %v8370_v29, 1  ;;  %vm717_vm3 = vcmask 1046528   ;;  %v7325_v53 = vld [vmem:[%s10696_s1 + $0xc4] ss:$16 sps:$4 sm:$0xff]  }
  0x25   : > { %6332 = vmatprep.subr.msk.bf16.mxu1 %vm388_vm0, %v7307_v28  ;;  %v7328_v54 = vld [vmem:[%s10696_s1 + $0xcc] ss:$16 sps:$4 sm:$0xff]   ;;  %v949_v55 = vsel %vm388_vm0, %v7321_v48, 0  ;;  %v955_v56 = vsel %vm388_vm0, %v7322_v49, 0  ;;  %v7323_v57 = vld [vmem:[%s10696_s1 + $0xc0] ss:$16 sps:$4 sm:$0xff]  }
  0x26   : > { %6287 = vmatmul.mubr.msk.bf16.gmra.mxu0 %vm381_vm1, %v8370_v29  ;;  %v720_v52 = vsel %vm717_vm3, %v718_v50, %v719_v51  ;;  %v7326_v58 = vld [vmem:[%s10696_s1 + $0xc8] ss:$16 sps:$4 sm:$0xff]   ;;  %v7329_v59 = vld [vmem:[%s10696_s1 + $0x124] ss:$16 sps:$4 sm:$0x3f]   ;;  %v902_v61 = vrot.slane %v535_v42, 1 }
  0x27   : > { %6290 = vmatmul.mubr.msk.bf16.gmra.mxu1 %vm381_vm1, %v8370_v29  ;;  %624 = vmatprep.mubr.bf16.mxu0 %v8185_v3  ;;  %v7331_v60 = vld [vmem:[%s10696_s1 + $0x12c] ss:$16 sps:$4 sm:$0x3f]   ;;  %v899_v62 = vrot.slane %v525_v30, 1  ;;  %v900_v63 = vrot.slane %v527_v26, 2  ;;  %v903_v0 = vrot.slane %v531_v32, 2 }
  0x28   : > { %675 = vmatprep.mubr.bf16.mxu1 %v8185_v3  ;;  %v7333_v1 = vld [vmem:[%s10696_s1 + $0x120] ss:$16 sps:$4 sm:$0x3f]   ;;  %v7334_v2 = vld [vmem:[%s10696_s1 + $0x128] ss:$16 sps:$4 sm:$0x3f]  }
  0x29   : > { %v901_v4 = vor.u32 %v900_v63, %v899_v62  ;;  %v904_v5 = vor.u32 %v903_v0, %v902_v61  ;;  %vm898_vm4 = vsmask.f32 6400  ;;  %v7337_v7 = vld [vmem:[%s10696_s1 + $0x104] ss:$16 sps:$4 sm:$0xff]   ;;  %v7340_v8 = vld [vmem:[%s10696_s1 + $0x10c] ss:$16 sps:$4 sm:$0xff]  }
  0x2a   : > { %v1130_v9 = vsel %vm388_vm0, %v7333_v1, 0  ;;  %v1136_v10 = vsel %vm388_vm0, %v7334_v2, 0  ;;  %v7335_v11 = vld [vmem:[%s10696_s1 + $0x100] ss:$16 sps:$4 sm:$0xff]   ;;  %v7338_v12 = vld [vmem:[%s10696_s1 + $0x108] ss:$16 sps:$4 sm:$0xff]  }
  0x2b   : > { %v905_v6 = vsel %vm898_vm4, %v901_v4, %v904_v5  ;;  %v1084_v13 = vrot.slane %v8340_v17, 2  ;;  %v1085_v14 = vrot.slane %v8370_v29, 2  ;;  %v7341_v16 = vld [vmem:[%s10698_s3 + $0xe0] ss:$16 sps:$4 sm:$0xff]   ;;  %v7343_v17 = vld [vmem:[%s10698_s3 + $0xe4] ss:$16 sps:$4 sm:$0xff]  }
  0x2c   : > { %v7344_v18 = vld [vmem:[%s10698_s3 + $0xe8] ss:$16 sps:$4 sm:$0xff]   ;;  %v7346_v19 = vld [vmem:[%s10698_s3 + $0xec] ss:$16 sps:$4 sm:$0xff]   ;;  %v7349_v20 = vld [vmem:[%s10698_s3 + $0xc4] ss:$16 sps:$4 sm:$0xff]  }
  0x2d   : > { %v1086_v15 = vsel %vm388_vm0, %v1084_v13, %v1085_v14  ;;  %v7352_v21 = vld [vmem:[%s10698_s3 + $0xcc] ss:$16 sps:$4 sm:$0xff]   ;;  %v7347_v22 = vld [vmem:[%s10698_s3 + $0xc0] ss:$16 sps:$4 sm:$0xff]   ;;  %v7350_v23 = vld [vmem:[%s10698_s3 + $0xc8] ss:$16 sps:$4 sm:$0xff]  }
  0x2e   : > { %6308 = vmatmul.mubr.msk.bf16.vlgmr.msra.gmra.mxu0 %vm381_vm1, %v534_v37  ;;  %v7355_v24 = vld [vmem:[%s10698_s3 + $0xa4] ss:$16 sps:$4 sm:$0xff]   ;;  %v7353_v25 = vld [vmem:[%s10698_s3 + $0xa0] ss:$16 sps:$4 sm:$0xff]   ;;  %v7358_v26 = vld [vmem:[%s10698_s3 + $0xac] ss:$16 sps:$4 sm:$0xff]  }
  0x2f   : > { %6311 = vmatmul.mubr.msk.bf16.vlgmr.msra.gmra.mxu1 %vm381_vm1, %v534_v37  ;;  %788 = vmatpush1.bf16.msra.mxu0 %v764_v38  ;;  %v7356_v27 = vld [vmem:[%s10698_s3 + $0xa8] ss:$16 sps:$4 sm:$0xff]   ;;  %v7361_v28 = vld [vmem:[%s10698_s3 + $0x84] ss:$16 sps:$4 sm:$0xff]   ;;  %v7364_v29 = vld [vmem:[%s10698_s3 + $0x8c] ss:$16 sps:$4 sm:$0xff]  }
  0x30   : > { %839 = vmatpush1.bf16.msra.mxu1 %v770_v39  ;;  %634 = vmatprep.mubr.bf16.mxu0 %v8185_v3  ;;  %v7359_v30 = vld [vmem:[%s10698_s3 + $0x80] ss:$16 sps:$4 sm:$0xff]   ;;  %v7362_v31 = vld [vmem:[%s10698_s3 + $0x88] ss:$16 sps:$4 sm:$0xff]   ;;  %v7367_v32 = vld [vmem:[%s10698_s3 + $0x64] ss:$16 sps:$4 sm:$0xff]  }
  0x31   : > { %685 = vmatprep.mubr.bf16.mxu1 %v8185_v3  ;;  %789 = vmatprep.subr.bf16.mxu0 %v7313_v40  ;;  %v7370_v33 = vld [vmem:[%s10698_s3 + $0x6c] ss:$16 sps:$4 sm:$0xff]   ;;  %v7365_v34 = vld [vmem:[%s10698_s3 + $0x60] ss:$16 sps:$4 sm:$0xff]   ;;  %v7368_v35 = vld [vmem:[%s10698_s3 + $0x68] ss:$16 sps:$4 sm:$0xff]  }
  0x32   : > { %840 = vmatprep.subr.bf16.mxu1 %v7316_v41  ;;  %vm1282_vm5 = vcmask 130048   ;;  %vm1734_vm6 = vcmask 1041409   ;;  %vm1737_vm7 = vcmask 1042434   ;;  %vm1740_vm8 = vcmask 1043459  }
  0x33   : > { %790 = vmatpush1.bf16.msra.mxu0 %v7311_v43  ;;  %vm1743_vm9 = vcmask 1044484   ;;  %vm1746_vm10 = vcmask 1045509   ;;  %vm1749_vm11 = vcmask 1046534   ;;  %vm1752_vm12 = vcmask 1047559  }
  0x34   : > { %841 = vmatpush1.bf16.msra.mxu1 %v7314_v44  ;;  %6351 = vmatprep.subr.msk.bf16.mxu0 %vm388_vm0, %v7317_v45  ;;  %vm2071_vm13 = vcmask 916480   ;;  %vm4110_vm14 = vcmask 457728   ;;  %vm4250_vm15 = vcmask 588800   ;;  %vm6118_vm2 = vcmask 1041408  }
  0x35   : > { %6354 = vmatprep.subr.msk.bf16.mxu1 %vm388_vm0, %v7319_v46  ;;  %vm6114_vm3 = vcmask 949248  }
  0x36   : > { %6309 = vmatmul.mubr.msk.bf16.gmra.mxu0 %vm381_vm1, %v537_v47 }
  0x37   : > { %6312 = vmatmul.mubr.msk.bf16.gmra.mxu1 %vm381_vm1, %v537_v47  ;;  %807 = vmatprep.mubr.bf16.mxu0 %v8185_v3 }
  0x38   : > { %858 = vmatprep.mubr.bf16.mxu1 %v8185_v3 }
  0x3e   : > { %6330 = vmatmul.mubr.msk.bf16.vlgmr.msra.gmra.mxu0 %vm381_vm1, %v720_v52 }
  0x3f   : > { %6333 = vmatmul.mubr.msk.bf16.vlgmr.msra.gmra.mxu1 %vm381_vm1, %v720_v52  ;;  %973 = vmatpush1.bf16.msra.mxu0 %v949_v55 }
  0x40   : > { %1024 = vmatpush1.bf16.msra.mxu1 %v955_v56  ;;  %817 = vmatprep.mubr.bf16.mxu0 %v8185_v3 }
  0x41   : > { %868 = vmatprep.mubr.bf16.mxu1 %v8185_v3  ;;  %974 = vmatprep.subr.bf16.mxu0 %v7325_v53 }
  0x42   : > { %1025 = vmatprep.subr.bf16.mxu1 %v7328_v54 }
  0x43   : > { %975 = vmatpush1.bf16.msra.mxu0 %v7323_v57 }
  0x44   : > { %1026 = vmatpush1.bf16.msra.mxu1 %v7326_v58  ;;  %6373 = vmatprep.subr.msk.bf16.mxu0 %vm388_vm0, %v7329_v59 }
  0x45   : > { %6376 = vmatprep.subr.msk.bf16.mxu1 %vm388_vm0, %v7331_v60  ;;  %vm4284_vm0 = vcmask 719872  }
  0x46   : > { %6331 = vmatmul.mubr.msk.bf16.gmra.mxu0 %vm381_vm1, %v719_v51 }
  0x47   : > { %6334 = vmatmul.mubr.msk.bf16.gmra.mxu1 %vm381_vm1, %v719_v51  ;;  %992 = vmatprep.mubr.bf16.mxu0 %v8185_v3 }
  0x48   : > { %1043 = vmatprep.mubr.bf16.mxu1 %v8185_v3 }
  0x4e   : > { %6352 = vmatmul.mubr.msk.bf16.vlgmr.msra.gmra.mxu0 %vm381_vm1, %v905_v6 }
  0x4f   : > { %6355 = vmatmul.mubr.msk.bf16.vlgmr.msra.gmra.mxu1 %vm381_vm1, %v905_v6  ;;  %1154 = vmatpush1.bf16.msra.mxu0 %v1130_v9 }
  0x50   : > { %1205 = vmatpush1.bf16.msra.mxu1 %v1136_v10  ;;  %1002 = vmatprep.mubr.bf16.mxu0 %v8185_v3 }
  0x51   : > { %1053 = vmatprep.mubr.bf16.mxu1 %v8185_v3  ;;  %1155 = vmatprep.subr.bf16.mxu0 %v7337_v7 }
  0x52   : > { %1206 = vmatprep.subr.bf16.mxu1 %v7340_v8 }
  0x53   : > { %1156 = vmatpush1.bf16.msra.mxu0 %v7335_v11 }
  0x54   : > { %1207 = vmatpush1.bf16.msra.mxu1 %v7338_v12  ;;  %2075 = vmatprep.subr.bf16.mxu0 %v7343_v17 }
  0x55   : > { %2116 = vmatprep.subr.bf16.mxu1 %v7346_v19 }
  0x56   : > { %6353 = vmatmul.mubr.msk.bf16.gmra.mxu0 %vm381_vm1, %v904_v5 }
  0x57   : > { %6356 = vmatmul.mubr.msk.bf16.gmra.mxu1 %vm381_vm1, %v904_v5  ;;  %1173 = vmatprep.mubr.bf16.mxu0 %v8185_v3 }
  0x58   : > { %1224 = vmatprep.mubr.bf16.mxu1 %v8185_v3 }
  0x5e   : > { %6374 = vmatmul.mubr.msk.bf16.vlgmr.msra.gmra.mxu0 %vm381_vm1, %v1086_v15 }
  0x5f   : > { %6377 = vmatmul.mubr.msk.bf16.vlgmr.msra.gmra.mxu1 %vm381_vm1, %v1086_v15  ;;  %1183 = vmatprep.mubr.bf16.mxu0 %v8185_v3 }
  0x60   : > { %1234 = vmatprep.mubr.bf16.mxu1 %v8185_v3  ;;  %2076 = vmatpush1.bf16.msra.mxu0 %v7341_v16 }
  0x61   : > { %2117 = vmatpush1.bf16.msra.mxu1 %v7344_v18  ;;  %2077 = vmatprep.subr.bf16.mxu0 %v7349_v20 }
  0x62   : > { %2118 = vmatprep.subr.bf16.mxu1 %v7352_v21 }
  0x64   : > { %2078 = vmatpush1.bf16.msra.mxu0 %v7347_v22 }
  0x65   : > { %2119 = vmatpush1.bf16.msra.mxu1 %v7350_v23  ;;  %2079 = vmatprep.subr.bf16.mxu0 %v7355_v24 }
  0x66   : > { %6375 = vmatmul.mubr.msk.bf16.gmra.mxu0 %vm381_vm1, %v1085_v14  ;;  %2120 = vmatprep.subr.bf16.mxu1 %v7358_v26 }
  0x67   : > { %6378 = vmatmul.mubr.msk.bf16.gmra.mxu1 %vm381_vm1, %v1085_v14  ;;  %vm5521_vm1 = vcmask 261120  }
  0x68   : > { %2080 = vmatpush1.bf16.msra.mxu0 %v7353_v25 }
  0x69   : > { %2121 = vmatpush1.bf16.msra.mxu1 %v7356_v27  ;;  %2081 = vmatprep.subr.bf16.mxu0 %v7361_v28 }
  0x6a   : > { %2122 = vmatprep.subr.bf16.mxu1 %v7364_v29 }
  0x6c   : > { %2082 = vmatpush1.bf16.msra.mxu0 %v7359_v30 }
  0x6d   : > { %2123 = vmatpush1.bf16.msra.mxu1 %v7362_v31  ;;  %2083 = vmatprep.subr.bf16.mxu0 %v7367_v32 }
  0x6e   : > { %2124 = vmatprep.subr.bf16.mxu1 %v7370_v33 }
  0x70   : > { %2084 = vmatpush1.bf16.msra.mxu0 %v7365_v34  ;;  %v7373_v34 = vld [vmem:[%s10698_s3 + $0x44] ss:$16 sps:$4 sm:$0xff]  }
  0x71   : > { %2125 = vmatpush1.bf16.msra.mxu1 %v7368_v35  ;;  %v7376_v35 = vld [vmem:[%s10698_s3 + $0x4c] ss:$16 sps:$4 sm:$0xff]   ;;  %2085 = vmatprep.subr.bf16.mxu0 %v7373_v34 }
  0x72   : > { %2126 = vmatprep.subr.bf16.mxu1 %v7376_v35 }
  0xde   : > { %v435_v36 = vpop.f32.mrf.mxu0 }
  0xdf   : > { %v8566_v37 = vpop.f32.mrf.mxu1 }
  0xe0   : > { %v8568_v38 = vpop.f32.mrf.mxu0 }
  0xe1   : > { %v8570_v39 = vpop.f32.mrf.mxu1 }
  0xe2   : > { %v439_v40 = vpop.f32.mrf.mxu0 }
  0xe3   : > { %v8572_v41 = vpop.f32.mrf.mxu1 }
  0xe4   : > { %v8574_v42 = vpop.f32.mrf.mxu0 }
  0xe5   : > { %v8576_v43 = vpop.f32.mrf.mxu1 }
  0xe6   : > { %v445_v44 = vpop.f32.mrf.mxu0 }
  0xe7   : > { %v8578_v45 = vpop.f32.mrf.mxu1 }
  0xe8   : > { %v8580_v46 = vpop.f32.mrf.mxu0 }
  0xe9   : > { %v8582_v47 = vpop.f32.mrf.mxu1 }
  0xea   : > { %v449_v48 = vpop.f32.mrf.mxu0 }
  0xeb   : > { %v500_v49 = vpop.f32.mrf.mxu1 }
  0xec   : > { %v450_v50 = vpop.f32.mrf.mxu0 }
  0xed   : > { %v501_v51 = vpop.f32.mrf.mxu1 }
  0xee   : > { %v626_v52 = vpop.f32.mrf.mxu0 }
  0xef   : > { %v8584_v53 = vpop.f32.mrf.mxu1  ;;  %v694_v54 = vadd.f32 %v626_v52, %v435_v36 }
  0xf0   : > { %v8586_v55 = vpop.f32.mrf.mxu0 }
  0xf1   : > { %v8588_v56 = vpop.f32.mrf.mxu1 }
  0xf2   : > { %v630_v57 = vpop.f32.mrf.mxu0 }
  0xf3   : > { %v8590_v58 = vpop.f32.mrf.mxu1  ;;  %v698_v59 = vadd.f32 %v630_v57, %v439_v40  ;;  %v7371_v40 = vld [vmem:[%s10698_s3 + $0x40] ss:$16 sps:$4 sm:$0xff]  }
  0xf4   : > { %v8592_v60 = vpop.f32.mrf.mxu0  ;;  %2086 = vmatpush1.bf16.msra.mxu0 %v7371_v40 }
  0xf5   : > { %v8594_v61 = vpop.f32.mrf.mxu1 }
  0xf6   : > { %v636_v62 = vpop.f32.mrf.mxu0 }
  0xf7   : > { %v8596_v63 = vpop.f32.mrf.mxu1  ;;  %v702_v0 = vadd.f32 %v636_v62, %v445_v44  ;;  %v7374_v44 = vld [vmem:[%s10698_s3 + $0x48] ss:$16 sps:$4 sm:$0xff]   ;;  %v7377_v62 = vld [vmem:[%s10698_s3 + $0x20] ss:$16 sps:$4 sm:$0xff]  }
  0xf8   : > { %v8598_v1 = vpop.f32.mrf.mxu0  ;;  %2127 = vmatpush1.bf16.msra.mxu1 %v7374_v44 }
  0xf9   : > { %v8600_v2 = vpop.f32.mrf.mxu1 }
  0xfa   : > { %v640_v4 = vpop.f32.mrf.mxu0 }
  0xfb   : > { %v691_v5 = vpop.f32.mrf.mxu1  ;;  %v696_v4 = vadd.f32 %v8584_v53, %v8566_v37  ;;  %v7388_v37 = vld [vmem:[%s10698_s3 + $0xc] ss:$16 sps:$4 sm:$0xff]  }
  0xfc   : > { %v641_v6 = vpop.f32.mrf.mxu0  ;;  %v7382_v5 = vld [vmem:[%s10698_s3 + $0x2c] ss:$16 sps:$4 sm:$0xff]  }
  0xfd   : > { %v692_v7 = vpop.f32.mrf.mxu1  ;;  %2128 = vmatprep.subr.bf16.mxu1 %v7382_v5 }
  0xfe   : > { %v809_v8 = vpop.f32.mrf.mxu0 }
  0xff   : > { %v860_v9 = vpop.f32.mrf.mxu1  ;;  %v877_v10 = vadd.f32 %v809_v8, %v694_v54  ;;  %v7379_v54 = vld [vmem:[%s10698_s3 + $0x24] ss:$16 sps:$4 sm:$0xff]   ;;  %v697_v8 = vadd.f32 %v8588_v56, %v8570_v39  ;;  %v7386_v39 = vld [vmem:[%s10698_s3 + $0x8] ss:$16 sps:$4 sm:$0xff]   ;;  %v695_v56 = vadd.f32 %v8586_v55, %v8568_v38  ;;  %v700_v38 = vadd.f32 %v8590_v58, %v8572_v41 }
 0x100   : > { %v8602_v11 = vpop.f32.mrf.mxu0  ;;  %2087 = vmatprep.subr.bf16.mxu0 %v7379_v54 }
 0x101   : > { %v862_v12 = vpop.f32.mrf.mxu1  ;;  %2088 = vmatpush1.bf16.msra.mxu0 %v7377_v62 }
 0x102   : > { %v813_v13 = vpop.f32.mrf.mxu0 }
 0x103   : > { %v8604_v14 = vpop.f32.mrf.mxu1  ;;  %v881_v15 = vadd.f32 %v813_v13, %v698_v59  ;;  %v7385_v13 = vld [vmem:[%s10698_s3 + $0x4] ss:$16 sps:$4 sm:$0xff]  }
 0x104   : > { %v8606_v16 = vpop.f32.mrf.mxu0  ;;  %2089 = vmatprep.subr.bf16.mxu0 %v7385_v13 }
 0x105   : > { %v8608_v17 = vpop.f32.mrf.mxu1 }
 0x106   : > { %v819_v18 = vpop.f32.mrf.mxu0 }
 0x107   : > { %v8610_v19 = vpop.f32.mrf.mxu1  ;;  %v885_v20 = vadd.f32 %v819_v18, %v702_v0  ;;  %v7380_v0 = vld [vmem:[%s10698_s3 + $0x28] ss:$16 sps:$4 sm:$0xff]   ;;  %v7383_v18 = vld [vmem:[%s10698_s3] ss:$16 sps:$4 sm:$0xff]  }
 0x108   : > { %v8612_v21 = vpop.f32.mrf.mxu0  ;;  %2129 = vmatpush1.bf16.msra.mxu1 %v7380_v0  ;;  %2090 = vmatpush1.bf16.msra.mxu0 %v7383_v18  ;;  %v7406_v18 = vld [vmem:[%s10698_s3 + $0x18c] ss:$16 sps:$4 sm:$0xff]  }
 0x109   : > { %v8614_v22 = vpop.f32.mrf.mxu1  ;;  %2130 = vmatprep.subr.bf16.mxu1 %v7388_v37 }
 0x10a   : > { %v823_v23 = vpop.f32.mrf.mxu0 }
 0x10b   : > { %v874_v24 = vpop.f32.mrf.mxu1  ;;  %v699_v23 = vadd.f32 %v8592_v60, %v8574_v42  ;;  %v701_v42 = vadd.f32 %v8594_v61, %v8576_v43 }
 0x10c   : > { %v824_v25 = vpop.f32.mrf.mxu0  ;;  %2131 = vmatpush1.bf16.msra.mxu1 %v7386_v39  ;;  %v7401_v39 = vld [vmem:[%s10698_s3 + $0x180] ss:$16 sps:$4 sm:$0xff]  }
 0x10d   : > { %v875_v26 = vpop.f32.mrf.mxu1  ;;  %v882_v55 = vadd.f32 %v8606_v16, %v699_v23  ;;  %v703_v16 = vadd.f32 %v8598_v1, %v8580_v46  ;;  %v7391_v1 = vld [vmem:[%s10698_s3 + $0x1c4] ss:$16 sps:$4 sm:$0xff]   ;;  %v7407_v23 = vld [vmem:[%s10698_s3 + $0x160] ss:$16 sps:$4 sm:$0xff]  }
 0x10e   : > { %v994_v27 = vpop.f32.mrf.mxu0  ;;  %v878_v26 = vadd.f32 %v8602_v11, %v695_v56  ;;  %2093 = vmatprep.subr.bf16.mxu0 %v7391_v1  ;;  %v7404_v56 = vld [vmem:[%s10698_s3 + $0x188] ss:$16 sps:$4 sm:$0xff]  }
 0x10f   : > { %v1045_v28 = vpop.f32.mrf.mxu1  ;;  %v1062_v29 = vadd.f32 %v994_v27, %v877_v10  ;;  %v879_v10 = vadd.f32 %v860_v9, %v696_v4  ;;  %v880_v9 = vadd.f32 %v862_v12, %v697_v8  ;;  %v886_v54 = vadd.f32 %v8612_v21, %v703_v16 }
 0x110   : > { %v996_v30 = vpop.f32.mrf.mxu0 }
 0x111   : > { %v1047_v31 = vpop.f32.mrf.mxu1  ;;  %v1063_v12 = vadd.f32 %v996_v30, %v878_v26  ;;  %v884_v30 = vadd.f32 %v8608_v17, %v701_v42  ;;  %v7418_v26 = vld [vmem:[%s10698_s3 + $0x14c] ss:$16 sps:$4 sm:$0xff]   ;;  %v7425_v42 = vld [vmem:[%s10698_s3 + $0x100] ss:$16 sps:$4 sm:$0xff]  }
 0x112   : > { %v998_v32 = vpop.f32.mrf.mxu0  ;;  %v1065_v27 = vadd.f32 %v1047_v31, %v880_v9  ;;  %v7409_v9 = vld [vmem:[%s10698_s3 + $0x164] ss:$16 sps:$4 sm:$0xff]  }
 0x113   : > { %v8616_v33 = vpop.f32.mrf.mxu1  ;;  %v1066_v36 = vadd.f32 %v998_v32, %v881_v15 }
 0x114   : > { %v1000_v48 = vpop.f32.mrf.mxu0 }
 0x115   : > { %v8630_v49 = vpop.f32.mrf.mxu1  ;;  %v1067_v31 = vadd.f32 %v1000_v48, %v882_v55  ;;  %v7422_v55 = vld [vmem:[%s10698_s3 + $0x128] ss:$16 sps:$4 sm:$0xff]  }
 0x116   : > { %v1004_v50 = vpop.f32.mrf.mxu0  ;;  %v1069_v62 = vadd.f32 %v8630_v49, %v884_v30  ;;  %v7392_v49 = vld [vmem:[%s10698_s3 + $0x1c8] ss:$16 sps:$4 sm:$0xff]   ;;  %v1421_v30 = vld [vmem:[%s10697_s2] sm:$0x3] }
 0x117   : > { %v8632_v51 = vpop.f32.mrf.mxu1  ;;  %v8634_v52 = vadd.f32 %v1004_v50, %v885_v20  ;;  %v1064_v20 = vadd.f32 %v1045_v28, %v879_v10 }
 0x118   : > { %v8639_v57 = vpop.f32.mrf.mxu0 }
 0x119   : > { %v8641_v59 = vpop.f32.mrf.mxu1  ;;  %v1071_v4 = vadd.f32 %v8639_v57, %v886_v54 }
 0x11a   : > { %v1008_v6 = vpop.f32.mrf.mxu0 }
 0x11b   : > { %v1059_v7 = vpop.f32.mrf.mxu1 }
 0x11c   : > { %v1009_v53 = vpop.f32.mrf.mxu0 }
 0x11d   : > { %v1060_v15 = vpop.f32.mrf.mxu1  ;;  %v7398_v53 = vld [vmem:[%s10698_s3 + $0x1a8] ss:$16 sps:$4 sm:$0xff]  }
 0x11e   : > { %v1175_v24 = vpop.f32.mrf.mxu0  ;;  %v7403_v15 = vld [vmem:[%s10698_s3 + $0x184] ss:$16 sps:$4 sm:$0xff]  }
 0x11f   : > { %v1226_v25 = vpop.f32.mrf.mxu1  ;;  %v8673_v32 = vadd.f32 %v1175_v24, %v1062_v29  ;;  %v883_v29 = vadd.f32 %v8604_v14, %v700_v38  ;;  %v704_v14 = vadd.f32 %v8596_v63, %v8578_v45  ;;  %v7394_v45 = vld [vmem:[%s10698_s3 + $0x1cc] ss:$16 sps:$4 sm:$0xff]   ;;  %v705_v63 = vadd.f32 %v8600_v2, %v8582_v47  ;;  %v7410_v24 = vld [vmem:[%s10698_s3 + $0x168] ss:$16 sps:$4 sm:$0xff]   ;;  %v7419_v38 = vld [vmem:[%s10698_s3 + $0x120] ss:$16 sps:$4 sm:$0xff]  }
 0x120   : > { %v1245_v34 = vadd.f32 %v1226_v25, %v1064_v20  ;;  %v1177_v35 = vpop.f32.mrf.mxu0  ;;  %2134 = vmatprep.subr.bf16.mxu1 %v7394_v45  ;;  %v7412_v20 = vld [vmem:[%s10698_s3 + $0x16c] ss:$16 sps:$4 sm:$0xff]   ;;  %v7415_v25 = vld [vmem:[%s10698_s3 + $0x144] ss:$16 sps:$4 sm:$0xff]  }
 0x121   : > { %v1228_v40 = vpop.f32.mrf.mxu1  ;;  %v8682_v44 = vadd.f32 %v1177_v35, %v1063_v12  ;;  %v1068_v43 = vadd.f32 %v8616_v33, %v883_v29  ;;  %v7389_v33 = vld [vmem:[%s10698_s3 + $0x1c0] ss:$16 sps:$4 sm:$0xff]   ;;  %v888_v2 = vadd.f32 %v8614_v22, %v705_v63  ;;  %2135 = vmatpush2.bf16.msra.mxu1 %v7392_v49  ;;  %v7397_v22 = vld [vmem:[%s10698_s3 + $0x1a4] ss:$16 sps:$4 sm:$0xff]   ;;  %v7436_v29 = vld [vmem:[%s10698_s3 + $0x2cc] ss:$16 sps:$4 sm:$0xff]  }
 0x122   : > { %v1246_v28 = vadd.f32 %v1228_v40, %v1065_v27  ;;  %1266 = vrot.lane.b32.xlu0 %v1245_v34, %s8186_s27  ;;  %v1179_v60 = vpop.f32.mrf.mxu0  ;;  %2094 = vmatpush2.bf16.msra.mxu0 %v7389_v33  ;;  %v7413_v27 = vld [vmem:[%s10698_s3 + $0x140] ss:$16 sps:$4 sm:$0xff]   ;;  %v7416_v34 = vld [vmem:[%s10698_s3 + $0x148] ss:$16 sps:$4 sm:$0xff]   ;;  %v7421_v35 = vld [vmem:[%s10698_s3 + $0x124] ss:$16 sps:$4 sm:$0xff]  }
 0x123   : > { %v1230_v11 = vpop.f32.mrf.mxu1  ;;  %v8684_v50 = vadd.f32 %v1179_v60, %v1066_v36  ;;  %v1073_v57 = vadd.f32 %v8641_v59, %v888_v2  ;;  %v7395_v59 = vld [vmem:[%s10698_s3 + $0x1a0] ss:$16 sps:$4 sm:$0xff]   ;;  %2095 = vmatprep.subr.bf16.mxu0 %v7397_v22  ;;  %v7424_v40 = vld [vmem:[%s10698_s3 + $0x12c] ss:$16 sps:$4 sm:$0xff]   ;;  %v7427_v12 = vld [vmem:[%s10698_s3 + $0x104] ss:$16 sps:$4 sm:$0xff]  }
 0x124   : > { %1268 = vrot.lane.b32.xlu1 %v1246_v28, %s8186_s27  ;;  %v1181_v41 = vpop.f32.mrf.mxu0  ;;  %v1249_v0 = vadd.f32 %v1230_v11, %v1068_v43  ;;  %v7430_v28 = vld [vmem:[%s10698_s3 + $0x10c] ss:$16 sps:$4 sm:$0xff]   ;;  %v7428_v60 = vld [vmem:[%s10698_s3 + $0x108] ss:$16 sps:$4 sm:$0xff]   ;;  %v7433_v11 = vld [vmem:[%s10698_s3 + $0x2c4] ss:$16 sps:$4 sm:$0xff]  }
 0x125   : > { %v1232_v58 = vpop.f32.mrf.mxu1  ;;  %v8691_v61 = vadd.f32 %v1181_v41, %v1067_v31  ;;  %v1312_v31 = vlaneseq  ;;  %v8187_v43 = vmov 1983009808  }
 0x126   : > { %1264 = vrot.lane.b32.xlu0 %v8682_v44, %s8186_s27  ;;  %v1185_v36 = vpop.f32.mrf.mxu0  ;;  %v1250_v5 = vadd.f32 %v1232_v58, %v1069_v62  ;;  %2096 = vmatpush2.bf16.msra.mxu0 %v7395_v59 }
 0x127   : > { %v1236_v48 = vpop.f32.mrf.mxu1  ;;  %v8700_v46 = vadd.f32 %v1185_v36, %v8634_v52  ;;  %v887_v52 = vadd.f32 %v8610_v19, %v704_v14  ;;  %2097 = vmatprep.subr.bf16.mxu0 %v7403_v15  ;;  %v8809_v41 = vshrl.u32 %v1312_v31, 7  ;;  %v1310_v14 = vunpack.c.l.s4 %v8187_v43 }
 0x128   : > { %1270 = vrot.lane.b32.xlu1 %v8691_v61, %s8186_s27  ;;  %v1187_v17 = vpop.f32.mrf.mxu0 }
 0x129   : > { %v1238_v21 = vpop.f32.mrf.mxu1  ;;  %v1072_v7 = vadd.f32 %v8632_v51, %v887_v52  ;;  %v8723_v8 = vadd.f32 %v1187_v17, %v1071_v4  ;;  %v7400_v51 = vld [vmem:[%s10698_s3 + $0x1ac] ss:$16 sps:$4 sm:$0xff]   ;;  %v8812_v58 = vsub.s32 0, %v8809_v41  ;;  %v8815_v16 = vsub.s32 1, %v8809_v41 }
 0x12a   : > { %1272 = vrot.lane.b32.xlu0 %v1249_v0, %s8186_s27  ;;  %v1189_v6 = vpop.f32.mrf.mxu0  ;;  %v1254_v37 = vadd.f32 %v1238_v21, %v1073_v57  ;;  %2136 = vmatprep.subr.bf16.mxu1 %v7400_v51  ;;  %v1311_v54 = vunpack.c.0.s8 %v1310_v14 }
 0x12b   : > { %v1240_v47 = vpop.f32.mrf.mxu1  ;;  %v1253_v13 = vadd.f32 %v1236_v48, %v1072_v7  ;;  %2137 = vmatpush2.bf16.msra.mxu1 %v7398_v53  ;;  %2098 = vmatpush2.bf16.msra.mxu0 %v7401_v39  ;;  %v1426_v36 = vrot.slane %v1421_v30, %v8812_v58  ;;  %v1430_v48 = vrot.slane %v1421_v30, %v8815_v16 }
 0x12c   : > { %1274 = vrot.lane.b32.xlu1 %v1250_v5, %s8186_s27  ;;  %v1190_v19 = vpop.f32.mrf.mxu0  ;;  %2138 = vmatprep.subr.bf16.mxu1 %v7406_v18  ;;  %v8824_v63 = vsub.s32 %v1311_v54, %v8809_v41 }
 0x12d   : > { %v1241_v10 = vpop.f32.mrf.mxu1  ;;  %2099 = vmatprep.subr.bf16.mxu0 %v7409_v9  ;;  %v1431_v0 = vcombine.low %v1426_v36, %v1430_v48  ;;  %v1432_v49 = vcombine.high %v1426_v36, %v1430_v48 }
 0x12e   : > { %1276 = vrot.lane.b32.xlu0 %v8723_v8, %s8186_s27 }
 0x12f   : > { %2139 = vmatpush2.bf16.msra.mxu1 %v7404_v56  ;;  %2100 = vmatpush2.bf16.msra.mxu0 %v7407_v23  ;;  %v8827_v21 = vrot.slane %v1431_v0, %v8824_v63  ;;  %v8837_v19 = vrot.slane %v1432_v49, %v8824_v63 }
 0x130   : > { %1278 = vrot.lane.b32.xlu1 %v1253_v13, %s8186_s27  ;;  %2140 = vmatprep.subr.bf16.mxu1 %v7412_v20 }
 0x131   : > { %2101 = vmatprep.subr.bf16.mxu0 %v7415_v25  ;;  %v8834_v7 = vcombine.high %v8827_v21, %v8827_v21  ;;  %v8851_v9 = vcombine.high %v8837_v19, %v8837_v19 }
 0x132   : > { %1280 = vrot.lane.b32.xlu0 %v1254_v37, %s8186_s27  ;;  %v8844_v37 = vsub.s32 2, %v8809_v41 }
 0x133   : > { %2141 = vmatpush2.bf16.msra.mxu1 %v7410_v24  ;;  %2102 = vmatpush2.bf16.msra.mxu0 %v7413_v27  ;;  %v1450_v39 = vrot.slane %v8834_v7, 1 }
 0x134   : > { %2142 = vmatprep.subr.bf16.mxu1 %v7418_v26  ;;  %2103 = vmatprep.subr.bf16.mxu0 %v7421_v35 }
 0x137   : > { %2143 = vmatpush2.bf16.msra.mxu1 %v7416_v34  ;;  %2104 = vmatpush2.bf16.msra.mxu0 %v7419_v38  ;;  %v1451_v34 = vrot.slane %v8837_v19, 1 }
 0x138   : > { %2144 = vmatprep.subr.bf16.mxu1 %v7424_v40  ;;  %2105 = vmatprep.subr.bf16.mxu0 %v7427_v12 }
 0x13b   : > { %2145 = vmatpush2.bf16.msra.mxu1 %v7422_v55  ;;  %2106 = vmatpush2.bf16.msra.mxu0 %v7425_v42 }
 0x13c   : > { %2146 = vmatprep.subr.bf16.mxu1 %v7430_v28  ;;  %2560 = vmatprep.subr.bf16.mxu0 %v7433_v11 }
 0x13f   : > { %2147 = vmatpush2.bf16.msra.mxu1 %v7428_v60 }
 0x140   : > { %2601 = vmatprep.subr.bf16.mxu1 %v7436_v29 }
 0x194   : > { %v1267_v62 = vpop.permute.xlu0 %1266 }
 0x196   : > { %v1269_v1 = vpop.permute.xlu1 %1268 }
 0x197   : > { %v1284_v45 = vsel %vm1282_vm5, %v1267_v62, %v1269_v1 }
 0x198   : > { %v1265_v17 = vpop.permute.xlu0 %1264  ;;  %v1296_v52 = vmax.f32 %v8682_v44, %v1284_v45 }
 0x199   : > { %v1283_v33 = vsel %vm1282_vm5, %v1265_v17, %v1267_v62 }
 0x19a   : > { %v1295_v4 = vmax.f32 %v8673_v32, %v1283_v33  ;;  %v1271_v5 = vpop.permute.xlu1 %1270  ;;  %v1449_v32 = vrot.slane %v8827_v21, 1 }
 0x19c   : > { %v1307_v6 = vcombine.low %v1295_v4, %v1296_v52  ;;  %v1308_v47 = vcombine.high %v1295_v4, %v1296_v52  ;;  %v1273_v2 = vpop.permute.xlu0 %1272 }
 0x19d   : > { %v1285_v13 = vsel %vm1282_vm5, %v1271_v5, %v1273_v2 }
 0x19e   : > { %v1315_v10 = vrot.slane %v1307_v6, %v8824_v63  ;;  %v1322_v57 = vrot.slane %v1308_v47, %v8824_v63  ;;  %v1275_v44 = vpop.permute.xlu1 %1274  ;;  %v1297_v56 = vmax.f32 %v8684_v50, %v1285_v13 }
 0x19f   : > { %v1286_v22 = vsel %vm1282_vm5, %v1273_v2, %v1275_v44 }
 0x1a0   : > { %v1323_v51 = vcombine.high %v1315_v10, %v1315_v10  ;;  %v1324_v59 = vcombine.high %v1322_v57, %v1322_v57  ;;  %v6379_v53 = vrot.slane %v1315_v10, 9  ;;  %v6381_v15 = vrot.slane %v1322_v57, 9  ;;  %v1277_v18 = vpop.permute.xlu0 %1276 }
 0x1a1   : > { %v1298_v20 = vmax.f32 %v8691_v61, %v1286_v22  ;;  %v1452_v61 = vrot.slane %v8851_v9, 1 }
 0x1a2   : > { %v6380_v23 = vrot.slane %v1323_v51, 9  ;;  %v6382_v24 = vrot.slane %v1324_v59, 9  ;;  %v1409_v25 = vmax.f32 %v1315_v10, %v6379_v53  ;;  %v1411_v26 = vmax.f32 %v1322_v57, %v6381_v15  ;;  %v1279_v27 = vpop.permute.xlu1 %1278 }
 0x1a3   : > { %v1325_v35 = vcombine.low %v1297_v56, %v1298_v20  ;;  %v1326_v40 = vcombine.high %v1297_v56, %v1298_v20  ;;  %v1287_v38 = vsel %vm1282_vm5, %v1277_v18, %v1279_v27 }
 0x1a4   : > { %v1410_v55 = vmax.f32 %v1323_v51, %v6380_v23  ;;  %v1412_v12 = vmax.f32 %v1324_v59, %v6382_v24  ;;  %v1461_v50 = vadd.f32 %v8827_v21, %v1409_v25  ;;  %v1463_v28 = vadd.f32 %v8834_v7, %v1411_v26  ;;  %v1281_v42 = vpop.permute.xlu0 %1280 }
 0x1a5   : > { %v1333_v60 = vrot.slane %v1325_v35, %v8824_v63  ;;  %v1340_v11 = vrot.slane %v1326_v40, %v8824_v63  ;;  %v8862_v29 = vmax.f32 %v8700_v46, %v1287_v38  ;;  %v1288_v62 = vsel %vm1282_vm5, %v1279_v27, %v1281_v42 }
 0x1a6   : > { %v1462_v31 = vadd.f32 %v1449_v32, %v1410_v55  ;;  %v1464_v30 = vadd.f32 %v1450_v39, %v1412_v12  ;;  %v1473_v43 = vmax.f32 %v1461_v50, 0.0  ;;  %v1475_v14 = vmax.f32 %v1463_v28, 0.0 }
 0x1a7   : > { %v1341_v36 = vcombine.high %v1333_v60, %v1333_v60  ;;  %v1342_v48 = vcombine.high %v1340_v11, %v1340_v11  ;;  %v6383_v54 = vrot.slane %v1333_v60, 9  ;;  %v6385_v52 = vrot.slane %v1340_v11, 9 }
 0x1a8   : > { %v1474_v0 = vmax.f32 %v1462_v31, 0.0  ;;  %v1476_v1 = vmax.f32 %v1464_v30, 0.0  ;;  %v1500_v45 = vrot.slane %v1473_v43, %v8812_v58  ;;  %v1504_v46 = vrot.slane %v1473_v43, %v8844_v37 }
 0x1a9   : > { %v1516_v17 = vrot.slane %v1475_v14, %v8812_v58  ;;  %v1520_v33 = vrot.slane %v1475_v14, %v8844_v37  ;;  %v6384_v49 = vrot.slane %v1341_v36, 9  ;;  %v6386_v56 = vrot.slane %v1342_v48, 9 }
 0x1aa   : > { %v1508_v4 = vrot.slane %v1474_v0, %v8812_v58  ;;  %v1512_v5 = vrot.slane %v1474_v0, %v8844_v37  ;;  %v1524_v6 = vrot.slane %v1476_v1, %v8812_v58  ;;  %v1528_v47 = vrot.slane %v1476_v1, %v8844_v37 }
 0x1ab   : > { %v1617_v2 = vpack.c.bf16 %v1500_v45, %v1500_v45  ;;  %v1618_v10 = vpack.c.bf16 %v1504_v46, %v1504_v46  ;;  %v1621_v57 = vpack.c.bf16 %v1516_v17, %v1516_v17  ;;  %v1622_v13 = vpack.c.bf16 %v1520_v33, %v1520_v33 }
 0x1ac   : > { %v1619_v44 = vpack.c.bf16 %v1508_v4, %v1508_v4  ;;  %v1620_v22 = vpack.c.bf16 %v1512_v5, %v1512_v5  ;;  %v1623_v51 = vpack.c.bf16 %v1524_v6, %v1524_v6  ;;  %v1624_v59 = vpack.c.bf16 %v1528_v47, %v1528_v47 }
 0x1ad   : > { %v1717_v53 = vunpack.c.l.b16 %v1617_v2  ;;  %v8877_v15 = vunpack.c.l.b16 %v1621_v57  ;;  %v8879_v18 = vunpack.c.l.b16 %v1622_v13  ;;  %v1718_v20 = vunpack.c.l.b16 %v1618_v10 }
 0x1ae   : > { %v8881_v23 = vunpack.c.l.b16 %v1619_v44  ;;  %v8883_v24 = vunpack.c.l.b16 %v1620_v22  ;;  %v8885_v25 = vunpack.c.l.b16 %v1624_v59  ;;  %v8887_v26 = vunpack.c.l.b16 %v1623_v51 }
 0x1af   : > { %v1736_v27 = vrot.slane %v8877_v15, 6  ;;  %v1756_v35 = vrot.slane %v8879_v18, 6  ;;  %v2226_v40 = vrot.slane %v8877_v15, 7  ;;  %v1413_v12 = vmax.f32 %v1333_v60, %v6383_v54 }
 0x1b0   : > { %v1733_v38 = vrot.slane %v8881_v23, 7  ;;  %v1754_v55 = vrot.slane %v8883_v24, 7  ;;  %v1414_v50 = vmax.f32 %v1341_v36, %v6384_v49  ;;  %v2240_v28 = vrot.slane %v8879_v18, 7 }
 0x1b1   : > { %v1415_v42 = vmax.f32 %v1340_v11, %v6385_v52  ;;  %v1416_v31 = vmax.f32 %v1342_v48, %v6386_v56  ;;  %v1300_v30 = vmax.f32 %v8723_v8, %v1288_v62  ;;  %v1465_v43 = vadd.f32 %v8837_v19, %v1413_v12 }
 0x1b2   : > { %v1466_v14 = vadd.f32 %v1451_v34, %v1414_v50  ;;  %v1755_v0 = vsel %vm1734_vm6, %v1754_v55, %v1718_v20  ;;  %v1758_v1 = vrot.slane %v8885_v25, 5  ;;  %v1735_v48 = vsel %vm1734_vm6, %v1733_v38, %v1717_v53 }
 0x1b3   : > { %v1467_v45 = vadd.f32 %v8851_v9, %v1415_v42  ;;  %v1468_v60 = vadd.f32 %v1452_v61, %v1416_v31  ;;  %v1343_v36 = vcombine.low %v8862_v29, %v1300_v30  ;;  %v1344_v11 = vcombine.high %v8862_v29, %v1300_v30 }
 0x1b4   : > { %v1477_v8 = vmax.f32 %v1465_v43, 0.0  ;;  %v1478_v54 = vmax.f32 %v1466_v14, 0.0  ;;  %v1757_v19 = vsel %vm1737_vm7, %v1756_v35, %v1755_v0  ;;  %v1738_v56 = vsel %vm1737_vm7, %v1736_v27, %v1735_v48 }
 0x1b5   : > { %v1479_v34 = vmax.f32 %v1467_v45, 0.0  ;;  %v1480_v62 = vmax.f32 %v1468_v60, 0.0  ;;  %v1351_v46 = vrot.slane %v1343_v36, %v8824_v63  ;;  %v1358_v17 = vrot.slane %v1344_v11, %v8824_v63 }
 0x1b6   : > { %v1532_v9 = vrot.slane %v1477_v8, %v8812_v58  ;;  %v1536_v61 = vrot.slane %v1477_v8, %v8844_v37  ;;  %v1540_v33 = vrot.slane %v1478_v54, %v8812_v58  ;;  %v1544_v29 = vrot.slane %v1478_v54, %v8844_v37 }
 0x1b7   : > { %v1548_v49 = vrot.slane %v1479_v34, %v8812_v58  ;;  %v1552_v52 = vrot.slane %v1479_v34, %v8844_v37  ;;  %v1556_v4 = vrot.slane %v1480_v62, %v8812_v58  ;;  %v1560_v5 = vrot.slane %v1480_v62, %v8844_v37 }
 0x1b8   : > { %v1625_v6 = vpack.c.bf16 %v1532_v9, %v1532_v9  ;;  %v1626_v47 = vpack.c.bf16 %v1536_v61, %v1536_v61  ;;  %v1627_v2 = vpack.c.bf16 %v1540_v33, %v1540_v33  ;;  %v1628_v10 = vpack.c.bf16 %v1544_v29, %v1544_v29 }
 0x1b9   : > { %v1629_v57 = vpack.c.bf16 %v1548_v49, %v1548_v49  ;;  %v1630_v13 = vpack.c.bf16 %v1552_v52, %v1552_v52  ;;  %v1631_v44 = vpack.c.bf16 %v1556_v4, %v1556_v4  ;;  %v1632_v22 = vpack.c.bf16 %v1560_v5, %v1560_v5 }
 0x1ba   : > { %v8916_v51 = vunpack.c.l.b16 %v1625_v6  ;;  %v8918_v59 = vunpack.c.l.b16 %v1626_v47  ;;  %v8920_v53 = vunpack.c.l.b16 %v1628_v10  ;;  %v8923_v20 = vunpack.c.l.b16 %v1627_v2 }
 0x1bb   : > { %v8925_v35 = vunpack.c.l.b16 %v1629_v57  ;;  %v8927_v38 = vunpack.c.l.b16 %v1630_v13  ;;  %v8929_v55 = vunpack.c.l.b16 %v1632_v22  ;;  %v1359_v12 = vcombine.high %v1351_v46, %v1351_v46 }
 0x1bc   : > { %v1360_v50 = vcombine.high %v1358_v17, %v1358_v17  ;;  %v6387_v42 = vrot.slane %v1351_v46, 9  ;;  %v6389_v31 = vrot.slane %v1358_v17, 9  ;;  %v8931_v30 = vunpack.c.l.b16 %v1631_v44 }
 0x1bd   : > { %v1759_v43 = vsel %vm1740_vm8, %v1758_v1, %v1757_v19  ;;  %v1760_v14 = vrot.slane %v8918_v59, 4  ;;  %v1762_v27 = vrot.slane %v8920_v53, 3  ;;  %v6388_v0 = vrot.slane %v1359_v12, 9 }
 0x1be   : > { %v6390_v45 = vrot.slane %v1360_v50, 9  ;;  %v1417_v60 = vmax.f32 %v1351_v46, %v6387_v42  ;;  %v1419_v36 = vmax.f32 %v1358_v17, %v6389_v31  ;;  %v1764_v48 = vrot.slane %v8927_v38, 2 }
 0x1bf   : > { %v1761_v11 = vsel %vm1743_vm9, %v1760_v14, %v1759_v43  ;;  %v1739_v8 = vrot.slane %v8887_v26, 5  ;;  %v1742_v54 = vrot.slane %v8916_v51, 4  ;;  %v1418_v34 = vmax.f32 %v1359_v12, %v6388_v0  ;;  %v7434_v12 = vld [vmem:[%s10698_s3 + $0x2c8] ss:$16 sps:$4 sm:$0xff]  }
 0x1c0   : > { %v1420_v62 = vmax.f32 %v1360_v50, %v6390_v45  ;;  %v1469_v1 = vadd.f32 %v8827_v21, %v1417_v60  ;;  %v1766_v19 = vrot.slane %v8929_v55, 1  ;;  %v8943_v9 = vadd.f32 %v8834_v7, %v1419_v36  ;;  %v7439_v60 = vld [vmem:[%s10698_s3 + $0x2a4] ss:$16 sps:$4 sm:$0xff]   ;;  %v7442_v36 = vld [vmem:[%s10698_s3 + $0x2ac] ss:$16 sps:$4 sm:$0xff]  }
 0x1c1   : > { %v1763_v46 = vsel %vm1746_vm10, %v1762_v27, %v1761_v11  ;;  %v1741_v17 = vsel %vm1740_vm8, %v1739_v8, %v1738_v56  ;;  %v1745_v61 = vrot.slane %v8923_v20, 3  ;;  %v8950_v33 = vadd.f32 %v1449_v32, %v1418_v34 }
 0x1c2   : > { %v8954_v29 = vadd.f32 %v1450_v39, %v1420_v62  ;;  %v1481_v49 = vmax.f32 %v1469_v1, 0.0  ;;  %v1748_v52 = vrot.slane %v8925_v35, 2  ;;  %v1765_v4 = vsel %vm1749_vm11, %v1764_v48, %v1763_v46 }
 0x1c3   : > { %v1744_v5 = vsel %vm1743_vm9, %v1742_v54, %v1741_v17  ;;  %v1751_v6 = vrot.slane %v8931_v30, 1  ;;  %v2241_v21 = vsel %vm1734_vm6, %v2240_v28, %v8883_v24  ;;  %v1482_v32 = vmax.f32 %v8950_v33, 0.0  ;;  %v7431_v28 = vld [vmem:[%s10698_s3 + $0x2c0] ss:$16 sps:$4 sm:$0xff]  }
 0x1c4   : > { %v1564_v7 = vrot.slane %v1481_v49, %v8812_v58  ;;  %v1568_v39 = vrot.slane %v1481_v49, %v8844_v37  ;;  %v1767_v47 = vsel %vm1752_vm12, %v1766_v19, %v1765_v4  ;;  %v1747_v10 = vsel %vm1746_vm10, %v1745_v61, %v1744_v5  ;;  %v7437_v49 = vld [vmem:[%s10698_s3 + $0x2a0] ss:$16 sps:$4 sm:$0xff]  }
 0x1c5   : > { %v1769_v2 = vpack.c.b16 %v1767_v47, %v1767_v47  ;;  %v2242_v57 = vrot.slane %v8885_v25, 6  ;;  %v2244_v13 = vrot.slane %v8918_v59, 5  ;;  %v1750_v56 = vsel %vm1749_vm11, %v1748_v52, %v1747_v10  ;;  %v7440_v52 = vld [vmem:[%s10698_s3 + $0x2a8] ss:$16 sps:$4 sm:$0xff]  }
 0x1c6   : > { %v1633_v44 = vpack.c.bf16 %v1564_v7, %v1564_v7  ;;  %v1634_v22 = vpack.c.bf16 %v1568_v39, %v1568_v39  ;;  %v2246_v24 = vrot.slane %v8920_v53, 4  ;;  %v1753_v50 = vsel %vm1752_vm12, %v1751_v6, %v1750_v56  ;;  %v7445_v7 = vld [vmem:[%s10698_s3 + $0x284] ss:$16 sps:$4 sm:$0xff]   ;;  %v7448_v39 = vld [vmem:[%s10698_s3 + $0x28c] ss:$16 sps:$4 sm:$0xff]  }
 0x1c7   : > { %6451 = vmatprep.mubr.msk.bf16.mxu0 %vm2071_vm13, %v1769_v2  ;;  %6452 = vmatprep.mubr.msk.bf16.mxu1 %vm2071_vm13, %v1769_v2  ;;  %v2243_v42 = vsel %vm1737_vm7, %v2242_v57, %v2241_v21  ;;  %v2248_v31 = vrot.slane %v8927_v38, 3  ;;  %v2250_v43 = vrot.slane %v8929_v55, 2  ;;  %v1768_v0 = vpack.c.b16 %v1753_v50, %v1753_v50  ;;  %v7446_v50 = vld [vmem:[%s10698_s3 + $0x288] ss:$16 sps:$4 sm:$0xff]  }
 0x1c8   : > { %v8985_v14 = vunpack.c.l.b16 %v1633_v44  ;;  %v8987_v27 = vunpack.c.l.b16 %v1634_v22  ;;  %v2245_v45 = vsel %vm1740_vm8, %v2244_v13, %v2243_v42  ;;  %v2227_v48 = vsel %vm1734_vm6, %v2226_v40, %v8881_v23  ;;  %v7451_v42 = vld [vmem:[%s10698_s3 + $0x264] ss:$16 sps:$4 sm:$0xff]  }
 0x1c9   : > { %v2247_v11 = vsel %vm1743_vm9, %v2246_v24, %v2245_v45  ;;  %v2228_v8 = vrot.slane %v8887_v26, 6  ;;  %v2230_v54 = vrot.slane %v8916_v51, 5  ;;  %2108 = vmatmul.mubr.bf16.vlgmr.msra.gmra.mxu0 %v1768_v0  ;;  %2149 = vmatmul.mubr.bf16.vlgmr.msra.gmra.mxu1 %v1768_v0  ;;  %v2232_v1 = vrot.slane %v8923_v20, 4 }
 0x1ca   : > { %v2249_v34 = vsel %vm1746_vm10, %v2248_v31, %v2247_v11  ;;  %v2252_v62 = vrot.slane %v8987_v27, 1  ;;  %v2234_v19 = vrot.slane %v8925_v35, 3  ;;  %2561 = vmatpush1.bf16.msra.mxu0 %v7431_v28  ;;  %2602 = vmatpush1.bf16.msra.mxu1 %v7434_v12  ;;  %v2236_v40 = vrot.slane %v8931_v30, 2 }
 0x1cb   : > { %v2251_v46 = vsel %vm1749_vm11, %v2250_v43, %v2249_v34  ;;  %v2229_v23 = vsel %vm1737_vm7, %v2228_v8, %v2227_v48  ;;  %v2238_v17 = vrot.slane %v8985_v14, 1  ;;  %2562 = vmatprep.subr.bf16.mxu0 %v7439_v60  ;;  %2603 = vmatprep.subr.bf16.mxu1 %v7442_v36  ;;  %v1576_v5 = vrot.slane %v1482_v32, %v8844_v37  ;;  %v7454_v36 = vld [vmem:[%s10698_s3 + $0x26c] ss:$16 sps:$4 sm:$0xff]  }
 0x1cc   : > { %v2253_v61 = vsel %vm1752_vm12, %v2252_v62, %v2251_v46  ;;  %v2231_v4 = vsel %vm1740_vm8, %v2230_v54, %v2229_v23  ;;  %v2725_v6 = vrot.slane %v8885_v25, 7  ;;  %v2727_v2 = vrot.slane %v8918_v59, 6  ;;  %v7452_v46 = vld [vmem:[%s10698_s3 + $0x268] ss:$16 sps:$4 sm:$0xff]  }
 0x1cd   : > { %v2255_v21 = vpack.c.b16 %v2253_v61, %v2253_v61  ;;  %v2233_v47 = vsel %vm1743_vm9, %v2232_v1, %v2231_v4  ;;  %v2729_v10 = vrot.slane %v8920_v53, 5  ;;  %v1636_v13 = vpack.c.bf16 %v1576_v5, %v1576_v5  ;;  %v7457_v61 = vld [vmem:[%s10698_s3 + $0x244] ss:$16 sps:$4 sm:$0xff]  }
 0x1ce   : > { %v2235_v57 = vsel %vm1746_vm10, %v2234_v19, %v2233_v47  ;;  %v2726_v44 = vsel %vm1734_vm6, %v2725_v6, %v8879_v18  ;;  %v2731_v22 = vrot.slane %v8927_v38, 4  ;;  %v2733_v28 = vrot.slane %v8929_v55, 3  ;;  %2563 = vmatpush1.bf16.msra.mxu0 %v7437_v49  ;;  %2604 = vmatpush1.bf16.msra.mxu1 %v7440_v52  ;;  %v7443_v18 = vld [vmem:[%s10698_s3 + $0x280] ss:$16 sps:$4 sm:$0xff]   ;;  %v7460_v49 = vld [vmem:[%s10698_s3 + $0x24c] ss:$16 sps:$4 sm:$0xff]  }
 0x1cf   : > { %6573 = vmatprep.mubr.msk.bf16.mxu0 %vm2071_vm13, %v2255_v21  ;;  %6574 = vmatprep.mubr.msk.bf16.mxu1 %vm2071_vm13, %v2255_v21  ;;  %v2237_v56 = vsel %vm1749_vm11, %v2236_v40, %v2235_v57  ;;  %v2728_v24 = vsel %vm1737_vm7, %v2727_v2, %v2726_v44  ;;  %v2735_v12 = vrot.slane %v8987_v27, 2  ;;  %v9054_v43 = vunpack.c.l.b16 %v1636_v13  ;;  %v7449_v19 = vld [vmem:[%s10698_s3 + $0x260] ss:$16 sps:$4 sm:$0xff]  }
 0x1d0   : > { %v9052_v31 = vsel %vm1752_vm12, %v2238_v17, %v2237_v56  ;;  %v2730_v0 = vsel %vm1740_vm8, %v2729_v10, %v2728_v24  ;;  %v1572_v45 = vrot.slane %v1482_v32, %v8812_v58  ;;  %v1483_v60 = vmax.f32 %v8943_v9, 0.0  ;;  %2564 = vmatprep.subr.bf16.mxu0 %v7445_v7  ;;  %2605 = vmatprep.subr.bf16.mxu1 %v7448_v39  ;;  %v7455_v44 = vld [vmem:[%s10698_s3 + $0x240] ss:$16 sps:$4 sm:$0xff]  }
 0x1d1   : > { %v2732_v11 = vsel %vm1743_vm9, %v2731_v22, %v2730_v0  ;;  %v2711_v48 = vrot.slane %v8887_v26, 7  ;;  %v2713_v8 = vrot.slane %v8916_v51, 6  ;;  %v2737_v34 = vrot.slane %v9054_v43, 1  ;;  %v7458_v22 = vld [vmem:[%s10698_s3 + $0x248] ss:$16 sps:$4 sm:$0xff]  }
 0x1d2   : > { %v2734_v54 = vsel %vm1746_vm10, %v2733_v28, %v2732_v11  ;;  %v1635_v33 = vpack.c.bf16 %v1572_v45, %v1572_v45  ;;  %v2715_v32 = vrot.slane %v8923_v20, 5  ;;  %v2717_v1 = vrot.slane %v8925_v35, 4  ;;  %2565 = vmatpush1.bf16.msra.mxu0 %v7443_v18  ;;  %2606 = vmatpush1.bf16.msra.mxu1 %v7446_v50  ;;  %v7466_v18 = vld [vmem:[%s10698_s3 + $0x22c] ss:$16 sps:$4 sm:$0xff]  }
 0x1d3   : > { %v2736_v9 = vsel %vm1749_vm11, %v2735_v12, %v2734_v54  ;;  %v2712_v62 = vsel %vm1734_vm6, %v2711_v48, %v8877_v15  ;;  %v2721_v15 = vrot.slane %v8985_v14, 2  ;;  %2566 = vmatprep.subr.bf16.mxu0 %v7451_v42  ;;  %2607 = vmatprep.subr.bf16.mxu1 %v7454_v36  ;;  %v2719_v4 = vrot.slane %v8931_v30, 3  ;;  %v7463_v12 = vld [vmem:[%s10698_s3 + $0x224] ss:$16 sps:$4 sm:$0xff]  }
 0x1d4   : > { %v9081_v23 = vsel %vm1752_vm12, %v2737_v34, %v2736_v9  ;;  %v9083_v40 = vunpack.c.l.b16 %v1635_v33  ;;  %v2714_v17 = vsel %vm1737_vm7, %v2713_v8, %v2712_v62  ;;  %v1584_v5 = vrot.slane %v1483_v60, %v8844_v37  ;;  %v7461_v33 = vld [vmem:[%s10698_s3 + $0x220] ss:$16 sps:$4 sm:$0xff]  }
 0x1d5   : > { %v2716_v52 = vsel %vm1740_vm8, %v2715_v32, %v2714_v17  ;;  %v3210_v6 = vrot.slane %v8918_v59, 7  ;;  %v3212_v39 = vrot.slane %v8920_v53, 6  ;;  %v3214_v47 = vrot.slane %v8927_v38, 5 }
 0x1d6   : > { %v2718_v21 = vsel %vm1743_vm9, %v2717_v1, %v2716_v52  ;;  %v2723_v7 = vrot.slane %v9083_v40, 1  ;;  %v1638_v10 = vpack.c.bf16 %v1584_v5, %v1584_v5  ;;  %v3216_v13 = vrot.slane %v8929_v55, 4  ;;  %2567 = vmatpush1.bf16.msra.mxu0 %v7449_v19  ;;  %2608 = vmatpush1.bf16.msra.mxu1 %v7452_v46  ;;  %v7469_v19 = vld [vmem:[%s10698_s3 + $0x204] ss:$16 sps:$4 sm:$0xff]   ;;  %v7472_v46 = vld [vmem:[%s10698_s3 + $0x20c] ss:$16 sps:$4 sm:$0xff]  }
 0x1d7   : > { %v2720_v2 = vsel %vm1746_vm10, %v2719_v4, %v2718_v21  ;;  %v3211_v57 = vsel %vm1734_vm6, %v3210_v6, %v8885_v25  ;;  %v3218_v28 = vrot.slane %v8987_v27, 3  ;;  %v3220_v25 = vrot.slane %v9054_v43, 2  ;;  %2568 = vmatprep.subr.bf16.mxu0 %v7457_v61  ;;  %2609 = vmatprep.subr.bf16.mxu1 %v7460_v49 }
 0x1d8   : > { %v2722_v56 = vsel %vm1749_vm11, %v2721_v15, %v2720_v2  ;;  %v3213_v24 = vsel %vm1737_vm7, %v3212_v39, %v3211_v57  ;;  %v9124_v42 = vunpack.c.l.b16 %v1638_v10  ;;  %v1580_v45 = vrot.slane %v1483_v60, %v8812_v58  ;;  %v7464_v60 = vld [vmem:[%s10698_s3 + $0x228] ss:$16 sps:$4 sm:$0xff]   ;;  %v7478_v57 = vld [vmem:[%s10698_s3 + $0x1ec] ss:$16 sps:$4 sm:$0xff]  }
 0x1d9   : > { %v9122_v50 = vsel %vm1752_vm12, %v2723_v7, %v2722_v56  ;;  %v3215_v0 = vsel %vm1740_vm8, %v3214_v47, %v3213_v24  ;;  %v3196_v11 = vrot.slane %v8916_v51, 7  ;;  %v3198_v48 = vrot.slane %v8923_v20, 6  ;;  %v7467_v7 = vld [vmem:[%s10698_s3 + $0x200] ss:$16 sps:$4 sm:$0xff]   ;;  %v7470_v39 = vld [vmem:[%s10698_s3 + $0x208] ss:$16 sps:$4 sm:$0xff]  }
 0x1da   : > { %v3217_v36 = vsel %vm1743_vm9, %v3216_v13, %v3215_v0  ;;  %v3222_v54 = vrot.slane %v9124_v42, 1  ;;  %v1637_v34 = vpack.c.bf16 %v1580_v45, %v1580_v45  ;;  %2569 = vmatpush1.bf16.msra.mxu0 %v7455_v44  ;;  %2610 = vmatpush1.bf16.msra.mxu1 %v7458_v22  ;;  %v3200_v62 = vrot.slane %v8925_v35, 5 }
 0x1db   : > { %v3219_v8 = vsel %vm1746_vm10, %v3218_v28, %v3217_v36  ;;  %v3197_v9 = vsel %vm1734_vm6, %v3196_v11, %v8887_v26  ;;  %v3204_v1 = vrot.slane %v8985_v14, 3  ;;  %2570 = vmatprep.subr.bf16.mxu0 %v7463_v12  ;;  %2611 = vmatprep.subr.bf16.mxu1 %v7466_v18  ;;  %v3202_v61 = vrot.slane %v8931_v30, 4  ;;  %v7481_v36 = vld [vmem:[%s10698_s3 + $0x3a4] ss:$16 sps:$4 sm:$0xff]   ;;  %v7484_v11 = vld [vmem:[%s10698_s3 + $0x3ac] ss:$16 sps:$4 sm:$0xff]  }
 0x1dc   : > { %v3221_v32 = vsel %vm1749_vm11, %v3220_v25, %v3219_v8  ;;  %v9153_v15 = vunpack.c.l.b16 %v1637_v34  ;;  %v3199_v26 = vsel %vm1737_vm7, %v3198_v48, %v3197_v9  ;;  %v3206_v52 = vrot.slane %v9083_v40, 2 }
 0x1dd   : > { %v9151_v17 = vsel %vm1752_vm12, %v3222_v54, %v3221_v32  ;;  %v3201_v49 = vsel %vm1740_vm8, %v3200_v62, %v3199_v26  ;;  %v1484_v4 = vmax.f32 %v8954_v29, 0.0  ;;  %v3695_v21 = vrot.slane %v8920_v53, 7  ;;  %v7475_v53 = vld [vmem:[%s10698_s3 + $0x1e4] ss:$16 sps:$4 sm:$0xff]   ;;  %v7482_v62 = vld [vmem:[%s10698_s3 + $0x3a8] ss:$16 sps:$4 sm:$0xff]  }
 0x1de   : > { %v3203_v5 = vsel %vm1743_vm9, %v3202_v61, %v3201_v49  ;;  %v3208_v6 = vrot.slane %v9153_v15, 1  ;;  %2571 = vmatpush1.bf16.msra.mxu0 %v7461_v33  ;;  %2612 = vmatpush1.bf16.msra.mxu1 %v7464_v60  ;;  %v3697_v2 = vrot.slane %v8927_v38, 6  ;;  %v3701_v10 = vrot.slane %v8987_v27, 4  ;;  %v7485_v49 = vld [vmem:[%s10698_s3 + $0x380] ss:$16 sps:$4 sm:$0xff]  }
 0x1df   : > { %v3205_v47 = vsel %vm1746_vm10, %v3204_v1, %v3203_v5  ;;  %v1592_v29 = vrot.slane %v1484_v4, %v8844_v37  ;;  %2572 = vmatprep.subr.bf16.mxu0 %v7469_v19  ;;  %2613 = vmatprep.subr.bf16.mxu1 %v7472_v46  ;;  %v3696_v44 = vsel %vm1734_vm6, %v3695_v21, %v8918_v59  ;;  %v3699_v22 = vrot.slane %v8929_v55, 5  ;;  %v7473_v59 = vld [vmem:[%s10698_s3 + $0x1e0] ss:$16 sps:$4 sm:$0xff]   ;;  %v7476_v55 = vld [vmem:[%s10698_s3 + $0x1e8] ss:$16 sps:$4 sm:$0xff]  }
 0x1e0   : > { %v3207_v13 = vsel %vm1749_vm11, %v3206_v52, %v3205_v47  ;;  %v1588_v38 = vrot.slane %v1484_v4, %v8812_v58  ;;  %v3698_v24 = vsel %vm1737_vm7, %v3697_v2, %v3696_v44  ;;  %v3703_v28 = vrot.slane %v9054_v43, 3  ;;  %v7488_v52 = vld [vmem:[%s10698_s3 + $0x388] ss:$16 sps:$4 sm:$0xff]   ;;  %v7496_v5 = vld [vmem:[%s10698_s3 + $0x36c] ss:$16 sps:$4 sm:$0xff]  }
 0x1e1   : > { %v9185_v27 = vsel %vm1752_vm12, %v3208_v6, %v3207_v13  ;;  %v1640_v56 = vpack.c.bf16 %v1592_v29, %v1592_v29  ;;  %v3700_v25 = vsel %vm1740_vm8, %v3699_v22, %v3698_v24  ;;  %v3705_v45 = vrot.slane %v9124_v42, 2  ;;  %v7491_v6 = vld [vmem:[%s10698_s3 + $0x360] ss:$16 sps:$4 sm:$0xff]   ;;  %v7494_v21 = vld [vmem:[%s10698_s3 + $0x368] ss:$16 sps:$4 sm:$0xff]  }
 0x1e2   : > { %v1639_v12 = vpack.c.bf16 %v1588_v38, %v1588_v38  ;;  %2573 = vmatpush1.bf16.msra.mxu0 %v7467_v7  ;;  %2614 = vmatpush1.bf16.msra.mxu1 %v7470_v39  ;;  %v3702_v0 = vsel %vm1743_vm9, %v3701_v10, %v3700_v25  ;;  %v3681_v43 = vrot.slane %v8923_v20, 7  ;;  %v3683_v54 = vrot.slane %v8925_v35, 6  ;;  %v7479_v35 = vld [vmem:[%s10698_s3 + $0x3a0] ss:$16 sps:$4 sm:$0xff]   ;;  %v7499_v7 = vld [vmem:[%s10698_s3 + $0x344] ss:$16 sps:$4 sm:$0xff]  }
 0x1e3   : > { %v3680_v18 = vunpack.c.l.b16 %v1640_v56  ;;  %2574 = vmatprep.subr.bf16.mxu0 %v7475_v53  ;;  %2615 = vmatprep.subr.bf16.mxu1 %v7478_v57  ;;  %v3704_v48 = vsel %vm1746_vm10, %v3703_v28, %v3702_v0  ;;  %v3685_v33 = vrot.slane %v8931_v30, 5  ;;  %v3687_v32 = vrot.slane %v8985_v14, 4  ;;  %v7487_v14 = vld [vmem:[%s10698_s3 + $0x384] ss:$16 sps:$4 sm:$0xff]   ;;  %v7502_v39 = vld [vmem:[%s10698_s3 + $0x34c] ss:$16 sps:$4 sm:$0xff]  }
 0x1e4   : > { %v3679_v8 = vunpack.c.l.b16 %v1639_v12  ;;  %v3706_v34 = vsel %vm1749_vm11, %v3705_v45, %v3704_v48  ;;  %v3682_v20 = vsel %vm1734_vm6, %v3681_v43, %v8916_v51  ;;  %v3689_v9 = vrot.slane %v9083_v40, 3  ;;  %v7490_v40 = vld [vmem:[%s10698_s3 + $0x38c] ss:$16 sps:$4 sm:$0xff]   ;;  %v7497_v47 = vld [vmem:[%s10698_s3 + $0x340] ss:$16 sps:$4 sm:$0xff]  }
 0x1e5   : > { %v3707_v42 = vrot.slane %v3680_v18, 1  ;;  %v3684_v60 = vsel %vm1737_vm7, %v3683_v54, %v3682_v20  ;;  %v3691_v19 = vrot.slane %v9153_v15, 2  ;;  %v7493_v15 = vld [vmem:[%s10698_s3 + $0x364] ss:$16 sps:$4 sm:$0xff]   ;;  %v7500_v29 = vld [vmem:[%s10698_s3 + $0x348] ss:$16 sps:$4 sm:$0xff]   ;;  %v2254_v18 = vpack.c.b16 %v9052_v31, %v9052_v31 }
 0x1e6   : > { %2575 = vmatpush1.bf16.msra.mxu0 %v7473_v59  ;;  %2616 = vmatpush1.bf16.msra.mxu1 %v7476_v55  ;;  %v3686_v30 = vsel %vm1740_vm8, %v3685_v33, %v3684_v60  ;;  %v3693_v26 = vrot.slane %v3679_v8, 1  ;;  %v7505_v2 = vld [vmem:[%s10698_s3 + $0x324] ss:$16 sps:$4 sm:$0xff]   ;;  %v7508_v10 = vld [vmem:[%s10698_s3 + $0x32c] ss:$16 sps:$4 sm:$0xff]   ;;  %v2740_v45 = vpack.c.b16 %v9081_v23, %v9081_v23 }
 0x1e7   : > { %v9221_v51 = vsel %vm1752_vm12, %v3707_v42, %v3706_v34  ;;  %2578 = vmatprep.subr.bf16.mxu0 %v7481_v36  ;;  %2619 = vmatprep.subr.bf16.mxu1 %v7484_v11  ;;  %v3688_v1 = vsel %vm1743_vm9, %v3687_v32, %v3686_v30  ;;  %v7503_v53 = vld [vmem:[%s10698_s3 + $0x320] ss:$16 sps:$4 sm:$0xff]   ;;  %v7506_v57 = vld [vmem:[%s10698_s3 + $0x328] ss:$16 sps:$4 sm:$0xff]   ;;  %v7511_v13 = vld [vmem:[%s10698_s3 + $0x304] ss:$16 sps:$4 sm:$0xff]  }
 0x1e8   : > { %v3690_v46 = vsel %vm1746_vm10, %v3689_v9, %v3688_v1  ;;  %v7514_v44 = vld [vmem:[%s10698_s3 + $0x30c] ss:$16 sps:$4 sm:$0xff]   ;;  %v7509_v22 = vld [vmem:[%s10698_s3 + $0x300] ss:$16 sps:$4 sm:$0xff]   ;;  %v7512_v38 = vld [vmem:[%s10698_s3 + $0x308] ss:$16 sps:$4 sm:$0xff]  }
 0x1e9   : > { %v3692_v61 = vsel %vm1749_vm11, %v3691_v19, %v3690_v46  ;;  %v7517_v56 = vld [vmem:[%s10698_s3 + $0x2e4] ss:$16 sps:$4 sm:$0xff]   ;;  %v7520_v24 = vld [vmem:[%s10698_s3 + $0x2ec] ss:$16 sps:$4 sm:$0xff]   ;;  %v7515_v28 = vld [vmem:[%s10698_s3 + $0x2e0] ss:$16 sps:$4 sm:$0xff]  }
 0x1ea   : > { %2579 = vmatpush2.bf16.msra.mxu0 %v7479_v35  ;;  %2620 = vmatpush2.bf16.msra.mxu1 %v7482_v62  ;;  %v9241_v4 = vsel %vm1752_vm12, %v3693_v26, %v3692_v61  ;;  %v7518_v25 = vld [vmem:[%s10698_s3 + $0x2e8] ss:$16 sps:$4 sm:$0xff]   ;;  %v7523_v12 = vld [vmem:[%s10698_s3 + $0x4a4] ss:$16 sps:$4 sm:$0xff]   ;;  %v7526_v59 = vld [vmem:[%s10698_s3 + $0x4ac] ss:$16 sps:$4 sm:$0xff]  }
 0x1eb   : > { %2580 = vmatprep.subr.bf16.mxu0 %v7487_v14  ;;  %2621 = vmatprep.subr.bf16.mxu1 %v7490_v40  ;;  %v7521_v55 = vld [vmem:[%s10698_s3 + $0x4a0] ss:$16 sps:$4 sm:$0xff]   ;;  %v7524_v0 = vld [vmem:[%s10698_s3 + $0x4a8] ss:$16 sps:$4 sm:$0xff]   ;;  %v7529_v43 = vld [vmem:[%s10698_s3 + $0x484] ss:$16 sps:$4 sm:$0xff]  }
 0x1ec   : > { %v7532_v36 = vld [vmem:[%s10698_s3 + $0x48c] ss:$16 sps:$4 sm:$0xff]   ;;  %v7527_v31 = vld [vmem:[%s10698_s3 + $0x480] ss:$16 sps:$4 sm:$0xff]   ;;  %v7530_v23 = vld [vmem:[%s10698_s3 + $0x488] ss:$16 sps:$4 sm:$0xff]  }
 0x1ed   : > { %v7535_v11 = vld [vmem:[%s10698_s3 + $0x464] ss:$16 sps:$4 sm:$0xff]   ;;  %v7538_v48 = vld [vmem:[%s10698_s3 + $0x46c] ss:$16 sps:$4 sm:$0xff]   ;;  %v7533_v8 = vld [vmem:[%s10698_s3 + $0x460] ss:$16 sps:$4 sm:$0xff]  }
 0x1ee   : > { %2581 = vmatpush2.bf16.msra.mxu0 %v7485_v49  ;;  %2622 = vmatpush2.bf16.msra.mxu1 %v7488_v52  ;;  %v7536_v54 = vld [vmem:[%s10698_s3 + $0x468] ss:$16 sps:$4 sm:$0xff]   ;;  %v7541_v34 = vld [vmem:[%s10698_s3 + $0x444] ss:$16 sps:$4 sm:$0xff]   ;;  %v7544_v42 = vld [vmem:[%s10698_s3 + $0x44c] ss:$16 sps:$4 sm:$0xff]  }
 0x1ef   : > { %2582 = vmatprep.subr.bf16.mxu0 %v7493_v15  ;;  %2623 = vmatprep.subr.bf16.mxu1 %v7496_v5  ;;  %v7539_v20 = vld [vmem:[%s10698_s3 + $0x440] ss:$16 sps:$4 sm:$0xff]   ;;  %v7542_v33 = vld [vmem:[%s10698_s3 + $0x448] ss:$16 sps:$4 sm:$0xff]   ;;  %v7547_v60 = vld [vmem:[%s10698_s3 + $0x424] ss:$16 sps:$4 sm:$0xff]  }
 0x1f0   : > { %v7550_v32 = vld [vmem:[%s10698_s3 + $0x42c] ss:$16 sps:$4 sm:$0xff]   ;;  %v7545_v9 = vld [vmem:[%s10698_s3 + $0x420] ss:$16 sps:$4 sm:$0xff]   ;;  %v7548_v35 = vld [vmem:[%s10698_s3 + $0x428] ss:$16 sps:$4 sm:$0xff]  }
 0x1f1   : > { %v7553_v62 = vld [vmem:[%s10698_s3 + $0x404] ss:$16 sps:$4 sm:$0xff]   ;;  %v7556_v30 = vld [vmem:[%s10698_s3 + $0x40c] ss:$16 sps:$4 sm:$0xff]   ;;  %v7551_v14 = vld [vmem:[%s10698_s3 + $0x400] ss:$16 sps:$4 sm:$0xff]  }
 0x1f2   : > { %2583 = vmatpush2.bf16.msra.mxu0 %v7491_v6  ;;  %2624 = vmatpush2.bf16.msra.mxu1 %v7494_v21  ;;  %v7554_v40 = vld [vmem:[%s10698_s3 + $0x408] ss:$16 sps:$4 sm:$0xff]   ;;  %v7559_v1 = vld [vmem:[%s10698_s3 + $0x3e4] ss:$16 sps:$4 sm:$0xff]   ;;  %v7562_v19 = vld [vmem:[%s10698_s3 + $0x3ec] ss:$16 sps:$4 sm:$0xff]  }
 0x1f3   : > { %2584 = vmatprep.subr.bf16.mxu0 %v7499_v7  ;;  %2625 = vmatprep.subr.bf16.mxu1 %v7502_v39  ;;  %v7557_v46 = vld [vmem:[%s10698_s3 + $0x3e0] ss:$16 sps:$4 sm:$0xff]   ;;  %v7560_v26 = vld [vmem:[%s10698_s3 + $0x3e8] ss:$16 sps:$4 sm:$0xff]   ;;  %v7565_v61 = vld [vmem:[%s10698_s3 + $0x3c4] ss:$16 sps:$4 sm:$0xff]  }
 0x1f4   : > { %v7568_v49 = vld [vmem:[%s10698_s3 + $0x3cc] ss:$16 sps:$4 sm:$0xff]   ;;  %v7563_v52 = vld [vmem:[%s10698_s3 + $0x3c0] ss:$16 sps:$4 sm:$0xff]   ;;  %v7566_v15 = vld [vmem:[%s10698_s3 + $0x3c8] ss:$16 sps:$4 sm:$0xff]  }
 0x1f5   : > { %v7571_v5 = vld [vmem:[%s10698_s3 + $0x584] ss:$16 sps:$4 sm:$0xff]   ;;  %v7574_v6 = vld [vmem:[%s10698_s3 + $0x58c] ss:$16 sps:$4 sm:$0xff]   ;;  %v7569_v21 = vld [vmem:[%s10698_s3 + $0x580] ss:$16 sps:$4 sm:$0xff]  }
 0x1f6   : > { %2585 = vmatpush2.bf16.msra.mxu0 %v7497_v47  ;;  %2626 = vmatpush2.bf16.msra.mxu1 %v7500_v29  ;;  %v7572_v7 = vld [vmem:[%s10698_s3 + $0x588] ss:$16 sps:$4 sm:$0xff]   ;;  %v7577_v39 = vld [vmem:[%s10698_s3 + $0x564] ss:$16 sps:$4 sm:$0xff]   ;;  %v7580_v47 = vld [vmem:[%s10698_s3 + $0x56c] ss:$16 sps:$4 sm:$0xff]  }
 0x1f7   : > { %2586 = vmatprep.subr.bf16.mxu0 %v7505_v2  ;;  %2627 = vmatprep.subr.bf16.mxu1 %v7508_v10  ;;  %v7575_v29 = vld [vmem:[%s10698_s3 + $0x560] ss:$16 sps:$4 sm:$0xff]   ;;  %v7578_v2 = vld [vmem:[%s10698_s3 + $0x568] ss:$16 sps:$4 sm:$0xff]   ;;  %v7583_v10 = vld [vmem:[%s10698_s3 + $0x544] ss:$16 sps:$4 sm:$0xff]  }
 0x1fa   : > { %2587 = vmatpush2.bf16.msra.mxu0 %v7503_v53  ;;  %2628 = vmatpush2.bf16.msra.mxu1 %v7506_v57  ;;  %v7586_v53 = vld [vmem:[%s10698_s3 + $0x54c] ss:$16 sps:$4 sm:$0xff]   ;;  %v7581_v57 = vld [vmem:[%s10698_s3 + $0x540] ss:$16 sps:$4 sm:$0xff]  }
 0x1fb   : > { %2588 = vmatprep.subr.bf16.mxu0 %v7511_v13  ;;  %2629 = vmatprep.subr.bf16.mxu1 %v7514_v44  ;;  %v7584_v13 = vld [vmem:[%s10698_s3 + $0x548] ss:$16 sps:$4 sm:$0xff]   ;;  %v7589_v44 = vld [vmem:[%s10698_s3 + $0x524] ss:$16 sps:$4 sm:$0xff]  }
 0x1fe   : > { %2589 = vmatpush2.bf16.msra.mxu0 %v7509_v22  ;;  %2630 = vmatpush2.bf16.msra.mxu1 %v7512_v38  ;;  %v7592_v22 = vld [vmem:[%s10698_s3 + $0x52c] ss:$16 sps:$4 sm:$0xff]   ;;  %v7587_v38 = vld [vmem:[%s10698_s3 + $0x520] ss:$16 sps:$4 sm:$0xff]  }
 0x1ff   : > { %2590 = vmatprep.subr.bf16.mxu0 %v7517_v56  ;;  %2631 = vmatprep.subr.bf16.mxu1 %v7520_v24  ;;  %v7590_v56 = vld [vmem:[%s10698_s3 + $0x528] ss:$16 sps:$4 sm:$0xff]   ;;  %v7595_v24 = vld [vmem:[%s10698_s3 + $0x504] ss:$16 sps:$4 sm:$0xff]  }
 0x202   : > { %2591 = vmatpush2.bf16.msra.mxu0 %v7515_v28  ;;  %2632 = vmatpush2.bf16.msra.mxu1 %v7518_v25  ;;  %v7598_v28 = vld [vmem:[%s10698_s3 + $0x50c] ss:$16 sps:$4 sm:$0xff]   ;;  %v7593_v25 = vld [vmem:[%s10698_s3 + $0x500] ss:$16 sps:$4 sm:$0xff]  }
 0x203   : > { %3045 = vmatprep.subr.bf16.mxu0 %v7523_v12  ;;  %3086 = vmatprep.subr.bf16.mxu1 %v7526_v59  ;;  %v7596_v12 = vld [vmem:[%s10698_s3 + $0x508] ss:$16 sps:$4 sm:$0xff]   ;;  %v7601_v59 = vld [vmem:[%s10698_s3 + $0x4e4] ss:$16 sps:$4 sm:$0xff]  }
 0x205   : > { %2593 = vmatmul.mubr.bf16.vlgmr.msra.gmra.mxu0 %v2254_v18  ;;  %2634 = vmatmul.mubr.bf16.vlgmr.msra.gmra.mxu1 %v2254_v18  ;;  %v7599_v18 = vld [vmem:[%s10698_s3 + $0x4e0] ss:$16 sps:$4 sm:$0xff]  }
 0x206   : > { %3046 = vmatpush1.bf16.msra.mxu0 %v7521_v55  ;;  %6695 = vmatprep.mubr.msk.bf16.mxu0 %vm2071_vm13, %v2740_v45  ;;  %v7604_v55 = vld [vmem:[%s10698_s3 + $0x4ec] ss:$16 sps:$4 sm:$0xff]  }
 0x207   : > { %3087 = vmatpush1.bf16.msra.mxu1 %v7524_v0  ;;  %6696 = vmatprep.mubr.msk.bf16.mxu1 %vm2071_vm13, %v2740_v45  ;;  %v7602_v0 = vld [vmem:[%s10698_s3 + $0x4e8] ss:$16 sps:$4 sm:$0xff]   ;;  %v7607_v45 = vld [vmem:[%s10698_s3 + $0x4c4] ss:$16 sps:$4 sm:$0xff]  }
 0x208   : > { %3047 = vmatprep.subr.bf16.mxu0 %v7529_v43  ;;  %3088 = vmatprep.subr.bf16.mxu1 %v7532_v36  ;;  %v7610_v43 = vld [vmem:[%s10698_s3 + $0x4cc] ss:$16 sps:$4 sm:$0xff]   ;;  %v7605_v36 = vld [vmem:[%s10698_s3 + $0x4c0] ss:$16 sps:$4 sm:$0xff]  }
 0x20a   : > { %3048 = vmatpush1.bf16.msra.mxu0 %v7527_v31  ;;  %v7608_v31 = vld [vmem:[%s10698_s3 + $0x4c8] ss:$16 sps:$4 sm:$0xff]  }
 0x20b   : > { %3089 = vmatpush1.bf16.msra.mxu1 %v7530_v23  ;;  %3049 = vmatprep.subr.bf16.mxu0 %v7535_v11  ;;  %v7613_v23 = vld [vmem:[%s10698_s3 + $0x684] ss:$16 sps:$4 sm:$0xff]   ;;  %v7616_v11 = vld [vmem:[%s10698_s3 + $0x68c] ss:$16 sps:$4 sm:$0xff]  }
 0x20c   : > { %3090 = vmatprep.subr.bf16.mxu1 %v7538_v48  ;;  %v7611_v48 = vld [vmem:[%s10698_s3 + $0x680] ss:$16 sps:$4 sm:$0xff]  }
 0x20e   : > { %3050 = vmatpush1.bf16.msra.mxu0 %v7533_v8  ;;  %v2739_v8 = vpack.c.b16 %v9122_v50, %v9122_v50  ;;  %v7617_v50 = vld [vmem:[%s10698_s3 + $0x660] ss:$16 sps:$4 sm:$0xff]  }
 0x20f   : > { %3091 = vmatpush1.bf16.msra.mxu1 %v7536_v54  ;;  %3051 = vmatprep.subr.bf16.mxu0 %v7541_v34  ;;  %v7614_v54 = vld [vmem:[%s10698_s3 + $0x688] ss:$16 sps:$4 sm:$0xff]   ;;  %v7619_v34 = vld [vmem:[%s10698_s3 + $0x664] ss:$16 sps:$4 sm:$0xff]  }
 0x210   : > { %3092 = vmatprep.subr.bf16.mxu1 %v7544_v42  ;;  %v3225_v42 = vpack.c.b16 %v9151_v17, %v9151_v17  ;;  %v7625_v17 = vld [vmem:[%s10698_s3 + $0x644] ss:$16 sps:$4 sm:$0xff]  }
 0x212   : > { %3052 = vmatpush1.bf16.msra.mxu0 %v7539_v20  ;;  %v7622_v20 = vld [vmem:[%s10698_s3 + $0x66c] ss:$16 sps:$4 sm:$0xff]  }
 0x213   : > { %3093 = vmatpush1.bf16.msra.mxu1 %v7542_v33  ;;  %3053 = vmatprep.subr.bf16.mxu0 %v7547_v60  ;;  %v7620_v33 = vld [vmem:[%s10698_s3 + $0x668] ss:$16 sps:$4 sm:$0xff]   ;;  %v7628_v60 = vld [vmem:[%s10698_s3 + $0x64c] ss:$16 sps:$4 sm:$0xff]  }
 0x214   : > { %3094 = vmatprep.subr.bf16.mxu1 %v7550_v32  ;;  %v7623_v32 = vld [vmem:[%s10698_s3 + $0x640] ss:$16 sps:$4 sm:$0xff]  }
 0x216   : > { %3054 = vmatpush1.bf16.msra.mxu0 %v7545_v9  ;;  %v7626_v9 = vld [vmem:[%s10698_s3 + $0x648] ss:$16 sps:$4 sm:$0xff]  }
 0x217   : > { %3095 = vmatpush1.bf16.msra.mxu1 %v7548_v35  ;;  %3055 = vmatprep.subr.bf16.mxu0 %v7553_v62  ;;  %v7631_v35 = vld [vmem:[%s10698_s3 + $0x624] ss:$16 sps:$4 sm:$0xff]   ;;  %v7634_v62 = vld [vmem:[%s10698_s3 + $0x62c] ss:$16 sps:$4 sm:$0xff]  }
 0x218   : > { %3096 = vmatprep.subr.bf16.mxu1 %v7556_v30  ;;  %v7629_v30 = vld [vmem:[%s10698_s3 + $0x620] ss:$16 sps:$4 sm:$0xff]  }
 0x21a   : > { %3056 = vmatpush1.bf16.msra.mxu0 %v7551_v14  ;;  %v7632_v14 = vld [vmem:[%s10698_s3 + $0x628] ss:$16 sps:$4 sm:$0xff]  }
 0x21b   : > { %3097 = vmatpush1.bf16.msra.mxu1 %v7554_v40  ;;  %3057 = vmatprep.subr.bf16.mxu0 %v7559_v1  ;;  %v7637_v40 = vld [vmem:[%s10698_s3 + $0x604] ss:$16 sps:$4 sm:$0xff]   ;;  %v7640_v1 = vld [vmem:[%s10698_s3 + $0x60c] ss:$16 sps:$4 sm:$0xff]  }
 0x21c   : > { %3098 = vmatprep.subr.bf16.mxu1 %v7562_v19  ;;  %v7635_v19 = vld [vmem:[%s10698_s3 + $0x600] ss:$16 sps:$4 sm:$0xff]  }
 0x21e   : > { %3058 = vmatpush1.bf16.msra.mxu0 %v7557_v46  ;;  %v7638_v46 = vld [vmem:[%s10698_s3 + $0x608] ss:$16 sps:$4 sm:$0xff]  }
 0x21f   : > { %3099 = vmatpush1.bf16.msra.mxu1 %v7560_v26  ;;  %3059 = vmatprep.subr.bf16.mxu0 %v7565_v61  ;;  %v7643_v26 = vld [vmem:[%s10698_s3 + $0x5e4] ss:$16 sps:$4 sm:$0xff]   ;;  %v7646_v61 = vld [vmem:[%s10698_s3 + $0x5ec] ss:$16 sps:$4 sm:$0xff]  }
 0x220   : > { %3100 = vmatprep.subr.bf16.mxu1 %v7568_v49  ;;  %v7641_v49 = vld [vmem:[%s10698_s3 + $0x5e0] ss:$16 sps:$4 sm:$0xff]  }
 0x222   : > { %3060 = vmatpush1.bf16.msra.mxu0 %v7563_v52  ;;  %v7644_v52 = vld [vmem:[%s10698_s3 + $0x5e8] ss:$16 sps:$4 sm:$0xff]  }
 0x223   : > { %3101 = vmatpush1.bf16.msra.mxu1 %v7566_v15  ;;  %3063 = vmatprep.subr.bf16.mxu0 %v7571_v5  ;;  %v7649_v15 = vld [vmem:[%s10698_s3 + $0x5c4] ss:$16 sps:$4 sm:$0xff]   ;;  %v7652_v5 = vld [vmem:[%s10698_s3 + $0x5cc] ss:$16 sps:$4 sm:$0xff]  }
 0x224   : > { %3104 = vmatprep.subr.bf16.mxu1 %v7574_v6  ;;  %v7647_v6 = vld [vmem:[%s10698_s3 + $0x5c0] ss:$16 sps:$4 sm:$0xff]  }
 0x226   : > { %3064 = vmatpush2.bf16.msra.mxu0 %v7569_v21  ;;  %v7650_v21 = vld [vmem:[%s10698_s3 + $0x5c8] ss:$16 sps:$4 sm:$0xff]  }
 0x227   : > { %3105 = vmatpush2.bf16.msra.mxu1 %v7572_v7  ;;  %3065 = vmatprep.subr.bf16.mxu0 %v7577_v39  ;;  %v7655_v7 = vld [vmem:[%s10698_s3 + $0x5a4] ss:$16 sps:$4 sm:$0xff]   ;;  %v7658_v39 = vld [vmem:[%s10698_s3 + $0x5ac] ss:$16 sps:$4 sm:$0xff]  }
 0x228   : > { %3106 = vmatprep.subr.bf16.mxu1 %v7580_v47  ;;  %v7653_v47 = vld [vmem:[%s10698_s3 + $0x5a0] ss:$16 sps:$4 sm:$0xff]  }
 0x22a   : > { %3066 = vmatpush2.bf16.msra.mxu0 %v7575_v29  ;;  %v7656_v29 = vld [vmem:[%s10698_s3 + $0x5a8] ss:$16 sps:$4 sm:$0xff]  }
 0x22b   : > { %3107 = vmatpush2.bf16.msra.mxu1 %v7578_v2  ;;  %3067 = vmatprep.subr.bf16.mxu0 %v7583_v10  ;;  %v7661_v2 = vld [vmem:[%s10698_s3 + $0x764] ss:$16 sps:$4 sm:$0xff]   ;;  %v7664_v10 = vld [vmem:[%s10698_s3 + $0x76c] ss:$16 sps:$4 sm:$0xff]  }
 0x22c   : > { %3108 = vmatprep.subr.bf16.mxu1 %v7586_v53  ;;  %v7659_v53 = vld [vmem:[%s10698_s3 + $0x760] ss:$16 sps:$4 sm:$0xff]  }
 0x22e   : > { %3068 = vmatpush2.bf16.msra.mxu0 %v7581_v57  ;;  %v7662_v57 = vld [vmem:[%s10698_s3 + $0x768] ss:$16 sps:$4 sm:$0xff]  }
 0x22f   : > { %3109 = vmatpush2.bf16.msra.mxu1 %v7584_v13  ;;  %3069 = vmatprep.subr.bf16.mxu0 %v7589_v44  ;;  %v7667_v13 = vld [vmem:[%s10698_s3 + $0x744] ss:$16 sps:$4 sm:$0xff]   ;;  %v7670_v44 = vld [vmem:[%s10698_s3 + $0x74c] ss:$16 sps:$4 sm:$0xff]  }
 0x230   : > { %3110 = vmatprep.subr.bf16.mxu1 %v7592_v22  ;;  %v7665_v22 = vld [vmem:[%s10698_s3 + $0x740] ss:$16 sps:$4 sm:$0xff]  }
 0x232   : > { %3070 = vmatpush2.bf16.msra.mxu0 %v7587_v38  ;;  %v7668_v38 = vld [vmem:[%s10698_s3 + $0x748] ss:$16 sps:$4 sm:$0xff]  }
 0x233   : > { %3111 = vmatpush2.bf16.msra.mxu1 %v7590_v56  ;;  %3071 = vmatprep.subr.bf16.mxu0 %v7595_v24  ;;  %v7673_v56 = vld [vmem:[%s10698_s3 + $0x724] ss:$16 sps:$4 sm:$0xff]   ;;  %v7676_v24 = vld [vmem:[%s10698_s3 + $0x72c] ss:$16 sps:$4 sm:$0xff]  }
 0x234   : > { %3112 = vmatprep.subr.bf16.mxu1 %v7598_v28  ;;  %v7671_v28 = vld [vmem:[%s10698_s3 + $0x720] ss:$16 sps:$4 sm:$0xff]  }
 0x236   : > { %3072 = vmatpush2.bf16.msra.mxu0 %v7593_v25  ;;  %v7674_v25 = vld [vmem:[%s10698_s3 + $0x728] ss:$16 sps:$4 sm:$0xff]  }
 0x237   : > { %3113 = vmatpush2.bf16.msra.mxu1 %v7596_v12  ;;  %3073 = vmatprep.subr.bf16.mxu0 %v7601_v59  ;;  %v7679_v12 = vld [vmem:[%s10698_s3 + $0x704] ss:$16 sps:$4 sm:$0xff]   ;;  %v7682_v59 = vld [vmem:[%s10698_s3 + $0x70c] ss:$16 sps:$4 sm:$0xff]  }
 0x238   : > { %3114 = vmatprep.subr.bf16.mxu1 %v7604_v55  ;;  %v7677_v55 = vld [vmem:[%s10698_s3 + $0x700] ss:$16 sps:$4 sm:$0xff]  }
 0x23a   : > { %3074 = vmatpush2.bf16.msra.mxu0 %v7599_v18  ;;  %v7680_v18 = vld [vmem:[%s10698_s3 + $0x708] ss:$16 sps:$4 sm:$0xff]  }
 0x23b   : > { %3115 = vmatpush2.bf16.msra.mxu1 %v7602_v0  ;;  %3075 = vmatprep.subr.bf16.mxu0 %v7607_v45  ;;  %v7685_v0 = vld [vmem:[%s10698_s3 + $0x6e4] ss:$16 sps:$4 sm:$0xff]   ;;  %v7688_v45 = vld [vmem:[%s10698_s3 + $0x6ec] ss:$16 sps:$4 sm:$0xff]  }
 0x23c   : > { %3116 = vmatprep.subr.bf16.mxu1 %v7610_v43  ;;  %v7683_v43 = vld [vmem:[%s10698_s3 + $0x6e0] ss:$16 sps:$4 sm:$0xff]  }
 0x23e   : > { %3076 = vmatpush2.bf16.msra.mxu0 %v7605_v36  ;;  %v7686_v36 = vld [vmem:[%s10698_s3 + $0x6e8] ss:$16 sps:$4 sm:$0xff]  }
 0x23f   : > { %3117 = vmatpush2.bf16.msra.mxu1 %v7608_v31  ;;  %3530 = vmatprep.subr.bf16.mxu0 %v7613_v23  ;;  %v7691_v31 = vld [vmem:[%s10698_s3 + $0x6c4] ss:$16 sps:$4 sm:$0xff]   ;;  %v7694_v23 = vld [vmem:[%s10698_s3 + $0x6cc] ss:$16 sps:$4 sm:$0xff]  }
 0x240   : > { %3571 = vmatprep.subr.bf16.mxu1 %v7616_v11  ;;  %v7689_v11 = vld [vmem:[%s10698_s3 + $0x6c0] ss:$16 sps:$4 sm:$0xff]  }
 0x241   : > { %3078 = vmatmul.mubr.bf16.vlgmr.msra.gmra.mxu0 %v2739_v8 }
 0x242   : > { %3119 = vmatmul.mubr.bf16.vlgmr.msra.gmra.mxu1 %v2739_v8  ;;  %3531 = vmatpush1.bf16.msra.mxu0 %v7611_v48  ;;  %v7692_v48 = vld [vmem:[%s10698_s3 + $0x6c8] ss:$16 sps:$4 sm:$0xff]   ;;  %v7697_v8 = vld [vmem:[%s10698_s3 + $0x6a4] ss:$16 sps:$4 sm:$0xff]  }
 0x243   : > { %6817 = vmatprep.mubr.msk.bf16.mxu0 %vm2071_vm13, %v3225_v42  ;;  %3572 = vmatpush1.bf16.msra.mxu1 %v7614_v54  ;;  %v7700_v54 = vld [vmem:[%s10698_s3 + $0x6ac] ss:$16 sps:$4 sm:$0xff]  }
 0x244   : > { %6818 = vmatprep.mubr.msk.bf16.mxu1 %vm2071_vm13, %v3225_v42  ;;  %3532 = vmatprep.subr.bf16.mxu0 %v7619_v34  ;;  %v7695_v34 = vld [vmem:[%s10698_s3 + $0x6a0] ss:$16 sps:$4 sm:$0xff]   ;;  %v7698_v42 = vld [vmem:[%s10698_s3 + $0x6a8] ss:$16 sps:$4 sm:$0xff]  }
 0x245   : > { %3573 = vmatprep.subr.bf16.mxu1 %v7622_v20  ;;  %v7703_v20 = vld [vmem:[%s10698_s3 + $0x864] ss:$16 sps:$4 sm:$0xff]  }
 0x246   : > { %3533 = vmatpush1.bf16.msra.mxu0 %v7617_v50  ;;  %v7706_v50 = vld [vmem:[%s10698_s3 + $0x86c] ss:$16 sps:$4 sm:$0xff]  }
 0x247   : > { %3574 = vmatpush1.bf16.msra.mxu1 %v7620_v33  ;;  %3534 = vmatprep.subr.bf16.mxu0 %v7625_v17  ;;  %v7701_v33 = vld [vmem:[%s10698_s3 + $0x860] ss:$16 sps:$4 sm:$0xff]   ;;  %v3224_v17 = vpack.c.b16 %v9185_v27, %v9185_v27 }
 0x248   : > { %3575 = vmatprep.subr.bf16.mxu1 %v7628_v60  ;;  %v7704_v60 = vld [vmem:[%s10698_s3 + $0x868] ss:$16 sps:$4 sm:$0xff]   ;;  %v7707_v27 = vld [vmem:[%s10698_s3 + $0x840] ss:$16 sps:$4 sm:$0xff]  }
 0x24a   : > { %3535 = vmatpush1.bf16.msra.mxu0 %v7623_v32  ;;  %v7709_v32 = vld [vmem:[%s10698_s3 + $0x844] ss:$16 sps:$4 sm:$0xff]  }
 0x24b   : > { %3576 = vmatpush1.bf16.msra.mxu1 %v7626_v9  ;;  %3536 = vmatprep.subr.bf16.mxu0 %v7631_v35  ;;  %v3710_v9 = vpack.c.b16 %v9221_v51, %v9221_v51  ;;  %v7712_v35 = vld [vmem:[%s10698_s3 + $0x84c] ss:$16 sps:$4 sm:$0xff]   ;;  %v7715_v51 = vld [vmem:[%s10698_s3 + $0x824] ss:$16 sps:$4 sm:$0xff]  }
 0x24c   : > { %3577 = vmatprep.subr.bf16.mxu1 %v7634_v62  ;;  %v7710_v62 = vld [vmem:[%s10698_s3 + $0x848] ss:$16 sps:$4 sm:$0xff]  }
 0x24e   : > { %3537 = vmatpush1.bf16.msra.mxu0 %v7629_v30  ;;  %v7718_v30 = vld [vmem:[%s10698_s3 + $0x82c] ss:$16 sps:$4 sm:$0xff]  }
 0x24f   : > { %3578 = vmatpush1.bf16.msra.mxu1 %v7632_v14  ;;  %3538 = vmatprep.subr.bf16.mxu0 %v7637_v40  ;;  %v7713_v14 = vld [vmem:[%s10698_s3 + $0x820] ss:$16 sps:$4 sm:$0xff]   ;;  %v7716_v40 = vld [vmem:[%s10698_s3 + $0x828] ss:$16 sps:$4 sm:$0xff]  }
 0x250   : > { %3579 = vmatprep.subr.bf16.mxu1 %v7640_v1  ;;  %v7721_v1 = vld [vmem:[%s10698_s3 + $0x804] ss:$16 sps:$4 sm:$0xff]  }
 0x252   : > { %3539 = vmatpush1.bf16.msra.mxu0 %v7635_v19  ;;  %v7724_v19 = vld [vmem:[%s10698_s3 + $0x80c] ss:$16 sps:$4 sm:$0xff]  }
 0x253   : > { %3580 = vmatpush1.bf16.msra.mxu1 %v7638_v46  ;;  %3540 = vmatprep.subr.bf16.mxu0 %v7643_v26  ;;  %v7719_v46 = vld [vmem:[%s10698_s3 + $0x800] ss:$16 sps:$4 sm:$0xff]   ;;  %v7722_v26 = vld [vmem:[%s10698_s3 + $0x808] ss:$16 sps:$4 sm:$0xff]  }
 0x254   : > { %3581 = vmatprep.subr.bf16.mxu1 %v7646_v61  ;;  %v7727_v61 = vld [vmem:[%s10698_s3 + $0x7e4] ss:$16 sps:$4 sm:$0xff]  }
 0x256   : > { %3541 = vmatpush1.bf16.msra.mxu0 %v7641_v49 }
 0x257   : > { %3582 = vmatpush1.bf16.msra.mxu1 %v7644_v52  ;;  %3542 = vmatprep.subr.bf16.mxu0 %v7649_v15  ;;  %v7730_v15 = vld [vmem:[%s10698_s3 + $0x7ec] ss:$16 sps:$4 sm:$0xff]  }
 0x258   : > { %3583 = vmatprep.subr.bf16.mxu1 %v7652_v5 }
 0x25a   : > { %3543 = vmatpush1.bf16.msra.mxu0 %v7647_v6 }
 0x25b   : > { %3584 = vmatpush1.bf16.msra.mxu1 %v7650_v21  ;;  %3544 = vmatprep.subr.bf16.mxu0 %v7655_v7  ;;  %v7725_v21 = vld [vmem:[%s10698_s3 + $0x7e0] ss:$16 sps:$4 sm:$0xff]   ;;  %v7728_v7 = vld [vmem:[%s10698_s3 + $0x7e8] ss:$16 sps:$4 sm:$0xff]  }
 0x25c   : > { %3585 = vmatprep.subr.bf16.mxu1 %v7658_v39  ;;  %v7733_v39 = vld [vmem:[%s10698_s3 + $0x7c4] ss:$16 sps:$4 sm:$0xff]  }
 0x25e   : > { %3545 = vmatpush1.bf16.msra.mxu0 %v7653_v47 }
 0x25f   : > { %3586 = vmatpush1.bf16.msra.mxu1 %v7656_v29  ;;  %3548 = vmatprep.subr.bf16.mxu0 %v7661_v2  ;;  %v7736_v2 = vld [vmem:[%s10698_s3 + $0x7cc] ss:$16 sps:$4 sm:$0xff]  }
 0x260   : > { %3589 = vmatprep.subr.bf16.mxu1 %v7664_v10 }
 0x262   : > { %3549 = vmatpush2.bf16.msra.mxu0 %v7659_v53 }
 0x263   : > { %3590 = vmatpush2.bf16.msra.mxu1 %v7662_v57  ;;  %3550 = vmatprep.subr.bf16.mxu0 %v7667_v13  ;;  %v7731_v57 = vld [vmem:[%s10698_s3 + $0x7c0] ss:$16 sps:$4 sm:$0xff]   ;;  %v7734_v13 = vld [vmem:[%s10698_s3 + $0x7c8] ss:$16 sps:$4 sm:$0xff]  }
 0x264   : > { %3591 = vmatprep.subr.bf16.mxu1 %v7670_v44  ;;  %v7739_v44 = vld [vmem:[%s10698_s3 + $0x7a4] ss:$16 sps:$4 sm:$0xff]  }
 0x266   : > { %3551 = vmatpush2.bf16.msra.mxu0 %v7665_v22  ;;  %v7742_v22 = vld [vmem:[%s10698_s3 + $0x7ac] ss:$16 sps:$4 sm:$0xff]  }
 0x267   : > { %3592 = vmatpush2.bf16.msra.mxu1 %v7668_v38  ;;  %3552 = vmatprep.subr.bf16.mxu0 %v7673_v56  ;;  %v7737_v38 = vld [vmem:[%s10698_s3 + $0x7a0] ss:$16 sps:$4 sm:$0xff]   ;;  %v7740_v56 = vld [vmem:[%s10698_s3 + $0x7a8] ss:$16 sps:$4 sm:$0xff]  }
 0x268   : > { %3593 = vmatprep.subr.bf16.mxu1 %v7676_v24  ;;  %v7745_v24 = vld [vmem:[%s10698_s3 + $0x784] ss:$16 sps:$4 sm:$0xff]  }
 0x26a   : > { %3553 = vmatpush2.bf16.msra.mxu0 %v7671_v28  ;;  %v7748_v28 = vld [vmem:[%s10698_s3 + $0x78c] ss:$16 sps:$4 sm:$0xff]  }
 0x26b   : > { %3594 = vmatpush2.bf16.msra.mxu1 %v7674_v25  ;;  %3554 = vmatprep.subr.bf16.mxu0 %v7679_v12  ;;  %v7743_v25 = vld [vmem:[%s10698_s3 + $0x780] ss:$16 sps:$4 sm:$0xff]   ;;  %v7746_v12 = vld [vmem:[%s10698_s3 + $0x788] ss:$16 sps:$4 sm:$0xff]  }
 0x26c   : > { %3595 = vmatprep.subr.bf16.mxu1 %v7682_v59  ;;  %v7751_v59 = vld [vmem:[%s10698_s3 + $0x944] ss:$16 sps:$4 sm:$0xff]  }
 0x26e   : > { %3555 = vmatpush2.bf16.msra.mxu0 %v7677_v55  ;;  %v7754_v55 = vld [vmem:[%s10698_s3 + $0x94c] ss:$16 sps:$4 sm:$0xff]  }
 0x26f   : > { %3596 = vmatpush2.bf16.msra.mxu1 %v7680_v18  ;;  %3556 = vmatprep.subr.bf16.mxu0 %v7685_v0  ;;  %v7749_v18 = vld [vmem:[%s10698_s3 + $0x940] ss:$16 sps:$4 sm:$0xff]   ;;  %v7752_v0 = vld [vmem:[%s10698_s3 + $0x948] ss:$16 sps:$4 sm:$0xff]  }
 0x270   : > { %3597 = vmatprep.subr.bf16.mxu1 %v7688_v45  ;;  %v7757_v45 = vld [vmem:[%s10698_s3 + $0x924] ss:$16 sps:$4 sm:$0xff]  }
 0x272   : > { %3557 = vmatpush2.bf16.msra.mxu0 %v7683_v43  ;;  %v7760_v43 = vld [vmem:[%s10698_s3 + $0x92c] ss:$16 sps:$4 sm:$0xff]  }
 0x273   : > { %3598 = vmatpush2.bf16.msra.mxu1 %v7686_v36  ;;  %3558 = vmatprep.subr.bf16.mxu0 %v7691_v31  ;;  %v7755_v36 = vld [vmem:[%s10698_s3 + $0x920] ss:$16 sps:$4 sm:$0xff]   ;;  %v7758_v31 = vld [vmem:[%s10698_s3 + $0x928] ss:$16 sps:$4 sm:$0xff]  }
 0x274   : > { %3599 = vmatprep.subr.bf16.mxu1 %v7694_v23  ;;  %v7763_v23 = vld [vmem:[%s10698_s3 + $0x904] ss:$16 sps:$4 sm:$0xff]  }
 0x276   : > { %3559 = vmatpush2.bf16.msra.mxu0 %v7689_v11  ;;  %v7766_v11 = vld [vmem:[%s10698_s3 + $0x90c] ss:$16 sps:$4 sm:$0xff]  }
 0x277   : > { %3600 = vmatpush2.bf16.msra.mxu1 %v7692_v48  ;;  %3560 = vmatprep.subr.bf16.mxu0 %v7697_v8  ;;  %v7761_v48 = vld [vmem:[%s10698_s3 + $0x900] ss:$16 sps:$4 sm:$0xff]   ;;  %v7764_v8 = vld [vmem:[%s10698_s3 + $0x908] ss:$16 sps:$4 sm:$0xff]  }
 0x278   : > { %3601 = vmatprep.subr.bf16.mxu1 %v7700_v54  ;;  %v7769_v54 = vld [vmem:[%s10698_s3 + $0x8e4] ss:$16 sps:$4 sm:$0xff]  }
 0x27a   : > { %3561 = vmatpush2.bf16.msra.mxu0 %v7695_v34  ;;  %v7772_v34 = vld [vmem:[%s10698_s3 + $0x8ec] ss:$16 sps:$4 sm:$0xff]  }
 0x27b   : > { %3602 = vmatpush2.bf16.msra.mxu1 %v7698_v42  ;;  %4015 = vmatprep.subr.bf16.mxu0 %v7703_v20  ;;  %v7767_v42 = vld [vmem:[%s10698_s3 + $0x8e0] ss:$16 sps:$4 sm:$0xff]   ;;  %v7770_v20 = vld [vmem:[%s10698_s3 + $0x8e8] ss:$16 sps:$4 sm:$0xff]  }
 0x27c   : > { %4056 = vmatprep.subr.bf16.mxu1 %v7706_v50  ;;  %v7775_v50 = vld [vmem:[%s10698_s3 + $0x8c4] ss:$16 sps:$4 sm:$0xff]  }
 0x27d   : > { %3563 = vmatmul.mubr.bf16.vlgmr.msra.gmra.mxu0 %v3224_v17 }
 0x27e   : > { %3604 = vmatmul.mubr.bf16.vlgmr.msra.gmra.mxu1 %v3224_v17  ;;  %4016 = vmatpush1.bf16.msra.mxu0 %v7701_v33  ;;  %v7778_v33 = vld [vmem:[%s10698_s3 + $0x8cc] ss:$16 sps:$4 sm:$0xff]   ;;  %v7773_v17 = vld [vmem:[%s10698_s3 + $0x8c0] ss:$16 sps:$4 sm:$0xff]  }
 0x27f   : > { %6939 = vmatprep.mubr.msk.bf16.mxu0 %vm2071_vm13, %v3710_v9  ;;  %4057 = vmatpush1.bf16.msra.mxu1 %v7704_v60  ;;  %v7776_v60 = vld [vmem:[%s10698_s3 + $0x8c8] ss:$16 sps:$4 sm:$0xff]  }
 0x280   : > { %6940 = vmatprep.mubr.msk.bf16.mxu1 %vm2071_vm13, %v3710_v9  ;;  %4017 = vmatprep.subr.bf16.mxu0 %v7709_v32  ;;  %v7781_v32 = vld [vmem:[%s10698_s3 + $0x8a4] ss:$16 sps:$4 sm:$0xff]   ;;  %v7784_v9 = vld [vmem:[%s10698_s3 + $0x8ac] ss:$16 sps:$4 sm:$0xff]  }
 0x281   : > { %4058 = vmatprep.subr.bf16.mxu1 %v7712_v35  ;;  %v7779_v35 = vld [vmem:[%s10698_s3 + $0x8a0] ss:$16 sps:$4 sm:$0xff]  }
 0x282   : > { %4018 = vmatpush1.bf16.msra.mxu0 %v7707_v27  ;;  %v7782_v27 = vld [vmem:[%s10698_s3 + $0x8a8] ss:$16 sps:$4 sm:$0xff]  }
 0x283   : > { %4059 = vmatpush1.bf16.msra.mxu1 %v7710_v62  ;;  %4019 = vmatprep.subr.bf16.mxu0 %v7715_v51  ;;  %v7787_v62 = vld [vmem:[%s10698_s3 + $0x884] ss:$16 sps:$4 sm:$0xff]   ;;  %v7790_v51 = vld [vmem:[%s10698_s3 + $0x88c] ss:$16 sps:$4 sm:$0xff]  }
 0x284   : > { %4060 = vmatprep.subr.bf16.mxu1 %v7718_v30  ;;  %v7785_v30 = vld [vmem:[%s10698_s3 + $0x880] ss:$16 sps:$4 sm:$0xff]  }
 0x286   : > { %4020 = vmatpush1.bf16.msra.mxu0 %v7713_v14  ;;  %v7788_v14 = vld [vmem:[%s10698_s3 + $0x888] ss:$16 sps:$4 sm:$0xff]  }
 0x287   : > { %4061 = vmatpush1.bf16.msra.mxu1 %v7716_v40  ;;  %4021 = vmatprep.subr.bf16.mxu0 %v7721_v1  ;;  %v3709_v40 = vpack.c.b16 %v9241_v4, %v9241_v4 }
 0x288   : > { %4062 = vmatprep.subr.bf16.mxu1 %v7724_v19 }
 0x289   : > { %v9732_v49 = vpop.f32.mrf.mxu0  ;;  %v9734_v52 = vpop.f32.mrf.mxu1 }
 0x28a   : > { %4022 = vmatpush1.bf16.msra.mxu0 %v7719_v46 }
 0x28b   : > { %v9739_v5 = vpop.f32.mrf.mxu0  ;;  %v9741_v6 = vpop.f32.mrf.mxu1  ;;  %4063 = vmatpush1.bf16.msra.mxu1 %v7722_v26  ;;  %4023 = vmatprep.subr.bf16.mxu0 %v7727_v61 }
 0x28c   : > { %4064 = vmatprep.subr.bf16.mxu1 %v7730_v15 }
 0x28d   : > { %v2113_v47 = vpop.f32.mrf.mxu0  ;;  %v2154_v29 = vpop.f32.mrf.mxu1 }
 0x28e   : > { %4024 = vmatpush1.bf16.msra.mxu0 %v7725_v21 }
 0x28f   : > { %v2114_v10 = vpop.f32.mrf.mxu0  ;;  %v2155_v53 = vpop.f32.mrf.mxu1  ;;  %4065 = vmatpush1.bf16.msra.mxu1 %v7728_v7  ;;  %4025 = vmatprep.subr.bf16.mxu0 %v7733_v39 }
 0x290   : > { %4066 = vmatprep.subr.bf16.mxu1 %v7736_v2 }
 0x292   : > { %4026 = vmatpush1.bf16.msra.mxu0 %v7731_v57 }
 0x293   : > { %4067 = vmatpush1.bf16.msra.mxu1 %v7734_v13  ;;  %4027 = vmatprep.subr.bf16.mxu0 %v7739_v44 }
 0x294   : > { %4068 = vmatprep.subr.bf16.mxu1 %v7742_v22 }
 0x296   : > { %4028 = vmatpush1.bf16.msra.mxu0 %v7737_v38 }
 0x297   : > { %4069 = vmatpush1.bf16.msra.mxu1 %v7740_v56  ;;  %4029 = vmatprep.subr.bf16.mxu0 %v7745_v24 }
 0x298   : > { %4070 = vmatprep.subr.bf16.mxu1 %v7748_v28 }
 0x29a   : > { %4030 = vmatpush1.bf16.msra.mxu0 %v7743_v25 }
 0x29b   : > { %4071 = vmatpush1.bf16.msra.mxu1 %v7746_v12  ;;  %4033 = vmatprep.subr.bf16.mxu0 %v7751_v59 }
 0x29c   : > { %4074 = vmatprep.subr.bf16.mxu1 %v7754_v55 }
 0x29e   : > { %4034 = vmatpush2.bf16.msra.mxu0 %v7749_v18 }
 0x29f   : > { %4075 = vmatpush2.bf16.msra.mxu1 %v7752_v0  ;;  %4035 = vmatprep.subr.bf16.mxu0 %v7757_v45 }
 0x2a0   : > { %4076 = vmatprep.subr.bf16.mxu1 %v7760_v43 }
 0x2a2   : > { %4036 = vmatpush2.bf16.msra.mxu0 %v7755_v36 }
 0x2a3   : > { %4077 = vmatpush2.bf16.msra.mxu1 %v7758_v31  ;;  %4037 = vmatprep.subr.bf16.mxu0 %v7763_v23 }
 0x2a4   : > { %4078 = vmatprep.subr.bf16.mxu1 %v7766_v11 }
 0x2a6   : > { %4038 = vmatpush2.bf16.msra.mxu0 %v7761_v48 }
 0x2a7   : > { %4079 = vmatpush2.bf16.msra.mxu1 %v7764_v8  ;;  %4039 = vmatprep.subr.bf16.mxu0 %v7769_v54 }
 0x2a8   : > { %4080 = vmatprep.subr.bf16.mxu1 %v7772_v34 }
 0x2aa   : > { %4040 = vmatpush2.bf16.msra.mxu0 %v7767_v42 }
 0x2ab   : > { %4081 = vmatpush2.bf16.msra.mxu1 %v7770_v20  ;;  %4041 = vmatprep.subr.bf16.mxu0 %v7775_v50 }
 0x2ac   : > { %4082 = vmatprep.subr.bf16.mxu1 %v7778_v33 }
 0x2ae   : > { %4042 = vmatpush2.bf16.msra.mxu0 %v7773_v17 }
 0x2af   : > { %4083 = vmatpush2.bf16.msra.mxu1 %v7776_v60  ;;  %4043 = vmatprep.subr.bf16.mxu0 %v7781_v32  ;;  %v7791_v60 = vld [vmem:[%s10700_s5 + $0xe0] ss:$16 sps:$4 sm:$0xff]   ;;  %v7793_v32 = vld [vmem:[%s10700_s5 + $0xe4] ss:$16 sps:$4 sm:$0xff]  }
 0x2b0   : > { %4084 = vmatprep.subr.bf16.mxu1 %v7784_v9  ;;  %v7794_v9 = vld [vmem:[%s10700_s5 + $0x2e0] ss:$16 sps:$4 sm:$0xff]  }
 0x2b2   : > { %4044 = vmatpush2.bf16.msra.mxu0 %v7779_v35  ;;  %v7796_v35 = vld [vmem:[%s10700_s5 + $0x2e4] ss:$16 sps:$4 sm:$0xff]  }
 0x2b3   : > { %4085 = vmatpush2.bf16.msra.mxu1 %v7782_v27  ;;  %4045 = vmatprep.subr.bf16.mxu0 %v7787_v62  ;;  %v7799_v27 = vld [vmem:[%s10700_s5 + $0xc4] ss:$16 sps:$4 sm:$0xff]  }
 0x2b4   : > { %4086 = vmatprep.subr.bf16.mxu1 %v7790_v51  ;;  %v7802_v62 = vld [vmem:[%s10700_s5 + $0x2c4] ss:$16 sps:$4 sm:$0xff]   ;;  %v7797_v51 = vld [vmem:[%s10700_s5 + $0xc0] ss:$16 sps:$4 sm:$0xff]  }
 0x2b6   : > { %4046 = vmatpush2.bf16.msra.mxu0 %v7785_v30  ;;  %v7800_v30 = vld [vmem:[%s10700_s5 + $0x2c0] ss:$16 sps:$4 sm:$0xff]  }
 0x2b7   : > { %4087 = vmatpush2.bf16.msra.mxu1 %v7788_v14  ;;  %5525 = vmatprep.subr.bf16.mxu0 %v7793_v32  ;;  %v7805_v14 = vld [vmem:[%s10700_s5 + $0xa4] ss:$16 sps:$4 sm:$0xff]  }
 0x2b8   : > { %5566 = vmatprep.subr.bf16.mxu1 %v7796_v35 }
 0x2b9   : > { %4048 = vmatmul.mubr.bf16.vlgmr.msra.gmra.mxu0 %v3709_v40 }
 0x2ba   : > { %4089 = vmatmul.mubr.bf16.vlgmr.msra.gmra.mxu1 %v3709_v40  ;;  %5526 = vmatpush1.bf16.msra.mxu0 %v7791_v60  ;;  %v7808_v40 = vld [vmem:[%s10700_s5 + $0x2a4] ss:$16 sps:$4 sm:$0xff]   ;;  %v4157_v60 = vld [vmem:[%s10699_s4] sm:$0x3] }
 0x2bb   : > { %5567 = vmatpush1.bf16.msra.mxu1 %v7794_v9  ;;  %5527 = vmatprep.subr.bf16.mxu0 %v7799_v27  ;;  %v4162_v32 = vrot.slane %v4157_v60, %v8812_v58  ;;  %v4166_v9 = vrot.slane %v4157_v60, %v8815_v16 }
 0x2bc   : > { %5568 = vmatprep.subr.bf16.mxu1 %v7802_v62 }
 0x2bd   : > { %v4167_v27 = vcombine.low %v4162_v32, %v4166_v9  ;;  %v7889_v9 = vld [vmem:[%s10700_s5 + $0x4e4] ss:$16 sps:$4 sm:$0xff]  }
 0x2be   : > { %5528 = vmatpush1.bf16.msra.mxu0 %v7797_v51 }
 0x2bf   : > { %5569 = vmatpush1.bf16.msra.mxu1 %v7800_v30  ;;  %5529 = vmatprep.subr.bf16.mxu0 %v7805_v14  ;;  %v4174_v14 = vrot.slane %v4167_v27, %v8824_v63 }
 0x2c0   : > { %5570 = vmatprep.subr.bf16.mxu1 %v7808_v40 }
 0x2c5   : > { %v2594_v1 = vpop.f32.mrf.mxu0  ;;  %v2635_v19 = vpop.f32.mrf.mxu1 }
 0x2c6   : > { %v2642_v46 = vadd.f32 %v2594_v1, %v9732_v49  ;;  %v2644_v26 = vadd.f32 %v2635_v19, %v9734_v52  ;;  %v7803_v1 = vld [vmem:[%s10700_s5 + $0xa0] ss:$16 sps:$4 sm:$0xff]  }
 0x2c7   : > { %v2596_v61 = vpop.f32.mrf.mxu0  ;;  %v2637_v15 = vpop.f32.mrf.mxu1  ;;  %v7806_v19 = vld [vmem:[%s10700_s5 + $0x2a0] ss:$16 sps:$4 sm:$0xff]   ;;  %5530 = vmatpush1.bf16.msra.mxu0 %v7803_v1 }
 0x2c8   : > { %v2643_v21 = vadd.f32 %v2596_v61, %v9739_v5  ;;  %v2645_v7 = vadd.f32 %v2637_v15, %v9741_v6  ;;  %v7809_v61 = vld [vmem:[%s10700_s5 + $0x80] ss:$16 sps:$4 sm:$0xff]   ;;  %5571 = vmatpush1.bf16.msra.mxu1 %v7806_v19 }
 0x2c9   : > { %v2598_v39 = vpop.f32.mrf.mxu0  ;;  %v2639_v47 = vpop.f32.mrf.mxu1  ;;  %v7812_v15 = vld [vmem:[%s10700_s5 + $0x280] ss:$16 sps:$4 sm:$0xff]  }
 0x2ca   : > { %v7815_v39 = vld [vmem:[%s10700_s5 + $0x60] ss:$16 sps:$4 sm:$0xff]  }
 0x2cb   : > { %v2599_v29 = vpop.f32.mrf.mxu0  ;;  %v2640_v2 = vpop.f32.mrf.mxu1  ;;  %v7818_v47 = vld [vmem:[%s10700_s5 + $0x260] ss:$16 sps:$4 sm:$0xff]  }
 0x2cc   : > { %v7823_v29 = vld [vmem:[%s10700_s5 + $0x44] ss:$16 sps:$4 sm:$0xff]  }
 0x2cd   : > { %v7826_v2 = vld [vmem:[%s10700_s5 + $0x244] ss:$16 sps:$4 sm:$0xff]  }
 0x301   : > { %v3079_v10 = vpop.f32.mrf.mxu0 }
 0x302   : > { %v3127_v4 = vadd.f32 %v3079_v10, %v2642_v46  ;;  %v3120_v53 = vpop.f32.mrf.mxu1  ;;  %v7811_v46 = vld [vmem:[%s10700_s5 + $0x84] ss:$16 sps:$4 sm:$0xff]   ;;  %v7821_v10 = vld [vmem:[%s10700_s5 + $0x40] ss:$16 sps:$4 sm:$0xff]  }
 0x303   : > { %v3129_v57 = vadd.f32 %v3120_v53, %v2644_v26  ;;  %v3081_v13 = vpop.f32.mrf.mxu0  ;;  %v7814_v26 = vld [vmem:[%s10700_s5 + $0x284] ss:$16 sps:$4 sm:$0xff]   ;;  %5531 = vmatprep.subr.bf16.mxu0 %v7811_v46 }
 0x304   : > { %v3128_v44 = vadd.f32 %v3081_v13, %v2643_v21  ;;  %v3122_v22 = vpop.f32.mrf.mxu1  ;;  %v7817_v21 = vld [vmem:[%s10700_s5 + $0x64] ss:$16 sps:$4 sm:$0xff]   ;;  %5572 = vmatprep.subr.bf16.mxu1 %v7814_v26  ;;  %5532 = vmatpush1.bf16.msra.mxu0 %v7809_v61  ;;  %v7827_v13 = vld [vmem:[%s10700_s5 + $0x20] ss:$16 sps:$4 sm:$0xff]   ;;  %v4175_v61 = vcombine.high %v4174_v14, %v4174_v14 }
 0x305   : > { %v3130_v49 = vadd.f32 %v3122_v22, %v2645_v7  ;;  %v3083_v38 = vpop.f32.mrf.mxu0  ;;  %v7820_v7 = vld [vmem:[%s10700_s5 + $0x264] ss:$16 sps:$4 sm:$0xff]   ;;  %5573 = vmatpush1.bf16.msra.mxu1 %v7812_v15  ;;  %5533 = vmatprep.subr.bf16.mxu0 %v7817_v21 }
 0x306   : > { %v3124_v52 = vpop.f32.mrf.mxu1  ;;  %5574 = vmatprep.subr.bf16.mxu1 %v7820_v7  ;;  %v7829_v53 = vld [vmem:[%s10700_s5 + $0x24] ss:$16 sps:$4 sm:$0xff]   ;;  %v7833_v38 = vld [vmem:[%s10700_s5] ss:$16 sps:$4 sm:$0xff]  }
 0x307   : > { %v3084_v56 = vpop.f32.mrf.mxu0  ;;  %v7835_v22 = vld [vmem:[%s10700_s5 + $0x4] ss:$16 sps:$4 sm:$0xff]   ;;  %v7836_v52 = vld [vmem:[%s10700_s5 + $0x200] ss:$16 sps:$4 sm:$0xff]  }
 0x308   : > { %v3125_v24 = vpop.f32.mrf.mxu1  ;;  %5534 = vmatpush1.bf16.msra.mxu0 %v7815_v39  ;;  %v7841_v56 = vld [vmem:[%s10700_s5 + $0x1e4] ss:$16 sps:$4 sm:$0xff]  }
 0x309   : > { %5575 = vmatpush1.bf16.msra.mxu1 %v7818_v47  ;;  %5535 = vmatprep.subr.bf16.mxu0 %v7823_v29  ;;  %v7844_v24 = vld [vmem:[%s10700_s5 + $0x3e4] ss:$16 sps:$4 sm:$0xff]  }
 0x30a   : > { %5576 = vmatprep.subr.bf16.mxu1 %v7826_v2  ;;  %v4176_v2 = vrot.slane %v4174_v14, 1 }
 0x30c   : > { %5536 = vmatpush1.bf16.msra.mxu0 %v7821_v10  ;;  %v4177_v10 = vrot.slane %v4175_v61, 1 }
 0x30d   : > { %5537 = vmatprep.subr.bf16.mxu0 %v7829_v53 }
 0x310   : > { %5538 = vmatpush1.bf16.msra.mxu0 %v7827_v13 }
 0x311   : > { %5539 = vmatprep.subr.bf16.mxu0 %v7835_v22 }
 0x314   : > { %5540 = vmatpush1.bf16.msra.mxu0 %v7833_v38 }
 0x315   : > { %5541 = vmatprep.subr.bf16.mxu0 %v7841_v56 }
 0x33d   : > { %v3564_v28 = vpop.f32.mrf.mxu0 }
 0x33e   : > { %v3612_v5 = vadd.f32 %v3564_v28, %v3127_v4  ;;  %v3605_v25 = vpop.f32.mrf.mxu1  ;;  %v7824_v4 = vld [vmem:[%s10700_s5 + $0x240] ss:$16 sps:$4 sm:$0xff]  }
 0x33f   : > { %v3566_v6 = vpop.f32.mrf.mxu0  ;;  %v3614_v45 = vadd.f32 %v3605_v25, %v3129_v57  ;;  %v7832_v57 = vld [vmem:[%s10700_s5 + $0x224] ss:$16 sps:$4 sm:$0xff]   ;;  %5577 = vmatpush1.bf16.msra.mxu1 %v7824_v4  ;;  %v7839_v28 = vld [vmem:[%s10700_s5 + $0x1e0] ss:$16 sps:$4 sm:$0xff]  }
 0x340   : > { %v3607_v12 = vpop.f32.mrf.mxu1  ;;  %v3613_v36 = vadd.f32 %v3566_v6, %v3128_v44  ;;  %v7830_v44 = vld [vmem:[%s10700_s5 + $0x220] ss:$16 sps:$4 sm:$0xff]   ;;  %5578 = vmatprep.subr.bf16.mxu1 %v7832_v57  ;;  %v7847_v25 = vld [vmem:[%s10700_s5 + $0x1c4] ss:$16 sps:$4 sm:$0xff]   ;;  %5542 = vmatpush2.bf16.msra.mxu0 %v7839_v28 }
 0x341   : > { %v3568_v59 = vpop.f32.mrf.mxu0  ;;  %v3615_v42 = vadd.f32 %v3607_v12, %v3130_v49  ;;  %v7838_v49 = vld [vmem:[%s10700_s5 + $0x204] ss:$16 sps:$4 sm:$0xff]   ;;  %v7845_v12 = vld [vmem:[%s10700_s5 + $0x1c0] ss:$16 sps:$4 sm:$0xff]   ;;  %5543 = vmatprep.subr.bf16.mxu0 %v7847_v25 }
 0x342   : > { %v3609_v55 = vpop.f32.mrf.mxu1  ;;  %v7850_v6 = vld [vmem:[%s10700_s5 + $0x3c4] ss:$16 sps:$4 sm:$0xff]   ;;  %v7848_v59 = vld [vmem:[%s10700_s5 + $0x3c0] ss:$16 sps:$4 sm:$0xff]  }
 0x343   : > { %v3569_v18 = vpop.f32.mrf.mxu0  ;;  %5579 = vmatpush1.bf16.msra.mxu1 %v7830_v44  ;;  %v7853_v55 = vld [vmem:[%s10700_s5 + $0x1a4] ss:$16 sps:$4 sm:$0xff]   ;;  %v7878_v28 = vld [vmem:[%s10700_s5 + $0x320] ss:$16 sps:$4 sm:$0xff]  }
 0x344   : > { %v3610_v0 = vpop.f32.mrf.mxu1  ;;  %5580 = vmatprep.subr.bf16.mxu1 %v7838_v49  ;;  %v7856_v18 = vld [vmem:[%s10700_s5 + $0x3a4] ss:$16 sps:$4 sm:$0xff]   ;;  %5544 = vmatpush2.bf16.msra.mxu0 %v7845_v12 }
 0x345   : > { %v7851_v0 = vld [vmem:[%s10700_s5 + $0x1a0] ss:$16 sps:$4 sm:$0xff]   ;;  %5545 = vmatprep.subr.bf16.mxu0 %v7853_v55 }
 0x347   : > { %5581 = vmatpush1.bf16.msra.mxu1 %v7836_v52 }
 0x348   : > { %5582 = vmatprep.subr.bf16.mxu1 %v7844_v24  ;;  %5546 = vmatpush2.bf16.msra.mxu0 %v7851_v0  ;;  %v7877_v24 = vld [vmem:[%s10700_s5 + $0x124] ss:$16 sps:$4 sm:$0xff]  }
 0x379   : > { %v4049_v43 = vpop.f32.mrf.mxu0 }
 0x37a   : > { %v9875_v31 = vadd.f32 %v4049_v43, %v3612_v5  ;;  %v4090_v23 = vpop.f32.mrf.mxu1  ;;  %v7842_v5 = vld [vmem:[%s10700_s5 + $0x3e0] ss:$16 sps:$4 sm:$0xff]   ;;  %v7859_v43 = vld [vmem:[%s10700_s5 + $0x184] ss:$16 sps:$4 sm:$0xff]  }
 0x37b   : > { %v4099_v11 = vadd.f32 %v4090_v23, %v3614_v45  ;;  %v4051_v48 = vpop.f32.mrf.mxu0  ;;  %5583 = vmatpush2.bf16.msra.mxu1 %v7842_v5  ;;  %v7854_v45 = vld [vmem:[%s10700_s5 + $0x3a0] ss:$16 sps:$4 sm:$0xff]   ;;  %5547 = vmatprep.subr.bf16.mxu0 %v7859_v43  ;;  %v7880_v5 = vld [vmem:[%s10700_s5 + $0x324] ss:$16 sps:$4 sm:$0xff]  }
 0x37c   : > { %v9877_v8 = vadd.f32 %v4051_v48, %v3613_v36  ;;  %v4092_v54 = vpop.f32.mrf.mxu1  ;;  %5584 = vmatprep.subr.bf16.mxu1 %v7850_v6  ;;  %v7862_v36 = vld [vmem:[%s10700_s5 + $0x384] ss:$16 sps:$4 sm:$0xff]   ;;  %v7857_v23 = vld [vmem:[%s10700_s5 + $0x180] ss:$16 sps:$4 sm:$0xff]  }
 0x37d   : > { %4106 = vrot.lane.b32.xlu0 %v4099_v11, %s8188_s26  ;;  %v4053_v34 = vpop.f32.mrf.mxu0  ;;  %v4100_v33 = vadd.f32 %v4092_v54, %v3615_v42  ;;  %v7860_v11 = vld [vmem:[%s10700_s5 + $0x380] ss:$16 sps:$4 sm:$0xff]   ;;  %v7865_v48 = vld [vmem:[%s10700_s5 + $0x164] ss:$16 sps:$4 sm:$0xff]   ;;  %5548 = vmatpush2.bf16.msra.mxu0 %v7857_v23 }
 0x37e   : > { %v4094_v20 = vpop.f32.mrf.mxu1  ;;  %4104 = vrot.lane.b32.xlu1 %v9877_v8, %s8188_s26  ;;  %v7868_v54 = vld [vmem:[%s10700_s5 + $0x364] ss:$16 sps:$4 sm:$0xff]   ;;  %v7863_v34 = vld [vmem:[%s10700_s5 + $0x160] ss:$16 sps:$4 sm:$0xff]   ;;  %5549 = vmatprep.subr.bf16.mxu0 %v7865_v48 }
 0x37f   : > { %v4054_v50 = vpop.f32.mrf.mxu0  ;;  %5585 = vmatpush2.bf16.msra.mxu1 %v7848_v59  ;;  %v7866_v42 = vld [vmem:[%s10700_s5 + $0x360] ss:$16 sps:$4 sm:$0xff]   ;;  %v7871_v20 = vld [vmem:[%s10700_s5 + $0x144] ss:$16 sps:$4 sm:$0xff]  }
 0x380   : > { %v4095_v17 = vpop.f32.mrf.mxu1  ;;  %5586 = vmatprep.subr.bf16.mxu1 %v7856_v18  ;;  %v7874_v50 = vld [vmem:[%s10700_s5 + $0x344] ss:$16 sps:$4 sm:$0xff]  }
 0x381   : > { %5550 = vmatpush2.bf16.msra.mxu0 %v7863_v34  ;;  %v7872_v17 = vld [vmem:[%s10700_s5 + $0x340] ss:$16 sps:$4 sm:$0xff]  }
 0x382   : > { %4108 = vrot.lane.b32.xlu1 %v4100_v33, %s8188_s26  ;;  %v7869_v33 = vld [vmem:[%s10700_s5 + $0x140] ss:$16 sps:$4 sm:$0xff]   ;;  %5551 = vmatprep.subr.bf16.mxu0 %v7871_v20 }
 0x383   : > { %5587 = vmatpush2.bf16.msra.mxu1 %v7854_v45  ;;  %v7881_v34 = vld [vmem:[%s10700_s5 + $0x100] ss:$16 sps:$4 sm:$0xff]  }
 0x384   : > { %5588 = vmatprep.subr.bf16.mxu1 %v7862_v36  ;;  %v7884_v20 = vld [vmem:[%s10700_s5 + $0x300] ss:$16 sps:$4 sm:$0xff]  }
 0x385   : > { %5552 = vmatpush2.bf16.msra.mxu0 %v7869_v33 }
 0x386   : > { %5553 = vmatprep.subr.bf16.mxu0 %v7877_v24  ;;  %v7901_v24 = vld [vmem:[%s10700_s5 + $0x4a4] ss:$16 sps:$4 sm:$0xff]  }
 0x387   : > { %5589 = vmatpush2.bf16.msra.mxu1 %v7860_v11 }
 0x388   : > { %5590 = vmatprep.subr.bf16.mxu1 %v7868_v54 }
 0x38b   : > { %5591 = vmatpush2.bf16.msra.mxu1 %v7866_v42  ;;  %v7883_v42 = vld [vmem:[%s10700_s5 + $0x104] ss:$16 sps:$4 sm:$0xff]  }
 0x38c   : > { %5592 = vmatprep.subr.bf16.mxu1 %v7874_v50 }
 0x38f   : > { %5593 = vmatpush2.bf16.msra.mxu1 %v7872_v17  ;;  %v7886_v17 = vld [vmem:[%s10700_s5 + $0x304] ss:$16 sps:$4 sm:$0xff]  }
 0x390   : > { %5594 = vmatprep.subr.bf16.mxu1 %v7880_v5  ;;  %v7904_v5 = vld [vmem:[%s10700_s5 + $0xec] ss:$16 sps:$4 sm:$0xff]  }
 0x393   : > { %5595 = vmatpush2.bf16.msra.mxu1 %v7878_v28 }
 0x394   : > { %5596 = vmatprep.subr.bf16.mxu1 %v7886_v17  ;;  %v7931_v17 = vld [vmem:[%s10700_s5 + $0x404] ss:$16 sps:$4 sm:$0xff]  }
 0x397   : > { %5597 = vmatpush2.bf16.msra.mxu1 %v7884_v20  ;;  %v7928_v20 = vld [vmem:[%s10700_s5 + $0x6c] ss:$16 sps:$4 sm:$0xff]  }
 0x3ef   : > { %v4107_v62 = vpop.permute.xlu0 %4106 }
 0x3f0   : > { %v4105_v35 = vpop.permute.xlu1 %4104 }
 0x3f1   : > { %v4111_v51 = vsel %vm4110_vm14, %v4105_v35, %v4107_v62  ;;  %v7892_v35 = vld [vmem:[%s10700_s5 + $0x624] ss:$16 sps:$4 sm:$0xff]  }
 0x3f2   : > { %v4115_v1 = vmax.f32 %v9875_v31, %v4111_v51  ;;  %5660 = vmatprep.subr.bf16.mxu1 %v7892_v35  ;;  %v7937_v35 = vld [vmem:[%s10700_s5 + $0x5e4] ss:$16 sps:$4 sm:$0xff]  }
 0x3f4   : > { %v4109_v30 = vpop.permute.xlu1 %4108 }
 0x3f5   : > { %v4112_v40 = vsel %vm4110_vm14, %v4107_v62, %v4109_v30  ;;  %v8190_v62 = vmov 0.0  }
 0x3f6   : > { %v4116_v19 = vmax.f32 %v9877_v8, %v4112_v40  ;;  %v8189_v8 = vmov 1934713408  }
 0x3f7   : > { %v4210_v22 = vunpack.c.l.s4 %v8189_v8 }
 0x3f8   : > { %v4119_v46 = vcombine.low %v4115_v1, %v4116_v19  ;;  %v4120_v26 = vcombine.high %v4115_v1, %v4116_v19 }
 0x3f9   : > { %v4211_v12 = vunpack.c.0.s8 %v4210_v22  ;;  %v7895_v22 = vld [vmem:[%s10700_s5 + $0x4c4] ss:$16 sps:$4 sm:$0xff]  }
 0x3fa   : > { %v4127_v15 = vrot.slane %v4119_v46, %v8824_v63  ;;  %v4134_v21 = vrot.slane %v4120_v26, %v8824_v63  ;;  %v7875_v63 = vld [vmem:[%s10700_s5 + $0x120] ss:$16 sps:$4 sm:$0xff]  }
 0x3fb   : > { %5554 = vmatpush2.bf16.msra.mxu0 %v7875_v63  ;;  %v4214_v36 = vsub.s32 %v4211_v12, %v8809_v41 }
 0x3fc   : > { %v4135_v7 = vcombine.high %v4127_v15, %v4127_v15  ;;  %v4136_v39 = vcombine.high %v4134_v21, %v4134_v21  ;;  %v6941_v47 = vrot.slane %v4127_v15, 9  ;;  %v6943_v29 = vrot.slane %v4134_v21, 9  ;;  %5555 = vmatprep.subr.bf16.mxu0 %v7883_v42  ;;  %v7925_v42 = vld [vmem:[%s10700_s5 + $0x424] ss:$16 sps:$4 sm:$0xff]  }
 0x3fe   : > { %v6942_v4 = vrot.slane %v4135_v7, 9  ;;  %v6944_v53 = vrot.slane %v4136_v39, 9  ;;  %v4153_v57 = vmax.f32 %v4127_v15, %v6941_v47  ;;  %v4155_v13 = vmax.f32 %v4134_v21, %v6943_v29 }
 0x3ff   : > { %5556 = vmatpush2.bf16.msra.mxu0 %v7881_v34  ;;  %v7920_v34 = vld [vmem:[%s10700_s5 + $0x88] ss:$16 sps:$4 sm:$0xff]  }
 0x400   : > { %v4154_v31 = vmax.f32 %v4135_v7, %v6942_v4  ;;  %v4156_v44 = vmax.f32 %v4136_v39, %v6944_v53  ;;  %v4182_v49 = vadd.f32 %v4174_v14, %v4153_v57  ;;  %v4184_v52 = vadd.f32 %v4175_v61, %v4155_v13  ;;  %5607 = vmatprep.subr.bf16.mxu0 %v7889_v9  ;;  %v7932_v9 = vld [vmem:[%s10700_s5 + $0x48] ss:$16 sps:$4 sm:$0xff]  }
 0x402   : > { %v4183_v38 = vadd.f32 %v4176_v2, %v4154_v31  ;;  %v4185_v56 = vadd.f32 %v4177_v10, %v4156_v44  ;;  %v4186_v59 = vmax.f32 %v4182_v49, 0.0  ;;  %v4188_v55 = vmax.f32 %v4184_v52, 0.0  ;;  %v7887_v31 = vld [vmem:[%s10700_s5 + $0x4e0] ss:$16 sps:$4 sm:$0xff]   ;;  %v7898_v49 = vld [vmem:[%s10700_s5 + $0x604] ss:$16 sps:$4 sm:$0xff]  }
 0x403   : > { %v7890_v44 = vld [vmem:[%s10700_s5 + $0x620] ss:$16 sps:$4 sm:$0xff]  }
 0x404   : > { %v4187_v25 = vmax.f32 %v4183_v38, 0.0  ;;  %v4189_v6 = vmax.f32 %v4185_v56, 0.0  ;;  %v7893_v52 = vld [vmem:[%s10700_s5 + $0x4c0] ss:$16 sps:$4 sm:$0xff]  }
 0x405   : > { %v7896_v56 = vld [vmem:[%s10700_s5 + $0x600] ss:$16 sps:$4 sm:$0xff]  }
 0x406   : > { %v4196_v18 = vrot.slane %v4187_v25, 7  ;;  %v4203_v0 = vrot.slane %v4189_v6, 7  ;;  %v7899_v25 = vld [vmem:[%s10700_s5 + $0x4a0] ss:$16 sps:$4 sm:$0xff]   ;;  %v7902_v6 = vld [vmem:[%s10700_s5 + $0xe8] ss:$16 sps:$4 sm:$0xff]  }
 0x408   : > { %v4197_v45 = vsel %vm1734_vm6, %v4196_v18, %v4186_v59  ;;  %v4204_v43 = vsel %vm1734_vm6, %v4203_v0, %v4188_v55  ;;  %v7907_v59 = vld [vmem:[%s10700_s5 + $0x484] ss:$16 sps:$4 sm:$0xff]   ;;  %v7910_v55 = vld [vmem:[%s10700_s5 + $0xcc] ss:$16 sps:$4 sm:$0xff]  }
 0x409   : > { %v4205_v23 = vsel %vm1740_vm8, %v4203_v0, %v4204_v43  ;;  %v4198_v11 = vsel %vm1740_vm8, %v4196_v18, %v4197_v45  ;;  %v7913_v45 = vld [vmem:[%s10700_s5 + $0x464] ss:$16 sps:$4 sm:$0xff]   ;;  %v7916_v43 = vld [vmem:[%s10700_s5 + $0xac] ss:$16 sps:$4 sm:$0xff]  }
 0x40a   : > { %v4206_v48 = vsel %vm1746_vm10, %v4203_v0, %v4205_v23  ;;  %v4199_v54 = vsel %vm1746_vm10, %v4196_v18, %v4198_v11  ;;  %v7914_v23 = vld [vmem:[%s10700_s5 + $0xa8] ss:$16 sps:$4 sm:$0xff]   ;;  %v7919_v11 = vld [vmem:[%s10700_s5 + $0x444] ss:$16 sps:$4 sm:$0xff]  }
 0x40b   : > { %v4207_v50 = vsel %vm1752_vm12, %v4203_v0, %v4206_v48  ;;  %v4200_v33 = vsel %vm1752_vm12, %v4196_v18, %v4199_v54  ;;  %v7905_v18 = vld [vmem:[%s10700_s5 + $0x480] ss:$16 sps:$4 sm:$0xff]   ;;  %v7908_v0 = vld [vmem:[%s10700_s5 + $0xc8] ss:$16 sps:$4 sm:$0xff]   ;;  %v7922_v48 = vld [vmem:[%s10700_s5 + $0x8c] ss:$16 sps:$4 sm:$0xff]  }
 0x40c   : > { %v4224_v60 = vrot.slane %v4207_v50, %v4214_v36  ;;  %v4215_v32 = vrot.slane %v4200_v33, %v4214_v36  ;;  %v7911_v36 = vld [vmem:[%s10700_s5 + $0x460] ss:$16 sps:$4 sm:$0xff]   ;;  %v7926_v33 = vld [vmem:[%s10700_s5 + $0x68] ss:$16 sps:$4 sm:$0xff]  }
 0x40d   : > { %v7917_v54 = vld [vmem:[%s10700_s5 + $0x440] ss:$16 sps:$4 sm:$0xff]  }
 0x40e   : > { %v4259_v27 = vrot.slane %v4224_v60, %v8812_v58  ;;  %v4216_v51 = vcombine.high %v4215_v32, %v8190_v62  ;;  %v4263_v40 = vrot.slane %v4224_v60, %v8844_v37  ;;  %v4225_v19 = vcombine.high %v4224_v60, %v8190_v62  ;;  %v7923_v50 = vld [vmem:[%s10700_s5 + $0x420] ss:$16 sps:$4 sm:$0xff]   ;;  %v7934_v60 = vld [vmem:[%s10700_s5 + $0x4c] ss:$16 sps:$4 sm:$0xff]  }
 0x40f   : > { %v4234_v7 = vrot.slane %v4215_v32, %v8844_v37  ;;  %v4230_v39 = vrot.slane %v4215_v32, %v8812_v58  ;;  %v7929_v32 = vld [vmem:[%s10700_s5 + $0x400] ss:$16 sps:$4 sm:$0xff]  }
 0x410   : > { %4264 = vrot.lane.b32.xlu1 %v4259_v27, %s8186_s27  ;;  %v4241_v30 = vrot.slane %v4216_v51, %v8812_v58  ;;  %v4245_v14 = vrot.slane %v4216_v51, %v8844_v37  ;;  %v4279_v46 = vrot.slane %v4225_v19, %v8844_v37  ;;  %v4275_v26 = vrot.slane %v4225_v19, %v8812_v58  ;;  %v7940_v27 = vld [vmem:[%s10700_s5 + $0x2c] ss:$16 sps:$4 sm:$0xff]   ;;  %v7935_v62 = vld [vmem:[%s10700_s5 + $0x5e0] ss:$16 sps:$4 sm:$0xff]   ;;  %v7938_v51 = vld [vmem:[%s10700_s5 + $0x28] ss:$16 sps:$4 sm:$0xff]  }
 0x411   : > { %v10121_v8 = vpack.c.bf16 %v4230_v39, %v4230_v39  ;;  %v7949_v19 = vld [vmem:[%s10700_s5 + $0x5a4] ss:$16 sps:$4 sm:$0xff]   ;;  %v7956_v39 = vld [vmem:[%s10700_s5 + $0x1c8] ss:$16 sps:$4 sm:$0xff]  }
 0x412   : > { %v7276_v1 = vpack.i.bf16 %v4241_v30, %v4245_v14  ;;  %v7943_v30 = vld [vmem:[%s10700_s5 + $0x5c4] ss:$16 sps:$4 sm:$0xff]   ;;  %v7946_v14 = vld [vmem:[%s10700_s5 + $0xc] ss:$16 sps:$4 sm:$0xff]  }
 0x414   : > { %4266 = vrot.lane.b32.xlu1 %v4263_v40, %s8186_s27  ;;  %7277 = vrot.lane.b32.xlu0 %v7276_v1, %s8191_s29  ;;  %v7941_v40 = vld [vmem:[%s10700_s5 + $0x5c0] ss:$16 sps:$4 sm:$0xff]   ;;  %v7944_v1 = vld [vmem:[%s10700_s5 + $0x8] ss:$16 sps:$4 sm:$0xff]   ;;  %s324_s27 = scalar_lea.vmem [#allocation2], %s323_s18 }
 0x415   : > { %s6216_s16 = sshll.u32 %s324_s27, 4  ;;  %s6217_s16 = int_to_ptr.vmem [resolvable:$true] %s6216_s16 }
 0x416   : > { %s8123_s24 = scalar_lea.vmem %s6217_s16, 16 }
 0x417   : > { %p8124_p11 = scmp.ne.s32.totalorder %s6217_s16, %s8123_s24 }
 0x418   : > { %4282 = vrot.lane.b32.xlu0 %v4279_v46, %s8192_s14  ;;  %v7952_v46 = vld [vmem:[%s10700_s5 + $0x1ec] ss:$16 sps:$4 sm:$0xff]  }
 0x419   : > { %p8125_p12 = pnand %p8124_p11, %p8282_p5 }
 0x41b   : > { %p8126_p13 = pneg %p8125_p12 }
 0x41c   : > { %4280 = vrot.lane.b32.xlu0 %v4275_v26, %s8192_s14  ;;  %v7947_v26 = vld [vmem:[%s10700_s5 + $0x5a0] ss:$16 sps:$4 sm:$0xff]   ;;  %s7180_s14 = sshll.u32 %s8265_s13, 4  ;;  %s8193_s13 = smov [#allocation2]  }
 0x41d   : > { %s10660_s22 = scalar_lea.hbm %s10704_s9, %s7180_s14  ;;  %s8127_s25 = sshll.u32 %s8193_s13, 4  ;;  %s8128_s25 = int_to_ptr.vmem [resolvable:$false] %s8127_s25 }
 0x41e   : > { %s8129_s26 = scalar_lea.vmem %s8128_s25, 32  ;;  %p8130_p0 = scmp.lt.s32.totalorder %s6217_s16, %s8128_s25 }
 0x41f   : > { %p8131_p1 = scmp.lt.s32.totalorder %s8129_s26, %s8123_s24 }
 0x421   : > { %p8132_p2 = por %p8131_p1, %p8130_p0 }
 0x423   : > { %p8133_p3 = pnand %p8132_p2, %p8126_p13 }
 0x482   : > { %v10107_v47 = vpop.permute.xlu1 %4264 }
 0x486   : > { %v7278_v61 = vpop.permute.xlu0 %7277 }
 0x487   : > { %v7280_v15 = vunpack.i.h.bf16 %v7278_v61  ;;  %v7279_v21 = vunpack.i.l.bf16 %v7278_v61  ;;  %v7950_v61 = vld [vmem:[%s10700_s5 + $0x1e8] ss:$16 sps:$4 sm:$0xff]  }
 0x489   : > { %v4251_v29 = vsel %vm4250_vm15, %v7280_v15, %v7279_v21  ;;  %v4289_v2 = vsel %vm4250_vm15, %v4234_v7, %v7280_v15  ;;  %v4290_v10 = vsel %vm1282_vm5, %v7279_v21, %v10107_v47  ;;  %v7955_v15 = vld [vmem:[%s10700_s5 + $0x584] ss:$16 sps:$4 sm:$0xff]   ;;  %v7958_v21 = vld [vmem:[%s10700_s5 + $0x1cc] ss:$16 sps:$4 sm:$0xff]   ;;  %v7953_v7 = vld [vmem:[%s10700_s5 + $0x580] ss:$16 sps:$4 sm:$0xff]  }
 0x48a   : > { %v10111_v4 = vpack.c.bf16 %v4251_v29, %v4251_v29  ;;  %v4283_v53 = vpop.permute.xlu0 %4282  ;;  %v4293_v57 = vpack.c.bf16 %v4289_v2, %v4289_v2  ;;  %v10113_v13 = vpack.c.bf16 %v4290_v10, %v4290_v10  ;;  %v7961_v29 = vld [vmem:[%s10700_s5 + $0x564] ss:$16 sps:$4 sm:$0xff]   ;;  %v7964_v2 = vld [vmem:[%s10700_s5 + $0x1ac] ss:$16 sps:$4 sm:$0xff]   ;;  %v7959_v10 = vld [vmem:[%s10700_s5 + $0x560] ss:$16 sps:$4 sm:$0xff]  }
 0x48b   : > { %v10157_v12 = vpack.c.bf16 %v4283_v53, %v4283_v53 }
 0x48c   : > { %5557 = vmatprep.mubr.bf16.mxu0 %v4293_v57  ;;  %5598 = vmatprep.mubr.bf16.mxu1 %v10113_v13 }
 0x48d   : > { %5558 = vmatmul.mubr.bf16.vlgmr.msra.gmra.mxu0 %v10121_v8  ;;  %5599 = vmatmul.mubr.bf16.vlgmr.msra.gmra.mxu1 %v10111_v4 }
 0x48e   : > { %5608 = vmatpush1.bf16.msra.mxu0 %v7887_v31  ;;  %5661 = vmatpush1.bf16.msra.mxu1 %v7890_v44  ;;  %v10132_v38 = vpop.permute.xlu0 %4280  ;;  %v7970_v31 = vld [vmem:[%s10700_s5 + $0x18c] ss:$16 sps:$4 sm:$0xff]   ;;  %v7965_v44 = vld [vmem:[%s10700_s5 + $0x540] ss:$16 sps:$4 sm:$0xff]  }
 0x48f   : > { %v4285_v63 = vsel %vm4284_vm0, %v10132_v38, %v4283_v53  ;;  %5609 = vmatprep.subr.bf16.mxu0 %v7895_v22  ;;  %5662 = vmatprep.subr.bf16.mxu1 %v7898_v49  ;;  %v7962_v53 = vld [vmem:[%s10700_s5 + $0x1a8] ss:$16 sps:$4 sm:$0xff]   ;;  %v7973_v49 = vld [vmem:[%s10700_s5 + $0x524] ss:$16 sps:$4 sm:$0xff]  }
 0x490   : > { %v10145_v28 = vpack.c.bf16 %v4285_v63, %v4285_v63  ;;  %5680 = vmatprep.mubr.bf16.mxu1 %v8185_v3  ;;  %v7968_v22 = vld [vmem:[%s10700_s5 + $0x188] ss:$16 sps:$4 sm:$0xff]  }
 0x491   : > { %v7974_v63 = vld [vmem:[%s10700_s5 + $0x168] ss:$16 sps:$4 sm:$0xff]  }
 0x492   : > { %5610 = vmatpush1.bf16.msra.mxu0 %v7893_v52  ;;  %5663 = vmatpush1.bf16.msra.mxu1 %v7896_v56  ;;  %v7976_v52 = vld [vmem:[%s10700_s5 + $0x16c] ss:$16 sps:$4 sm:$0xff]   ;;  %v7971_v56 = vld [vmem:[%s10700_s5 + $0x520] ss:$16 sps:$4 sm:$0xff]  }
 0x493   : > { %5639 = vmatprep.mubr.bf16.mxu0 %v10145_v28  ;;  %5611 = vmatprep.subr.bf16.mxu0 %v7901_v24  ;;  %v7979_v24 = vld [vmem:[%s10700_s5 + $0x504] ss:$16 sps:$4 sm:$0xff]  }
 0x494   : > { %5689 = vmatprep.subr.bf16.mxu1 %v7904_v5  ;;  %v7982_v5 = vld [vmem:[%s10700_s5 + $0x14c] ss:$16 sps:$4 sm:$0xff]  }
 0x495   : > { %7145 = vmatmul.mubr.msk.bf16.vlgmr.msra.gmra.mxu1 %vm5521_vm1, %v10157_v12 }
 0x496   : > { %5612 = vmatpush1.bf16.msra.mxu0 %v7899_v25  ;;  %5690 = vmatpush1.bf16.msra.mxu1 %v7902_v6  ;;  %v4267_v25 = vpop.permute.xlu1 %4266  ;;  %v7977_v6 = vld [vmem:[%s10700_s5 + $0x500] ss:$16 sps:$4 sm:$0xff]  }
 0x497   : > { %5721 = vmatprep.mubr.bf16.mxu1 %v4293_v57  ;;  %5613 = vmatprep.subr.bf16.mxu0 %v7907_v59  ;;  %v7967_v57 = vld [vmem:[%s10700_s5 + $0x544] ss:$16 sps:$4 sm:$0xff]   ;;  %v7980_v59 = vld [vmem:[%s10700_s5 + $0x148] ss:$16 sps:$4 sm:$0xff]  }
 0x498   : > { %5691 = vmatprep.subr.bf16.mxu1 %v7910_v55  ;;  %v4268_v55 = vsel %vm1282_vm5, %v10107_v47, %v4267_v25  ;;  %v7986_v47 = vld [vmem:[%s10700_s5 + $0x2e8] ss:$16 sps:$4 sm:$0xff]  }
 0x499   : > { %v8058_v25 = vld [vmem:[%s10700_s5 + $0x5a8] ss:$16 sps:$4 sm:$0xff]  }
 0x49a   : > { %5614 = vmatpush1.bf16.msra.mxu0 %v7905_v18  ;;  %5692 = vmatpush1.bf16.msra.mxu1 %v7908_v0  ;;  %v7985_v18 = vld [vmem:[%s10700_s5 + $0x12c] ss:$16 sps:$4 sm:$0xff]  }
 0x49b   : > { %5615 = vmatprep.subr.bf16.mxu0 %v7913_v45  ;;  %5693 = vmatprep.subr.bf16.mxu1 %v7916_v43  ;;  %v7988_v0 = vld [vmem:[%s10700_s5 + $0x2ec] ss:$16 sps:$4 sm:$0xff]   ;;  %v4291_v45 = vsel %vm4284_vm0, %v4268_v55, %v10132_v38  ;;  %v7983_v43 = vld [vmem:[%s10700_s5 + $0x128] ss:$16 sps:$4 sm:$0xff]  }
 0x49c   : > { %v7994_v38 = vld [vmem:[%s10700_s5 + $0x2cc] ss:$16 sps:$4 sm:$0xff]   ;;  %v8061_v55 = vld [vmem:[%s10700_s5 + $0x348] ss:$16 sps:$4 sm:$0xff]  }
 0x49e   : > { %5616 = vmatpush1.bf16.msra.mxu0 %v7911_v36  ;;  %5694 = vmatpush1.bf16.msra.mxu1 %v7914_v23  ;;  %v10334_v36 = vpack.c.bf16 %v4291_v45, %v4291_v45  ;;  %v7991_v23 = vld [vmem:[%s10700_s5 + $0x10c] ss:$16 sps:$4 sm:$0xff]  }
 0x49f   : > { %5617 = vmatprep.subr.bf16.mxu0 %v7919_v11  ;;  %5695 = vmatprep.subr.bf16.mxu1 %v7922_v48  ;;  %v7989_v11 = vld [vmem:[%s10700_s5 + $0x108] ss:$16 sps:$4 sm:$0xff]   ;;  %v8072_v45 = vld [vmem:[%s10700_s5 + $0x56c] ss:$16 sps:$4 sm:$0xff]  }
 0x4a0   : > { %v7992_v48 = vld [vmem:[%s10700_s5 + $0x2c8] ss:$16 sps:$4 sm:$0xff]  }
 0x4a2   : > { %5618 = vmatpush1.bf16.msra.mxu0 %v7917_v54  ;;  %5696 = vmatpush1.bf16.msra.mxu1 %v7920_v34  ;;  %v7997_v54 = vld [vmem:[%s10700_s5 + $0x2ac] ss:$16 sps:$4 sm:$0xff]  }
 0x4a3   : > { %5619 = vmatprep.subr.bf16.mxu0 %v7925_v42  ;;  %5697 = vmatprep.subr.bf16.mxu1 %v7928_v20  ;;  %v8000_v34 = vld [vmem:[%s10700_s5 + $0x4ec] ss:$16 sps:$4 sm:$0xff]   ;;  %v7995_v42 = vld [vmem:[%s10700_s5 + $0x2a8] ss:$16 sps:$4 sm:$0xff]  }
 0x4a4   : > { %v8003_v20 = vld [vmem:[%s10700_s5 + $0x28c] ss:$16 sps:$4 sm:$0xff]  }
 0x4a6   : > { %5620 = vmatpush1.bf16.msra.mxu0 %v7923_v50  ;;  %5698 = vmatpush1.bf16.msra.mxu1 %v7926_v33  ;;  %v8006_v50 = vld [vmem:[%s10700_s5 + $0x4cc] ss:$16 sps:$4 sm:$0xff]   ;;  %v8001_v33 = vld [vmem:[%s10700_s5 + $0x288] ss:$16 sps:$4 sm:$0xff]  }
 0x4a7   : > { %5621 = vmatprep.subr.bf16.mxu0 %v7931_v17  ;;  %5699 = vmatprep.subr.bf16.mxu1 %v7934_v60  ;;  %v8004_v17 = vld [vmem:[%s10700_s5 + $0x4c8] ss:$16 sps:$4 sm:$0xff]   ;;  %v8009_v60 = vld [vmem:[%s10700_s5 + $0x26c] ss:$16 sps:$4 sm:$0xff]  }
 0x4aa   : > { %5622 = vmatpush1.bf16.msra.mxu0 %v7929_v32  ;;  %5700 = vmatpush1.bf16.msra.mxu1 %v7932_v9  ;;  %v8007_v32 = vld [vmem:[%s10700_s5 + $0x268] ss:$16 sps:$4 sm:$0xff]   ;;  %v8015_v9 = vld [vmem:[%s10700_s5 + $0x24c] ss:$16 sps:$4 sm:$0xff]  }
 0x4ab   : > { %5623 = vmatprep.subr.bf16.mxu0 %v7937_v35  ;;  %5701 = vmatprep.subr.bf16.mxu1 %v7940_v27  ;;  %v8018_v35 = vld [vmem:[%s10700_s5 + $0x48c] ss:$16 sps:$4 sm:$0xff]   ;;  %v8013_v27 = vld [vmem:[%s10700_s5 + $0x248] ss:$16 sps:$4 sm:$0xff]  }
 0x4ae   : > { %5624 = vmatpush2.bf16.msra.mxu0 %v7935_v62  ;;  %5702 = vmatpush1.bf16.msra.mxu1 %v7938_v51  ;;  %v8016_v62 = vld [vmem:[%s10700_s5 + $0x488] ss:$16 sps:$4 sm:$0xff]   ;;  %v8021_v51 = vld [vmem:[%s10700_s5 + $0x22c] ss:$16 sps:$4 sm:$0xff]  }
 0x4af   : > { %5625 = vmatprep.subr.bf16.mxu0 %v7943_v30  ;;  %5703 = vmatprep.subr.bf16.mxu1 %v7946_v14  ;;  %v8024_v30 = vld [vmem:[%s10700_s5 + $0x46c] ss:$16 sps:$4 sm:$0xff]   ;;  %v8019_v14 = vld [vmem:[%s10700_s5 + $0x228] ss:$16 sps:$4 sm:$0xff]  }
 0x4b2   : > { %5626 = vmatpush2.bf16.msra.mxu0 %v7941_v40  ;;  %5704 = vmatpush1.bf16.msra.mxu1 %v7944_v1  ;;  %v8022_v40 = vld [vmem:[%s10700_s5 + $0x468] ss:$16 sps:$4 sm:$0xff]   ;;  %v8027_v1 = vld [vmem:[%s10700_s5 + $0x20c] ss:$16 sps:$4 sm:$0xff]  }
 0x4b3   : > { %5627 = vmatprep.subr.bf16.mxu0 %v7949_v19  ;;  %5705 = vmatprep.subr.bf16.mxu1 %v7952_v46  ;;  %v8030_v19 = vld [vmem:[%s10700_s5 + $0x44c] ss:$16 sps:$4 sm:$0xff]   ;;  %v8025_v46 = vld [vmem:[%s10700_s5 + $0x208] ss:$16 sps:$4 sm:$0xff]  }
 0x4b6   : > { %5628 = vmatpush2.bf16.msra.mxu0 %v7947_v26  ;;  %5706 = vmatpush2.bf16.msra.mxu1 %v7950_v61  ;;  %v8028_v26 = vld [vmem:[%s10700_s5 + $0x448] ss:$16 sps:$4 sm:$0xff]   ;;  %v8033_v61 = vld [vmem:[%s10700_s5 + $0x3ec] ss:$16 sps:$4 sm:$0xff]  }
 0x4b7   : > { %5629 = vmatprep.subr.bf16.mxu0 %v7955_v15  ;;  %5707 = vmatprep.subr.bf16.mxu1 %v7958_v21  ;;  %v8036_v15 = vld [vmem:[%s10700_s5 + $0x42c] ss:$16 sps:$4 sm:$0xff]   ;;  %v8031_v21 = vld [vmem:[%s10700_s5 + $0x3e8] ss:$16 sps:$4 sm:$0xff]  }
 0x4ba   : > { %5630 = vmatpush2.bf16.msra.mxu0 %v7953_v7  ;;  %5708 = vmatpush2.bf16.msra.mxu1 %v7956_v39  ;;  %v8034_v7 = vld [vmem:[%s10700_s5 + $0x428] ss:$16 sps:$4 sm:$0xff]   ;;  %v8039_v39 = vld [vmem:[%s10700_s5 + $0x3cc] ss:$16 sps:$4 sm:$0xff]  }
 0x4bb   : > { %5631 = vmatprep.subr.bf16.mxu0 %v7961_v29  ;;  %5709 = vmatprep.subr.bf16.mxu1 %v7964_v2  ;;  %v8042_v29 = vld [vmem:[%s10700_s5 + $0x40c] ss:$16 sps:$4 sm:$0xff]   ;;  %v8037_v2 = vld [vmem:[%s10700_s5 + $0x3c8] ss:$16 sps:$4 sm:$0xff]  }
 0x4be   : > { %5632 = vmatpush2.bf16.msra.mxu0 %v7959_v10  ;;  %5710 = vmatpush2.bf16.msra.mxu1 %v7962_v53  ;;  %v8040_v10 = vld [vmem:[%s10700_s5 + $0x408] ss:$16 sps:$4 sm:$0xff]   ;;  %v8045_v53 = vld [vmem:[%s10700_s5 + $0x3ac] ss:$16 sps:$4 sm:$0xff]  }
 0x4bf   : > { %5633 = vmatprep.subr.bf16.mxu0 %v7967_v57  ;;  %5711 = vmatprep.subr.bf16.mxu1 %v7970_v31  ;;  %v8048_v57 = vld [vmem:[%s10700_s5 + $0x5ec] ss:$16 sps:$4 sm:$0xff]   ;;  %v8043_v31 = vld [vmem:[%s10700_s5 + $0x3a8] ss:$16 sps:$4 sm:$0xff]  }
 0x4c2   : > { %5634 = vmatpush2.bf16.msra.mxu0 %v7965_v44  ;;  %5712 = vmatpush2.bf16.msra.mxu1 %v7968_v22  ;;  %v8046_v44 = vld [vmem:[%s10700_s5 + $0x5e8] ss:$16 sps:$4 sm:$0xff]   ;;  %v8051_v22 = vld [vmem:[%s10700_s5 + $0x38c] ss:$16 sps:$4 sm:$0xff]  }
 0x4c3   : > { %5635 = vmatprep.subr.bf16.mxu0 %v7973_v49  ;;  %5713 = vmatprep.subr.bf16.mxu1 %v7976_v52  ;;  %v8054_v49 = vld [vmem:[%s10700_s5 + $0x5cc] ss:$16 sps:$4 sm:$0xff]   ;;  %v8049_v52 = vld [vmem:[%s10700_s5 + $0x388] ss:$16 sps:$4 sm:$0xff]  }
 0x4c6   : > { %5636 = vmatpush2.bf16.msra.mxu0 %v7971_v56  ;;  %5714 = vmatpush2.bf16.msra.mxu1 %v7974_v63  ;;  %v8052_v56 = vld [vmem:[%s10700_s5 + $0x5c8] ss:$16 sps:$4 sm:$0xff]   ;;  %v8057_v63 = vld [vmem:[%s10700_s5 + $0x36c] ss:$16 sps:$4 sm:$0xff]  }
 0x4c7   : > { %5637 = vmatprep.subr.bf16.mxu0 %v7979_v24  ;;  %5715 = vmatprep.subr.bf16.mxu1 %v7982_v5  ;;  %v8060_v24 = vld [vmem:[%s10700_s5 + $0x5ac] ss:$16 sps:$4 sm:$0xff]   ;;  %v8055_v5 = vld [vmem:[%s10700_s5 + $0x368] ss:$16 sps:$4 sm:$0xff]  }
 0x4ca   : > { %5638 = vmatpush2.bf16.msra.mxu0 %v7977_v6  ;;  %5716 = vmatpush2.bf16.msra.mxu1 %v7980_v59  ;;  %v8063_v6 = vld [vmem:[%s10700_s5 + $0x34c] ss:$16 sps:$4 sm:$0xff]  }
 0x4cb   : > { %5717 = vmatprep.subr.bf16.mxu1 %v7985_v18  ;;  %5730 = vmatprep.subr.bf16.mxu0 %v7988_v0  ;;  %v8066_v59 = vld [vmem:[%s10700_s5 + $0x58c] ss:$16 sps:$4 sm:$0xff]   ;;  %v8064_v18 = vld [vmem:[%s10700_s5 + $0x588] ss:$16 sps:$4 sm:$0xff]  }
 0x4cc   : > { %v8069_v0 = vld [vmem:[%s10700_s5 + $0x32c] ss:$16 sps:$4 sm:$0xff]  }
 0x4cd   : > { %5640 = vmatmul.mubr.bf16.vlgmr.msra.gmra.mxu0 %v10334_v36 }
 0x4ce   : > { %5718 = vmatpush2.bf16.msra.mxu1 %v7983_v43  ;;  %5731 = vmatpush1.bf16.msra.mxu0 %v7986_v47  ;;  %v8067_v43 = vld [vmem:[%s10700_s5 + $0x328] ss:$16 sps:$4 sm:$0xff]  }
 0x4cf   : > { %5762 = vmatprep.mubr.bf16.mxu0 %v10113_v13  ;;  %5719 = vmatprep.subr.bf16.mxu1 %v7991_v23  ;;  %v7998_v13 = vld [vmem:[%s10700_s5 + $0x4e8] ss:$16 sps:$4 sm:$0xff]   ;;  %v8075_v23 = vld [vmem:[%s10700_s5 + $0x30c] ss:$16 sps:$4 sm:$0xff]  }
 0x4d0   : > { %5732 = vmatprep.subr.bf16.mxu0 %v7994_v38  ;;  %v8070_v47 = vld [vmem:[%s10700_s5 + $0x568] ss:$16 sps:$4 sm:$0xff]   ;;  %v8078_v38 = vld [vmem:[%s10700_s5 + $0x54c] ss:$16 sps:$4 sm:$0xff]  }
 0x4d2   : > { %5720 = vmatpush2.bf16.msra.mxu1 %v7989_v11  ;;  %5733 = vmatpush1.bf16.msra.mxu0 %v7992_v48  ;;  %v8073_v11 = vld [vmem:[%s10700_s5 + $0x308] ss:$16 sps:$4 sm:$0xff]  }
 0x4d3   : > { %5734 = vmatprep.subr.bf16.mxu0 %v7997_v54  ;;  %5771 = vmatprep.subr.bf16.mxu1 %v8000_v34  ;;  %v8076_v48 = vld [vmem:[%s10700_s5 + $0x548] ss:$16 sps:$4 sm:$0xff]   ;;  %v8081_v54 = vld [vmem:[%s10700_s5 + $0x52c] ss:$16 sps:$4 sm:$0xff]  }
 0x4d4   : > { %v8084_v34 = vld [vmem:[%s10700_s5 + $0x62c] ss:$16 sps:$4 sm:$0xff]  }
 0x4d5   : > { %5722 = vmatmul.mubr.bf16.vlgmr.msra.gmra.mxu1 %v10121_v8  ;;  %v8012_v8 = vld [vmem:[%s10700_s5 + $0x4ac] ss:$16 sps:$4 sm:$0xff]  }
 0x4d6   : > { %5735 = vmatpush1.bf16.msra.mxu0 %v7995_v42  ;;  %5772 = vmatpush1.bf16.msra.mxu1 %v7998_v13  ;;  %v8079_v42 = vld [vmem:[%s10700_s5 + $0x528] ss:$16 sps:$4 sm:$0xff]  }
 0x4d7   : > { %5803 = vmatprep.mubr.bf16.mxu1 %v10145_v28  ;;  %5736 = vmatprep.subr.bf16.mxu0 %v8003_v20  ;;  %v8010_v28 = vld [vmem:[%s10700_s5 + $0x4a8] ss:$16 sps:$4 sm:$0xff]   ;;  %v8087_v20 = vld [vmem:[%s10700_s5 + $0x50c] ss:$16 sps:$4 sm:$0xff]  }
 0x4d8   : > { %5773 = vmatprep.subr.bf16.mxu1 %v8006_v50  ;;  %v8082_v13 = vld [vmem:[%s10700_s5 + $0x628] ss:$16 sps:$4 sm:$0xff]   ;;  %v8090_v50 = vld [vmem:[%s10700_s5 + $0x60c] ss:$16 sps:$4 sm:$0xff]  }
 0x4da   : > { %5737 = vmatpush1.bf16.msra.mxu0 %v8001_v33  ;;  %5774 = vmatpush1.bf16.msra.mxu1 %v8004_v17  ;;  %v8085_v33 = vld [vmem:[%s10700_s5 + $0x508] ss:$16 sps:$4 sm:$0xff]  }
 0x4db   : > { %5738 = vmatprep.subr.bf16.mxu0 %v8009_v60  ;;  %5775 = vmatprep.subr.bf16.mxu1 %v8012_v8  ;;  %v8088_v17 = vld [vmem:[%s10700_s5 + $0x608] ss:$16 sps:$4 sm:$0xff]   ;;  %v8093_v8 = vld [vmem:[%s10702_s7 + $0x70] sm:$0xff]  }
 0x4dc   : > { %v8091_v60 = vld [vmem:[%s10702_s7 + $0x78] sm:$0xff]  }
 0x4de   : > { %5739 = vmatpush1.bf16.msra.mxu0 %v8007_v32  ;;  %5776 = vmatpush1.bf16.msra.mxu1 %v8010_v28  ;;  %v8095_v32 = vld [vmem:[%s10702_s7 + $0x68] sm:$0xff]  }
 0x4df   : > { %5740 = vmatprep.subr.bf16.mxu0 %v8015_v9  ;;  %5777 = vmatprep.subr.bf16.mxu1 %v8018_v35  ;;  %v8096_v28 = vld [vmem:[%s10702_s7 + $0x28] sm:$0xff]   ;;  %v8108_v9 = vld [vmem:[%s10702_s7 + $0xb8] sm:$0xff]   ;;  %v8109_v35 = vld [vmem:[%s10702_s7 + $0xf0] sm:$0xff]  }
 0x4e2   : > { %5741 = vmatpush1.bf16.msra.mxu0 %v8013_v27  ;;  %5778 = vmatpush1.bf16.msra.mxu1 %v8016_v62  ;;  %v8098_v27 = vld [vmem:[%s10702_s7 + $0x20] sm:$0xff]   ;;  %v8110_v62 = vld [vmem:[%s10702_s7 + $0xb0] sm:$0xff]  }
 0x4e3   : > { %5742 = vmatprep.subr.bf16.mxu0 %v8021_v51  ;;  %5779 = vmatprep.subr.bf16.mxu1 %v8024_v30  ;;  %v8099_v51 = vld [vmem:[%s10702_s7 + $0x58] sm:$0xff]   ;;  %v8111_v30 = vld [vmem:[%s10702_s7 + $0xe8] sm:$0xff]  }
 0x4e6   : > { %5743 = vmatpush1.bf16.msra.mxu0 %v8019_v14  ;;  %5780 = vmatpush1.bf16.msra.mxu1 %v8022_v40  ;;  %v8100_v14 = vld [vmem:[%s10702_s7 + $0x18] sm:$0xff]   ;;  %v8112_v40 = vld [vmem:[%s10702_s7 + $0xa8] sm:$0xff]  }
 0x4e7   : > { %5744 = vmatprep.subr.bf16.mxu0 %v8027_v1  ;;  %5781 = vmatprep.subr.bf16.mxu1 %v8030_v19  ;;  %v8101_v1 = vld [vmem:[%s10702_s7 + $0x50] sm:$0xff]  }
 0x4e8   : > { %v8102_v19 = vld [vmem:[%s10702_s7 + $0x10] sm:$0xff]  }
 0x4ea   : > { %5745 = vmatpush1.bf16.msra.mxu0 %v8025_v46  ;;  %5782 = vmatpush1.bf16.msra.mxu1 %v8028_v26  ;;  %v8103_v46 = vld [vmem:[%s10702_s7 + $0x48] sm:$0xff]  }
 0x4eb   : > { %5746 = vmatprep.subr.bf16.mxu0 %v8033_v61  ;;  %5783 = vmatprep.subr.bf16.mxu1 %v8036_v15  ;;  %v8104_v26 = vld [vmem:[%s10702_s7 + $0x8] sm:$0xff]   ;;  %v8105_v61 = vld [vmem:[%s10702_s7 + $0x40] sm:$0xff]  }
 0x4ec   : > { %v8106_v15 = vld [vmem:[%s10702_s7] sm:$0xff]  }
 0x4ee   : > { %5747 = vmatpush2.bf16.msra.mxu0 %v8031_v21  ;;  %5784 = vmatpush1.bf16.msra.mxu1 %v8034_v7 }
 0x4ef   : > { %5748 = vmatprep.subr.bf16.mxu0 %v8039_v39  ;;  %5785 = vmatprep.subr.bf16.mxu1 %v8042_v29  ;;  %v8113_v39 = vld [vmem:[%s10702_s7 + $0xe0] sm:$0xff]  }
 0x4f0   : > { %v8114_v29 = vld [vmem:[%s10702_s7 + $0xa0] sm:$0xff]  }
 0x4f2   : > { %5749 = vmatpush2.bf16.msra.mxu0 %v8037_v2  ;;  %5786 = vmatpush1.bf16.msra.mxu1 %v8040_v10 }
 0x4f3   : > { %5750 = vmatprep.subr.bf16.mxu0 %v8045_v53  ;;  %5787 = vmatprep.subr.bf16.mxu1 %v8048_v57 }
 0x4f6   : > { %5751 = vmatpush2.bf16.msra.mxu0 %v8043_v31  ;;  %5788 = vmatpush2.bf16.msra.mxu1 %v8046_v44  ;;  %v8115_v31 = vld [vmem:[%s10702_s7 + $0xd8] sm:$0xff]  }
 0x4f7   : > { %5752 = vmatprep.subr.bf16.mxu0 %v8051_v22  ;;  %5789 = vmatprep.subr.bf16.mxu1 %v8054_v49  ;;  %v8116_v44 = vld [vmem:[%s10702_s7 + $0x98] sm:$0xff]  }
 0x4fa   : > { %5753 = vmatpush2.bf16.msra.mxu0 %v8049_v52  ;;  %5790 = vmatpush2.bf16.msra.mxu1 %v8052_v56 }
 0x4fb   : > { %5754 = vmatprep.subr.bf16.mxu0 %v8057_v63  ;;  %5791 = vmatprep.subr.bf16.mxu1 %v8060_v24 }
 0x4fe   : > { %5755 = vmatpush2.bf16.msra.mxu0 %v8055_v5  ;;  %5792 = vmatpush2.bf16.msra.mxu1 %v8058_v25  ;;  %v8117_v5 = vld [vmem:[%s10702_s7 + $0xd0] sm:$0xff]  }
 0x4ff   : > { %5756 = vmatprep.subr.bf16.mxu0 %v8063_v6  ;;  %5793 = vmatprep.subr.bf16.mxu1 %v8066_v59  ;;  %v8118_v25 = vld [vmem:[%s10702_s7 + $0x90] sm:$0xff]   ;;  %v8119_v6 = vld [vmem:[%s10702_s7 + $0xc8] sm:$0xff]  }
 0x500   : > { %v8120_v59 = vld [vmem:[%s10702_s7 + $0x88] sm:$0xff]  }
 0x502   : > { %5757 = vmatpush2.bf16.msra.mxu0 %v8061_v55  ;;  %5794 = vmatpush2.bf16.msra.mxu1 %v8064_v18  ;;  %v8121_v55 = vld [vmem:[%s10702_s7 + $0xc0] sm:$0xff]  }
 0x503   : > { %5758 = vmatprep.subr.bf16.mxu0 %v8069_v0  ;;  %5795 = vmatprep.subr.bf16.mxu1 %v8072_v45  ;;  %v8122_v18 = vld [vmem:[%s10702_s7 + $0x80] sm:$0xff]  }
 0x504   : > { %v4499_v0 = vld [vmem:[%s10701_s6] sm:$0xf] }
 0x505   : > { %v5504_v45 = vrot.slane %v4499_v0, %v8812_v58 }
 0x506   : > { %5759 = vmatpush2.bf16.msra.mxu0 %v8067_v43  ;;  %5796 = vmatpush2.bf16.msra.mxu1 %v8070_v47  ;;  %v5508_v43 = vrot.slane %v4499_v0, %v8815_v16 }
 0x507   : > { %5760 = vmatprep.subr.bf16.mxu0 %v8075_v23  ;;  %5797 = vmatprep.subr.bf16.mxu1 %v8078_v38 }
 0x50a   : > { %5761 = vmatpush2.bf16.msra.mxu0 %v8073_v11  ;;  %5798 = vmatpush2.bf16.msra.mxu1 %v8076_v48 }
 0x50b   : > { %5799 = vmatprep.subr.bf16.mxu1 %v8081_v54  ;;  %5824 = vmatprep.subr.bf16.mxu0 %v8084_v34 }
 0x50d   : > { %5763 = vmatmul.mubr.bf16.vlgmr.msra.gmra.mxu0 %v10111_v4  ;;  %v8092_v4 = vld [vmem:[%s10702_s7 + $0x38] sm:$0xff]  }
 0x50e   : > { %5800 = vmatpush2.bf16.msra.mxu1 %v8079_v42  ;;  %5825 = vmatpush1.bf16.msra.mxu0 %v8082_v13 }
 0x50f   : > { %5801 = vmatprep.subr.bf16.mxu1 %v8087_v20  ;;  %5826 = vmatprep.subr.bf16.mxu0 %v8090_v50 }
 0x510   : > { %5844 = vmatprep.mubr.bf16.mxu0 %v8185_v3  ;;  %v8094_v3 = vld [vmem:[%s10702_s7 + $0x30] sm:$0xff]  }
 0x512   : > { %5802 = vmatpush2.bf16.msra.mxu1 %v8085_v33  ;;  %5827 = vmatpush1.bf16.msra.mxu0 %v8088_v17 }
 0x513   : > { %7184 = vmatprep.subr.bf16.mxu0 %v8091_v60 }
 0x515   : > { %5804 = vmatmul.mubr.bf16.vlgmr.msra.gmra.mxu1 %v10334_v36  ;;  %7146 = vmatmul.mubr.msk.bf16.vlgmr.msra.gmra.mxu0 %vm5521_vm1, %v10157_v12  ;;  %v8097_v36 = vld [vmem:[%s10702_s7 + $0x60] sm:$0xff]   ;;  %v8107_v12 = vld [vmem:[%s10702_s7 + $0xf8] ss:$0 sps:$4 sm:$0x33]  }
 0x516   : > { %7185 = vmatpush3.bf16.msra.mxu0 %v8092_v4  ;;  %7228 = vmatprep.subr.msk.bf16.mxu1 %vm6118_vm2, %v8107_v12  ;;  %v5512_v12 = vrot.slane %v4499_v0, %v8844_v37 }
 0x517   : > { %7186 = vmatprep.subr.bf16.mxu0 %v8093_v8  ;;  %7207 = vmatpush3.bf16.msra.mxu1 %v8108_v9 }
 0x518   : > { %7208 = vmatprep.subr.bf16.mxu1 %v8109_v35 }
 0x51a   : > { %7187 = vmatpush3.bf16.msra.mxu0 %v8094_v3 }
 0x51b   : > { %7188 = vmatprep.subr.bf16.mxu0 %v8095_v32  ;;  %7209 = vmatpush3.bf16.msra.mxu1 %v8110_v62 }
 0x51c   : > { %7210 = vmatprep.subr.bf16.mxu1 %v8111_v30 }
 0x51e   : > { %7189 = vmatpush3.bf16.msra.mxu0 %v8096_v28  ;;  %v5515_v28 = vsub.s32 3, %v8809_v41 }
 0x51f   : > { %7190 = vmatprep.subr.bf16.mxu0 %v8097_v36  ;;  %7211 = vmatpush3.bf16.msra.mxu1 %v8112_v40 }
 0x520   : > { %7212 = vmatprep.subr.bf16.mxu1 %v8113_v39  ;;  %v5516_v35 = vrot.slane %v4499_v0, %v5515_v28 }
 0x522   : > { %7191 = vmatpush3.bf16.msra.mxu0 %v8098_v27 }
 0x523   : > { %7192 = vmatprep.subr.bf16.mxu0 %v8099_v51  ;;  %7213 = vmatpush3.bf16.msra.mxu1 %v8114_v29 }
 0x524   : > { %7214 = vmatprep.subr.bf16.mxu1 %v8115_v31 }
 0x526   : > { %7193 = vmatpush3.bf16.msra.mxu0 %v8100_v14 }
 0x527   : > { %7194 = vmatprep.subr.bf16.mxu0 %v8101_v1  ;;  %7215 = vmatpush3.bf16.msra.mxu1 %v8116_v44 }
 0x528   : > { %7216 = vmatprep.subr.bf16.mxu1 %v8117_v5 }
 0x52a   : > { %7195 = vmatpush3.bf16.msra.mxu0 %v8102_v19 }
 0x52b   : > { %7196 = vmatprep.subr.bf16.mxu0 %v8103_v46  ;;  %7217 = vmatpush3.bf16.msra.mxu1 %v8118_v25 }
 0x52c   : > { %7218 = vmatprep.subr.bf16.mxu1 %v8119_v6 }
 0x52e   : > { %7197 = vmatpush3.bf16.msra.mxu0 %v8104_v26 }
 0x52f   : > { %7198 = vmatprep.subr.bf16.mxu0 %v8105_v61  ;;  %7219 = vmatpush3.bf16.msra.mxu1 %v8120_v59 }
 0x530   : > { %7220 = vmatprep.subr.bf16.mxu1 %v8121_v55 }
 0x532   : > { %7199 = vmatpush3.bf16.msra.mxu0 %v8106_v15 }
 0x533   : > { %7221 = vmatpush3.bf16.msra.mxu1 %v8122_v18 }
 0x54d   : > { %v5559_v21 = vpop.f32.mrf.mxu0  ;;  %v5600_v7 = vpop.f32.mrf.mxu1 }
 0x54e   : > { %v5560_v47 = vadd.f32 %v5559_v21, %v5504_v45 }
 0x54f   : > { %v5561_v2 = vpop.f32.mrf.mxu0  ;;  %v5602_v10 = vpop.f32.mrf.mxu1 }
 0x550   : > { %v5562_v23 = vadd.f32 %v5561_v2, %v5508_v43  ;;  %v5601_v38 = vadd.f32 %v5600_v7, %v5560_v47 }
 0x551   : > { %v5563_v53 = vpop.f32.mrf.mxu0  ;;  %v5604_v57 = vpop.f32.mrf.mxu1 }
 0x552   : > { %v5603_v48 = vadd.f32 %v5602_v10, %v5562_v23 }
 0x553   : > { %v5564_v22 = vpop.f32.mrf.mxu0  ;;  %v5605_v49 = vpop.f32.mrf.mxu1 }
 0x555   : > { %v5682_v52 = vpop.f32.mrf.mxu1 }
 0x557   : > { %v5684_v56 = vpop.f32.mrf.mxu1 }
 0x559   : > { %v5686_v63 = vpop.f32.mrf.mxu1 }
 0x55b   : > { %v5687_v24 = vpop.f32.mrf.mxu1 }
 0x58d   : > { %v5641_v11 = vpop.f32.mrf.mxu0 }
 0x58e   : > { %v5642_v54 = vadd.f32 %v5641_v11, %v5601_v38 }
 0x58f   : > { %v5643_v34 = vpop.f32.mrf.mxu0 }
 0x590   : > { %v5683_v42 = vadd.f32 %v5682_v52, %v5642_v54  ;;  %v5644_v13 = vadd.f32 %v5643_v34, %v5603_v48 }
 0x591   : > { %v5645_v20 = vpop.f32.mrf.mxu0 }
 0x592   : > { %v5685_v50 = vadd.f32 %v5684_v56, %v5644_v13  ;;  %v5853_v33 = vmax.f32 %v5683_v42, 0.0  ;;  %v5924_v56 = vld [vmem:[%s10703_s8] sm:$0x1] }
 0x593   : > { %v5646_v17 = vpop.f32.mrf.mxu0 }
 0x594   : > { %v5854_v60 = vmax.f32 %v5685_v50, 0.0  ;;  %v5857_v3 = vpack.c.bf16 %v5853_v33, %v5853_v33 }
 0x595   : > { %v5723_v4 = vpop.f32.mrf.mxu1 }
 0x596   : > { %v5858_v8 = vpack.c.bf16 %v5854_v60, %v5854_v60  ;;  %v5724_v62 = vadd.f32 %v5723_v4, %v5512_v12 }
 0x597   : > { %v5725_v58 = vpop.f32.mrf.mxu1 }
 0x598   : > { %6154 = vmatprep.mubr.bf16.mxu0 %v5858_v8  ;;  %v5726_v30 = vadd.f32 %v5725_v58, %v5516_v35 }
 0x599   : > { %v5727_v16 = vpop.f32.mrf.mxu1  ;;  %6155 = vmatmul.mubr.bf16.vlgmr.msra.gmra.mxu0 %v5857_v3 }
 0x59b   : > { %v5728_v32 = vpop.f32.mrf.mxu1 }
 0x5cd   : > { %v5764_v36 = vpop.f32.mrf.mxu0 }
 0x5ce   : > { %v5765_v14 = vadd.f32 %v5764_v36, %v5724_v62 }
 0x5cf   : > { %v5766_v9 = vpop.f32.mrf.mxu0 }
 0x5d0   : > { %v5767_v19 = vadd.f32 %v5766_v9, %v5726_v30 }
 0x5d1   : > { %v5768_v27 = vpop.f32.mrf.mxu0 }
 0x5d3   : > { %v5769_v51 = vpop.f32.mrf.mxu0 }
 0x5d5   : > { %v5805_v40 = vpop.f32.mrf.mxu1  ;;  %v5846_v1 = vpop.f32.mrf.mxu0 }
 0x5d6   : > { %v5806_v46 = vadd.f32 %v5805_v40, %v5765_v14 }
 0x5d7   : > { %v5807_v26 = vpop.f32.mrf.mxu1  ;;  %v5848_v61 = vpop.f32.mrf.mxu0 }
 0x5d8   : > { %v5847_v15 = vadd.f32 %v5846_v1, %v5806_v46  ;;  %v5808_v21 = vadd.f32 %v5807_v26, %v5767_v19 }
 0x5d9   : > { %v5809_v7 = vpop.f32.mrf.mxu1  ;;  %v5850_v41 = vpop.f32.mrf.mxu0 }
 0x5da   : > { %v5849_v39 = vadd.f32 %v5848_v61, %v5808_v21  ;;  %v5855_v37 = vmax.f32 %v5847_v15, 0.0 }
 0x5db   : > { %v5810_v29 = vpop.f32.mrf.mxu1  ;;  %v5851_v2 = vpop.f32.mrf.mxu0 }
 0x5dc   : > { %v5856_v10 = vmax.f32 %v5849_v39, 0.0  ;;  %v5859_v57 = vpack.c.bf16 %v5855_v37, %v5855_v37 }
 0x5de   : > { %v5860_v53 = vpack.c.bf16 %v5856_v10, %v5856_v10 }
 0x5e0   : > { %7179 = vmatprep.mubr.msk.bf16.mxu1 %vm6114_vm3, %v5860_v53 }
 0x5e1   : > { %6195 = vmatmul.mubr.bf16.vlgmr.msra.gmra.mxu1 %v5859_v57 }
 0x659   : > { %v7200_v31 = vpop.f32.mrf.mxu0 }
 0x65b   : > { %v7201_v44 = vpop.f32.mrf.mxu0 }
 0x65c   : > { %v7202_v22 = vadd.f32 %v7201_v44, %v7200_v31 }
 0x65d   : > { %v7203_v49 = vpop.f32.mrf.mxu0 }
 0x65e   : > { %v6157_v5 = vadd.f32 %v7202_v22, %v5924_v56 }
 0x65f   : > { %v7204_v52 = vpop.f32.mrf.mxu0 }
 0x6a1   : > { %v7222_v63 = vpop.f32.mrf.mxu1 }
 0x6a3   : > { %v7223_v24 = vpop.f32.mrf.mxu1 }
 0x6a4   : > { %v7224_v25 = vadd.f32 %v7223_v24, %v7222_v63 }
 0x6a5   : > { %v7225_v6 = vpop.f32.mrf.mxu1 }
 0x6a6   : > { %v6197_v59 = vadd.f32 %v7224_v25, %v6157_v5 }
 0x6a7   : > { %v7226_v55 = vpop.f32.mrf.mxu1 }
 0x6a8   : > { %6202 = vst [vmem:[%s324_s27] sm:$0x1] %v6197_v59 }
 0x6a9   : > { %8136 = shalt.err (!%p8133_p3)
}
 0x6aa   : > { %s8137_s28 = scalar_lea.hbm %s10660_s22, 16  ;;  %s8141_s14 = scalar_lea.hbm %s10704_s9, 32 }
 0x6ab   : > { %p8138_p4 = scmp.ne.s32.totalorder %s10660_s22, %s8137_s28  ;;  %p8142_p9 = scmp.lt.s32.totalorder %s10660_s22, %s10704_s9 }
 0x6ac   : > { %p8143_p10 = scmp.lt.s32.totalorder %s8141_s14, %s8137_s28 }
 0x6ad   : > { %p8139_p7 = pnand %p8138_p4, %p8282_p5 }
 0x6ae   : > { %p8144_p11 = por %p8143_p10, %p8142_p9 }
 0x6af   : > { %p8140_p8 = pneg %p8139_p7 }
 0x6b1   : > { %p8145_p12 = pnand %p8144_p11, %p8140_p8 }
 0x6b3   : > { %8148 = shalt.err (!%p8145_p12)
}
 0x6b4   : > { %7229 = dma.vmem_to_hbm [thread:$0]  (%p8282_p5), %s6217_s16, 16, %s10660_s22, %s6204_s23  }
 0x6b5 PF: > { %p7235_p13 = scmp.ge.s32.totalorder %s8183_s12, 2  ;;  %s6228_s21 = sand.u32 1, %s8171_s30  }
 0x6b6   : > { %s6229_s24 = scalar_lea.sflag [#allocation3], %s6228_s21 }
 0x6b7   : > { %p7232_p0 = pnand %p7235_p13, %p8286_p6 }
 0x6b9   : > { %p7233_p1 = pneg %p7232_p0 }
 0x6bb   : > { %8166 = dma.done.wait (%p7233_p1), %s6229_s24, 16  }
 0x6bc   : > { %8168 = vsyncadd (%p7233_p1), %s6229_s24, 4294967280  ;;  %s10708_s13 = sld [smem:[#allocation5_spill]]  ;;  %p19_p2 = scmp.ge.s32.totalorder %s8269_s15, 4  }
 0x6bd   : > { %s10709_s30 = smov %s8175_s10  ;;  %s10710_s10 = smov %s8179_s11 }
 0x6be   : > { %s10712_s12 = smov %s8269_s15  ;;  %21 = sbr.rel (!%p19_p2) target bundleno = 3 (0x3), region = 99 }
 0x6c2   : > { %s10711_s11 = smov %s10708_s13 }
 0x6c3   :  { %6233 = vsyncpa [#allocation3], 1 }
 0x6c4   :  { %6235 = vsyncpa [#allocation3 + $0x1], 1 }

</bundles_post_ra>
